<compile_context>
chip_gen: v7x
topology: tpu7x:2x2x1
jax: 0.10.0
libtpu: 0.0.40
codegen_flags: <defaults>
</compile_context>

<pallas_src>
import functools

import jax
import jax.numpy as jnp
from jax.experimental import pallas as pl
from jax.experimental.pallas import tpu as pltpu

ORTH_PENALTY_ROLE = "orth_penalty_role"
ORTH_PENALTY_FILLER = "orth_penalty_filler"
ROLE_RANK = "role_rank"
FILLER_RANK = "filler_rank"


def _round_up(x: int, m: int) -> int:
    return ((x + m - 1) // m) * m


# ----------------------------------------------------------------------------
# Fused kernel: per-slot TPR bindings + slot-sum + semi-orthogonality penalties
# ----------------------------------------------------------------------------
def _bind_kernel(cls_ref, ghi_ref, gmid_ref, glo_ref, rt_ref, rolew_ref,
                 fillw_ref, bind_ref, sum_ref, pen_r_ref, pen_f_ref):
    # cls_ref   : (TB, S)  int32   filler class index per (batch row, slot)
    # g*_ref    : (NF, Kp) bf16    exact 3-way split of G[v, f*D_R+r]=filler_w[v,f]
    # rt_ref    : (S,  Kp) f32     RT[s, f*D_R+r] = role_w[s, r]
    # rolew_ref : (S,  D_R) f32    raw role weights (for the penalty)
    # fillw_ref : (NF, D_F) f32    raw filler weights (for the penalty)
    # bind_ref  : (TB, Kp) f32     bindings for this (batch block, slot)
    # sum_ref   : (TB, Kp) f32     running sum over slots (resident accumulator)
    # pen_*_ref : (1, 1)  f32      ||I - W W^T||_F for roles / fillers
    s_id = pl.program_id(1)
    tb, s_total = cls_ref.shape
    nf, kp = ghi_ref.shape

    # Select the class column of the current slot with a lane mask + reduce
    # (pure VPU; avoids dynamic lane slicing and any narrow-column input).
    c = cls_ref[...]                                                    # (TB, S)
    slot_mask = jax.lax.broadcasted_iota(jnp.int32, (tb, s_total), 1) == s_id
    c_col = jnp.sum(jnp.where(slot_mask, c, 0), axis=1, keepdims=True)  # (TB, 1)

    # One-hot is exact in bf16; each DEFAULT-precision pass selects one bf16
    # component of G, and hi + mid + lo == G exactly in f32.
    onehot = (c_col == jax.lax.broadcasted_iota(jnp.int32, (tb, nf), 1))
    onehot = onehot.astype(jnp.bfloat16)                                # (TB, NF)
    dn = (((1,), (0,)), ((), ()))
    fe = (jax.lax.dot_general(onehot, ghi_ref[...], dn,
                              preferred_element_type=jnp.float32)
          + jax.lax.dot_general(onehot, gmid_ref[...], dn,
                                preferred_element_type=jnp.float32)
          + jax.lax.dot_general(onehot, glo_ref[...], dn,
                                preferred_element_type=jnp.float32))    # (TB, Kp)

    # Pick role row s of RT with a sublane mask + reduce (tiny; avoids any
    # dynamic-slice lowering risk), then bind.
    row_mask = (jax.lax.broadcasted_iota(jnp.int32, (s_total, kp), 0)
                == s_id).astype(jnp.float32)
    rt_row = jnp.sum(rt_ref[...] * row_mask, axis=0, keepdims=True)     # (1, Kp)
    bind = fe * rt_row                                                  # (TB, Kp)
    bind_ref[...] = bind

    @pl.when(s_id == 0)
    def _():
        sum_ref[...] = bind

    @pl.when(s_id > 0)
    def _():
        sum_ref[...] = sum_ref[...] + bind

    # Semi-orthogonality penalties, fused (tiny; recomputed once per batch
    # block so every core writes the same, correct value).
    @pl.when(s_id == 0)
    def _():
        def fro_pen(w):
            g = jax.lax.dot_general(
                w, w, (((1,), (1,)), ((), ())),
                precision=jax.lax.Precision.HIGHEST,
                preferred_element_type=jnp.float32)                     # (n, n)
            n = g.shape[0]
            eye = (jax.lax.broadcasted_iota(jnp.int32, (n, n), 0)
                   == jax.lax.broadcasted_iota(jnp.int32, (n, n), 1)
                   ).astype(jnp.float32)
            d = eye - g
            return jnp.sqrt(jnp.sum(jnp.sum(d * d, axis=1, keepdims=True),
                                    axis=0, keepdims=True))             # (1, 1)

        pen_r_ref[...] = fro_pen(rolew_ref[...])
        pen_f_ref[...] = fro_pen(fillw_ref[...])


# ----------------------------------------------------------------------------
# Generation-aware block planning
# ----------------------------------------------------------------------------
def _plan_blocks(n: int, s: int, kp: int, nf: int, dr: int, df: int):
    try:
        cap = int(pltpu.get_tpu_info().vmem_capacity_bytes)
    except Exception:
        cap = 64 * 1024 * 1024          # conservative (v7x-sized) fallback
    vmem_limit = min(96 * 1024 * 1024, (cap * 3) // 4)

    lanes_s = _round_up(s, 128)
    lanes_nf = _round_up(nf, 128)
    # Bytes that scale with TB (per batch row): double-buffered outputs,
    # class block and in-kernel temps.
    per_row = (2 * 4 * kp               # bindings output block (double buffer)
               + 2 * 4 * kp             # slot-sum accumulator (x2 for safety)
               + 2 * 4 * lanes_s        # class block, int32, lane padded, x2
               + 2 * lanes_nf           # bf16 one-hot temp
               + 3 * 4 * kp)            # fe / bind / add temps
    # Resident bytes independent of TB (tables counted with x2 buffering).
    fixed = (2 * 3 * nf * kp * 2                                  # g_hi/mid/lo
             + 2 * 4 * s * kp                                     # RT
             + 2 * 4 * (s * _round_up(dr, 128) + nf * _round_up(df, 128))
             + 4 * 1024 * 1024)                                   # margin
    budget = vmem_limit - fixed
    if budget < per_row * 8:            # degenerate: huge tables
        vmem_limit = min(max(cap - 8 * 1024 * 1024, 8 * 1024 * 1024),
                         fixed + per_row * 8)
        budget = per_row * 8

    n8 = _round_up(max(n, 1), 8)
    tb = max(8, min(8192, (budget // per_row) // 8 * 8, n8))
    num_blocks = pl.cdiv(n8, tb)
    # Prefer an even block count when >1 (v7x megacore), but never force a
    # split of a batch that already fits in one block (v5e/v6e single TC).
    if num_blocks > 1 and num_blocks % 2 == 1:
        tb2 = _round_up(pl.cdiv(n8, num_blocks + 1), 8)
        nb2 = pl.cdiv(n8, tb2)
        if nb2 % 2 == 0:
            tb, num_blocks = tb2, nb2
    return tb, num_blocks, int(vmem_limit)


# ----------------------------------------------------------------------------
# Wrapper: gather + TPR bindings + slot sum + penalties in one launch
# ----------------------------------------------------------------------------
def tpr_bindings(gt_factor_classes: jax.Array, role_w: jax.Array,
                 filler_w: jax.Array):
    N, S = gt_factor_classes.shape
    n_fillers, DF = filler_w.shape
    n_roles, DR = role_w.shape
    assert S == n_roles
    K = DF * DR
    Kp = _round_up(K, 128)

    rw = role_w.astype(jnp.float32)
    fw = filler_w.astype(jnp.float32)

    # Expanded lookup tables (weights-sized), lane padded to Kp.
    g = jnp.repeat(fw, DR, axis=1)                # (NF, K): G[v,f*DR+r]=fw[v,f]
    rt = jnp.tile(rw, (1, DF))                    # (S,  K): RT[s,f*DR+r]=rw[s,r]
    if Kp != K:
        g = jnp.pad(g, ((0, 0), (0, Kp - K)))
        rt = jnp.pad(rt, ((0, 0), (0, Kp - K)))
    # Exact 3-way bf16 split of G (hi + mid + lo == G in f32).
    g_hi = g.astype(jnp.bfloat16)
    r1 = g - g_hi.astype(jnp.float32)
    g_mid = r1.astype(jnp.bfloat16)
    g_lo = (r1 - g_mid.astype(jnp.float32)).astype(jnp.bfloat16)

    tb, num_blocks, vmem_limit = _plan_blocks(N, S, Kp, n_fillers, DR, DF)
    n_pad = tb * num_blocks
    cls = gt_factor_classes.astype(jnp.int32)
    if n_pad != N:
        cls = jnp.pad(cls, ((0, n_pad - N), (0, 0)))

    flops = int(2 * n_pad * S * n_fillers * Kp * 3 + 2 * n_pad * S * Kp)
    bytes_accessed = int(4 * n_pad * S * Kp + 4 * n_pad * Kp + 4 * n_pad * S
                         + 3 * 2 * n_fillers * Kp + 4 * S * Kp
                         + 4 * (S * DR + n_fillers * DF) + 8)

    bind2d, bsum, pen_r, pen_f = pl.pallas_call(
        _bind_kernel,
        out_shape=(
            jax.ShapeDtypeStruct((n_pad, S * Kp), jnp.float32),
            jax.ShapeDtypeStruct((n_pad, Kp), jnp.float32),
            jax.ShapeDtypeStruct((1, 1), jnp.float32),
            jax.ShapeDtypeStruct((1, 1), jnp.float32),
        ),
        grid=(num_blocks, S),
        in_specs=[
            pl.BlockSpec((tb, S), lambda i, s: (i, 0)),              # classes
            pl.BlockSpec((n_fillers, Kp), lambda i, s: (0, 0)),      # G hi
            pl.BlockSpec((n_fillers, Kp), lambda i, s: (0, 0)),      # G mid
            pl.BlockSpec((n_fillers, Kp), lambda i, s: (0, 0)),      # G lo
            pl.BlockSpec((S, Kp), lambda i, s: (0, 0)),              # RT
            pl.BlockSpec((n_roles, DR), lambda i, s: (0, 0)),        # role_w
            pl.BlockSpec((n_fillers, DF), lambda i, s: (0, 0)),      # filler_w
        ],
        out_specs=(
            pl.BlockSpec((tb, Kp), lambda i, s: (i, s)),             # bindings
            pl.BlockSpec((tb, Kp), lambda i, s: (i, 0)),             # slot sum
            pl.BlockSpec((1, 1), lambda i, s: (0, 0)),               # pen role
            pl.BlockSpec((1, 1), lambda i, s: (0, 0)),               # pen filler
        ),
        compiler_params=pltpu.CompilerParams(
            dimension_semantics=("parallel", "arbitrary"),
            vmem_limit_bytes=vmem_limit,
        ),
        cost_estimate=pl.CostEstimate(flops=flops, transcendentals=2,
                                      bytes_accessed=bytes_accessed),
    )(cls, g_hi, g_mid, g_lo, rt, rw, fw)

    bindings = bind2d.reshape(n_pad, S, Kp)[:N, :, :K]   # free when aligned
    bind_sum = bsum[:N, :K]
    return bindings, bind_sum, pen_r[0, 0], pen_f[0, 0]


# ----------------------------------------------------------------------------
# Plain-JAX glue reproducing TPREncoder.forward semantics
# ----------------------------------------------------------------------------
def _weight_rank_stat(w: jax.Array) -> jax.Array:
    # torch: m = w.T of shape (D, K); (K - matrix_rank(m)) / (K - 1).
    # TODO(synk): matrix_rank needs an SVD; no Pallas equivalent, done in XLA.
    k = w.shape[0]
    rank = jnp.linalg.matrix_rank(w).astype(jnp.float32)
    return (k - rank) / (k - 1)


@functools.partial(jax.jit, static_argnames=("use_concatenated_rep",))
def tpr_encoder_forward(
    gt_factor_classes: jax.Array,   # (N, n_roles) int32 filler indices
    role_w: jax.Array,              # (n_roles, D_R)
    filler_w: jax.Array,            # (n_fillers, D_F)
    lambda_role,
    lambda_filler,
    use_concatenated_rep: bool,
):
    N, S = gt_factor_classes.shape
    n_roles, _ = role_w.shape
    assert S == n_roles

    bindings, bind_sum, pen_role, pen_filler = tpr_bindings(
        gt_factor_classes, role_w, filler_w)

    if use_concatenated_rep:
        z_rep = bindings.reshape(N, -1)          # (N, S*D_F*D_R)
    else:
        z_rep = bind_sum                         # (N, D_F*D_R)

    role_rank = _weight_rank_stat(role_w)
    filler_rank = _weight_rank_stat(filler_w)
    encoder_loss = lambda_role * pen_role + lambda_filler * pen_filler

    return {
        "rep": z_rep,
        "bindings": bindings,                    # (N, n_roles, D_F*D_R)
        "encoder_logs": {
            "encoder_loss": encoder_loss,
            ORTH_PENALTY_ROLE: pen_role,
            ORTH_PENALTY_FILLER: pen_filler,
            ROLE_RANK: role_rank,
            FILLER_RANK: filler_rank,
        },
    }


if __name__ == "__main__":
    # Small, module-consistent shapes; n_roles deliberately NOT a multiple of 8
    # (the per-slot grid keeps the kernel lane/sublane dense regardless).
    N = 16           # batch
    n_roles = 6      # number of roles == number of factor slots
    n_fillers = 10   # vocabulary of fillers
    D_R = 8          # role embed dim
    D_F = 16         # filler embed dim  -> K = 128 (lane aligned)
    lam_role, lam_filler = 0.5, 0.25

    key = jax.random.PRNGKey(0)
    k_role, k_fill, k_idx = jax.random.split(key, 3)
    role_w = jax.random.normal(k_role, (n_roles, D_R), dtype=jnp.float32)
    filler_w = jax.random.normal(k_fill, (n_fillers, D_F), dtype=jnp.float32)
    gt_factor_classes = jax.random.randint(
        k_idx, (N, n_roles), 0, n_fillers, dtype=jnp.int32)

    out = tpr_encoder_forward(gt_factor_classes, role_w, filler_w,
                              lam_role, lam_filler, False)
    out = jax.block_until_ready(out)
    out_cat = tpr_encoder_forward(gt_factor_classes, role_w, filler_w,
                                  lam_role, lam_filler, True)
    out_cat = jax.block_until_ready(out_cat)

    # Pure-JAX reference check.
    bf = filler_w[gt_factor_classes]
    br = jnp.broadcast_to(role_w[None], (N, n_roles, D_R))
    ref_bind = jnp.einsum("bsf,bsr->bsfr", bf, br)
    ref_sum_rep = ref_bind.sum(axis=1).reshape(N, -1)
    ref_cat_rep = ref_bind.reshape(N, -1)
    ref_pen_role = jnp.linalg.norm(jnp.eye(n_roles) - role_w @ role_w.T)
    ref_pen_fill = jnp.linalg.norm(jnp.eye(n_fillers) - filler_w @ filler_w.T)

    assert jnp.allclose(out["bindings"], ref_bind.reshape(N, n_roles, -1),
                        atol=1e-4)
    assert jnp.allclose(out["rep"], ref_sum_rep, atol=1e-4)
    assert jnp.allclose(out_cat["rep"], ref_cat_rep, atol=1e-4)
    assert jnp.allclose(out["encoder_logs"][ORTH_PENALTY_ROLE],
                        ref_pen_role, atol=1e-3)
    assert jnp.allclose(out["encoder_logs"][ORTH_PENALTY_FILLER],
                        ref_pen_fill, atol=1e-3)
    assert jnp.allclose(out["encoder_logs"]["encoder_loss"],
                        lam_role * ref_pen_role + lam_filler * ref_pen_fill,
                        rtol=1e-3)

    print("KERNEL_OK")
</pallas_src>

<mosaic_0001>
module attributes {stable_mosaic.version = 11 : i64} {
  func.func @_bind_kernel(%arg0: i32, %arg1: i32, %arg2: memref<16x6xi32, #tpu.memory_space<vmem>>, %arg3: memref<10x128xbf16, #tpu.memory_space<vmem>>, %arg4: memref<10x128xbf16, #tpu.memory_space<vmem>>, %arg5: memref<10x128xbf16, #tpu.memory_space<vmem>>, %arg6: memref<6x128xf32, #tpu.memory_space<vmem>>, %arg7: memref<6x8xf32, #tpu.memory_space<vmem>>, %arg8: memref<10x16xf32, #tpu.memory_space<vmem>>, %arg9: memref<16x128xf32, #tpu.memory_space<vmem>>, %arg10: memref<16x128xf32, #tpu.memory_space<vmem>>, %arg11: memref<1x1xf32, #tpu.memory_space<vmem>>, %arg12: memref<1x1xf32, #tpu.memory_space<vmem>>) attributes {dimension_semantics = [#tpu.dimension_semantics<parallel>, #tpu.dimension_semantics<arbitrary>], iteration_bounds = array<i64: 1, 6>, scalar_prefetch = 0 : i64, scratch_operands = 0 : i64, tpu.core_type = #tpu.core_type<tc>, window_params = [{transform_indices = @transform_0, window_bounds = array<i64: 16, 6>}, {pipeline_mode = #tpu.pipeline_mode<synchronous>, transform_indices = @transform_1, window_bounds = array<i64: 10, 128>}, {pipeline_mode = #tpu.pipeline_mode<synchronous>, transform_indices = @transform_2, window_bounds = array<i64: 10, 128>}, {pipeline_mode = #tpu.pipeline_mode<synchronous>, transform_indices = @transform_3, window_bounds = array<i64: 10, 128>}, {pipeline_mode = #tpu.pipeline_mode<synchronous>, transform_indices = @transform_4, window_bounds = array<i64: 6, 128>}, {pipeline_mode = #tpu.pipeline_mode<synchronous>, transform_indices = @transform_5, window_bounds = array<i64: 6, 8>}, {pipeline_mode = #tpu.pipeline_mode<synchronous>, transform_indices = @transform_6, window_bounds = array<i64: 10, 16>}, {transform_indices = @transform_7, window_bounds = array<i64: 16, 128>}, {transform_indices = @transform_8, window_bounds = array<i64: 16, 128>}, {pipeline_mode = #tpu.pipeline_mode<synchronous>, transform_indices = @transform_9, window_bounds = array<i64: 1, 1>}, {pipeline_mode = #tpu.pipeline_mode<synchronous>, transform_indices = @transform_10, window_bounds = array<i64: 1, 1>}]} {
    %c0 = arith.constant 0 : index
    %c0_0 = arith.constant 0 : index
    %0 = vector.load %arg2[%c0, %c0_0] : memref<16x6xi32, #tpu.memory_space<vmem>>, vector<16x6xi32>
    %1 = tpu.iota {dimensions = array<i32: 1>} : vector<16x6xi32>
    %2 = vector.broadcast %arg1 : i32 to vector<16x6xi32>
    %3 = arith.cmpi eq, %1, %2 : vector<16x6xi32>
    %c0_i32 = arith.constant 0 : i32
    %4 = vector.broadcast %c0_i32 : i32 to vector<16x6xi32>
    %5 = arith.select %3, %0, %4 : vector<16x6xi1>, vector<16x6xi32>
    %cst = arith.constant dense<0> : vector<16xi32>
    %6 = vector.multi_reduction <add>, %5, %cst [1] : vector<16x6xi32> to vector<16xi32>
    %7 = vector.shape_cast %6 : vector<16xi32> to vector<16x1xi32>
    %8 = tpu.iota {dimensions = array<i32: 1>} : vector<16x10xi32>
    %9 = vector.broadcast %7 : vector<16x1xi32> to vector<16x10xi32>
    %10 = arith.cmpi eq, %9, %8 : vector<16x10xi32>
    %11 = arith.extui %10 : vector<16x10xi1> to vector<16x10xi32>
    %12 = arith.sitofp %11 : vector<16x10xi32> to vector<16x10xf32>
    %13 = arith.truncf %12 : vector<16x10xf32> to vector<16x10xbf16>
    %c0_1 = arith.constant 0 : index
    %c0_2 = arith.constant 0 : index
    %14 = vector.load %arg3[%c0_1, %c0_2] : memref<10x128xbf16, #tpu.memory_space<vmem>>, vector<10x128xbf16>
    %cst_3 = arith.constant dense<0.000000e+00> : vector<16x128xf32>
    %15 = tpu.matmul %13, %14, %cst_3 {dimension_numbers = #tpu.dot_dimension_numbers<[1], [0], [0], [1], [0, 0, 1, 1], [], []>} : vector<16x10xbf16>, vector<10x128xbf16>, vector<16x128xf32> -> vector<16x128xf32>
    %c0_4 = arith.constant 0 : index
    %c0_5 = arith.constant 0 : index
    %16 = vector.load %arg4[%c0_4, %c0_5] : memref<10x128xbf16, #tpu.memory_space<vmem>>, vector<10x128xbf16>
    %cst_6 = arith.constant dense<0.000000e+00> : vector<16x128xf32>
    %17 = tpu.matmul %13, %16, %cst_6 {dimension_numbers = #tpu.dot_dimension_numbers<[1], [0], [0], [1], [0, 0, 1, 1], [], []>} : vector<16x10xbf16>, vector<10x128xbf16>, vector<16x128xf32> -> vector<16x128xf32>
    %18 = arith.addf %15, %17 : vector<16x128xf32>
    %c0_7 = arith.constant 0 : index
    %c0_8 = arith.constant 0 : index
    %19 = vector.load %arg5[%c0_7, %c0_8] : memref<10x128xbf16, #tpu.memory_space<vmem>>, vector<10x128xbf16>
    %cst_9 = arith.constant dense<0.000000e+00> : vector<16x128xf32>
    %20 = tpu.matmul %13, %19, %cst_9 {dimension_numbers = #tpu.dot_dimension_numbers<[1], [0], [0], [1], [0, 0, 1, 1], [], []>} : vector<16x10xbf16>, vector<10x128xbf16>, vector<16x128xf32> -> vector<16x128xf32>
    %21 = arith.addf %18, %20 : vector<16x128xf32>
    %22 = tpu.iota {dimensions = array<i32: 0>} : vector<6x128xi32>
    %23 = vector.broadcast %arg1 : i32 to vector<6x128xi32>
    %24 = arith.cmpi eq, %22, %23 : vector<6x128xi32>
    %25 = arith.extui %24 : vector<6x128xi1> to vector<6x128xi32>
    %26 = arith.sitofp %25 : vector<6x128xi32> to vector<6x128xf32>
    %c0_10 = arith.constant 0 : index
    %c0_11 = arith.constant 0 : index
    %27 = vector.load %arg6[%c0_10, %c0_11] : memref<6x128xf32, #tpu.memory_space<vmem>>, vector<6x128xf32>
    %28 = arith.mulf %27, %26 : vector<6x128xf32>
    %cst_12 = arith.constant dense<0.000000e+00> : vector<128xf32>
    %29 = vector.multi_reduction <add>, %28, %cst_12 [0] : vector<6x128xf32> to vector<128xf32>
    %30 = vector.shape_cast %29 : vector<128xf32> to vector<1x128xf32>
    %31 = vector.broadcast %30 : vector<1x128xf32> to vector<16x128xf32>
    %32 = arith.mulf %21, %31 : vector<16x128xf32>
    %c0_13 = arith.constant 0 : index
    %c0_14 = arith.constant 0 : index
    %33 = vector.load %arg9[%c0_13, %c0_14] : memref<16x128xf32, #tpu.memory_space<vmem>>, vector<16x128xf32>
    tpu.vector_store %arg9[%c0_13, %c0_14], %32 {strides = array<i32>} : memref<16x128xf32, #tpu.memory_space<vmem>>, vector<16x128xf32>,
    %c0_i32_15 = arith.constant 0 : i32
    %34 = arith.cmpi eq, %arg1, %c0_i32_15 : i32
    %35 = arith.extui %34 : i1 to i32
    %c0_i32_16 = arith.constant 0 : i32
    %36 = arith.cmpi ne, %35, %c0_i32_16 : i32
    scf.if %36 {
      %c0_21 = arith.constant 0 : index
      %c0_22 = arith.constant 0 : index
      %43 = vector.load %arg10[%c0_21, %c0_22] : memref<16x128xf32, #tpu.memory_space<vmem>>, vector<16x128xf32>
      tpu.vector_store %arg10[%c0_21, %c0_22], %32 {strides = array<i32>} : memref<16x128xf32, #tpu.memory_space<vmem>>, vector<16x128xf32>,
    } else {
    }
    %c0_i32_17 = arith.constant 0 : i32
    %37 = arith.cmpi sgt, %arg1, %c0_i32_17 : i32
    %38 = arith.extui %37 : i1 to i32
    %c0_i32_18 = arith.constant 0 : i32
    %39 = arith.cmpi ne, %38, %c0_i32_18 : i32
    scf.if %39 {
      %c0_21 = arith.constant 0 : index
      %c0_22 = arith.constant 0 : index
      %43 = vector.load %arg10[%c0_21, %c0_22] : memref<16x128xf32, #tpu.memory_space<vmem>>, vector<16x128xf32>
      %44 = arith.addf %43, %32 : vector<16x128xf32>
      %c0_23 = arith.constant 0 : index
      %c0_24 = arith.constant 0 : index
      %45 = vector.load %arg10[%c0_23, %c0_24] : memref<16x128xf32, #tpu.memory_space<vmem>>, vector<16x128xf32>
      tpu.vector_store %arg10[%c0_23, %c0_24], %44 {strides = array<i32>} : memref<16x128xf32, #tpu.memory_space<vmem>>, vector<16x128xf32>,
    } else {
    }
    %c0_i32_19 = arith.constant 0 : i32
    %40 = arith.cmpi eq, %arg1, %c0_i32_19 : i32
    %41 = arith.extui %40 : i1 to i32
    %c0_i32_20 = arith.constant 0 : i32
    %42 = arith.cmpi ne, %41, %c0_i32_20 : i32
    scf.if %42 {
      %c0_21 = arith.constant 0 : index
      %c0_22 = arith.constant 0 : index
      %43 = vector.load %arg7[%c0_21, %c0_22] : memref<6x8xf32, #tpu.memory_space<vmem>>, vector<6x8xf32>
      %cst_23 = arith.constant dense<0.000000e+00> : vector<6x6xf32>
      %44 = tpu.matmul %43, %43, %cst_23 {dimension_numbers = #tpu.dot_dimension_numbers<[1], [1], [0], [0], [0, 0, 1, 0], [], []>, precision = #tpu.contract_precision<fp32>} : vector<6x8xf32>, vector<6x8xf32>, vector<6x6xf32> -> vector<6x6xf32>
      %45 = tpu.iota {dimensions = array<i32: 0>} : vector<6x6xi32>
      %46 = tpu.iota {dimensions = array<i32: 1>} : vector<6x6xi32>
      %47 = arith.cmpi eq, %45, %46 : vector<6x6xi32>
      %48 = arith.extui %47 : vector<6x6xi1> to vector<6x6xi32>
      %49 = arith.sitofp %48 : vector<6x6xi32> to vector<6x6xf32>
      %50 = arith.subf %49, %44 : vector<6x6xf32>
      %51 = arith.mulf %50, %50 : vector<6x6xf32>
      %cst_24 = arith.constant dense<0.000000e+00> : vector<6xf32>
      %52 = vector.multi_reduction <add>, %51, %cst_24 [1] : vector<6x6xf32> to vector<6xf32>
      %53 = vector.shape_cast %52 : vector<6xf32> to vector<6x1xf32>
      %cst_25 = arith.constant dense<0.000000e+00> : vector<1xf32>
      %54 = vector.multi_reduction <add>, %53, %cst_25 [0] : vector<6x1xf32> to vector<1xf32>
      %55 = vector.shape_cast %54 : vector<1xf32> to vector<1x1xf32>
      %56 = math.sqrt %55 : vector<1x1xf32>
      %c0_26 = arith.constant 0 : index
      %c0_27 = arith.constant 0 : index
      %57 = vector.load %arg11[%c0_26, %c0_27] : memref<1x1xf32, #tpu.memory_space<vmem>>, vector<1x1xf32>
      tpu.vector_store %arg11[%c0_26, %c0_27], %56 {strides = array<i32>} : memref<1x1xf32, #tpu.memory_space<vmem>>, vector<1x1xf32>,
      %c0_28 = arith.constant 0 : index
      %c0_29 = arith.constant 0 : index
      %58 = vector.load %arg8[%c0_28, %c0_29] : memref<10x16xf32, #tpu.memory_space<vmem>>, vector<10x16xf32>
      %cst_30 = arith.constant dense<0.000000e+00> : vector<10x10xf32>
      %59 = tpu.matmul %58, %58, %cst_30 {dimension_numbers = #tpu.dot_dimension_numbers<[1], [1], [0], [0], [0, 0, 1, 0], [], []>, precision = #tpu.contract_precision<fp32>} : vector<10x16xf32>, vector<10x16xf32>, vector<10x10xf32> -> vector<10x10xf32>
      %60 = tpu.iota {dimensions = array<i32: 0>} : vector<10x10xi32>
      %61 = tpu.iota {dimensions = array<i32: 1>} : vector<10x10xi32>
      %62 = arith.cmpi eq, %60, %61 : vector<10x10xi32>
      %63 = arith.extui %62 : vector<10x10xi1> to vector<10x10xi32>
      %64 = arith.sitofp %63 : vector<10x10xi32> to vector<10x10xf32>
      %65 = arith.subf %64, %59 : vector<10x10xf32>
      %66 = arith.mulf %65, %65 : vector<10x10xf32>
      %cst_31 = arith.constant dense<0.000000e+00> : vector<10xf32>
      %67 = vector.multi_reduction <add>, %66, %cst_31 [1] : vector<10x10xf32> to vector<10xf32>
      %68 = vector.shape_cast %67 : vector<10xf32> to vector<10x1xf32>
      %cst_32 = arith.constant dense<0.000000e+00> : vector<1xf32>
      %69 = vector.multi_reduction <add>, %68, %cst_32 [0] : vector<10x1xf32> to vector<1xf32>
      %70 = vector.shape_cast %69 : vector<1xf32> to vector<1x1xf32>
      %71 = math.sqrt %70 : vector<1x1xf32>
      %c0_33 = arith.constant 0 : index
      %c0_34 = arith.constant 0 : index
      %72 = vector.load %arg12[%c0_33, %c0_34] : memref<1x1xf32, #tpu.memory_space<vmem>>, vector<1x1xf32>
      tpu.vector_store %arg12[%c0_33, %c0_34], %71 {strides = array<i32>} : memref<1x1xf32, #tpu.memory_space<vmem>>, vector<1x1xf32>,
    } else {
    }
    return
  }
  func.func @transform_0(%arg0: i32, %arg1: i32) -> (i32, i32) {
    %c0_i32 = arith.constant 0 : i32
    %c0_i32_0 = arith.constant 0 : i32
    return %arg0, %c0_i32 : i32, i32
  }
  func.func @transform_1(%arg0: i32, %arg1: i32) -> (i32, i32) {
    %c0_i32 = arith.constant 0 : i32
    %c0_i32_0 = arith.constant 0 : i32
    %c0_i32_1 = arith.constant 0 : i32
    return %c0_i32, %c0_i32_0 : i32, i32
  }
  func.func @transform_2(%arg0: i32, %arg1: i32) -> (i32, i32) {
    %c0_i32 = arith.constant 0 : i32
    %c0_i32_0 = arith.constant 0 : i32
    %c0_i32_1 = arith.constant 0 : i32
    return %c0_i32, %c0_i32_0 : i32, i32
  }
  func.func @transform_3(%arg0: i32, %arg1: i32) -> (i32, i32) {
    %c0_i32 = arith.constant 0 : i32
    %c0_i32_0 = arith.constant 0 : i32
    %c0_i32_1 = arith.constant 0 : i32
    return %c0_i32, %c0_i32_0 : i32, i32
  }
  func.func @transform_4(%arg0: i32, %arg1: i32) -> (i32, i32) {
    %c0_i32 = arith.constant 0 : i32
    %c0_i32_0 = arith.constant 0 : i32
    %c0_i32_1 = arith.constant 0 : i32
    return %c0_i32, %c0_i32_0 : i32, i32
  }
  func.func @transform_5(%arg0: i32, %arg1: i32) -> (i32, i32) {
    %c0_i32 = arith.constant 0 : i32
    %c0_i32_0 = arith.constant 0 : i32
    %c0_i32_1 = arith.constant 0 : i32
    return %c0_i32, %c0_i32_0 : i32, i32
  }
  func.func @transform_6(%arg0: i32, %arg1: i32) -> (i32, i32) {
    %c0_i32 = arith.constant 0 : i32
    %c0_i32_0 = arith.constant 0 : i32
    %c0_i32_1 = arith.constant 0 : i32
    return %c0_i32, %c0_i32_0 : i32, i32
  }
  func.func @transform_7(%arg0: i32, %arg1: i32) -> (i32, i32) {
    %c0_i32 = arith.constant 0 : i32
    return %arg0, %arg1 : i32, i32
  }
  func.func @transform_8(%arg0: i32, %arg1: i32) -> (i32, i32) {
    %c0_i32 = arith.constant 0 : i32
    %c0_i32_0 = arith.constant 0 : i32
    return %arg0, %c0_i32 : i32, i32
  }
  func.func @transform_9(%arg0: i32, %arg1: i32) -> (i32, i32) {
    %c0_i32 = arith.constant 0 : i32
    %c0_i32_0 = arith.constant 0 : i32
    %c0_i32_1 = arith.constant 0 : i32
    return %c0_i32, %c0_i32_0 : i32, i32
  }
  func.func @transform_10(%arg0: i32, %arg1: i32) -> (i32, i32) {
    %c0_i32 = arith.constant 0 : i32
    %c0_i32_0 = arith.constant 0 : i32
    %c0_i32_1 = arith.constant 0 : i32
    return %c0_i32, %c0_i32_0 : i32, i32
  }
}

</mosaic_0001>

<bundles_post_ra>
// kernel: custom-call.53
= control target key start
LH: loop header
LB: loop body
LE: loop exit
PB: predicated region body
PF: predicated region fallthrough
CT: control target
= control target key end

     0   :  { %4 = vsyncpa [#allocation4], 0  ;;  %v322_v1 = vmov 0.0   ;;  %s343_s11 = smov 0   ;;  %s405_s0 = inlined_call_operand.vmem [shape: f32[8,6], index: 0, kind: input, shape index: {}]   ;;  %s406_s1 = inlined_call_operand.vmem [shape: f32[8,6], index: 1, kind: output, shape index: {0}]   ;;  %s407_s2 = inlined_call_operand.hbm [shape: f32[6], index: 2, kind: output, shape index: {1}]  }
   0x1   :  { %v32_v0 = vld [vmem:[%s405_s0] sm:$0xff]  ;;  %39 = vst [vmem:[#allocation2] sm:$0x1] %v322_v1 }
   0x2   :  { %38 = vst [vmem:[#allocation1] sm:$0xff] %v32_v0 }
   0x3 LB: > { %v47_v2 = vlaneseq  ;;  %v351_v5 = vstv %s320_s11  ;;  %s74_s0 = scalar_lea.vmem [#allocation1], %s320_s11  ;;  %s110_s12 = smov [#allocation1]  ;;  %v323_v58 = vmov 1.0   ;;  %s320_s11 = sphi %s343_s11, %s45_s11  }
   0x4   : > { %s132_s13 = scalar_lea.vmem [#allocation5], %s320_s11  ;;  %s148_s14 = smov [#allocation1] }
   0x5   : > { %v348_v4 = vshrl.u32 %v47_v2, 7  ;;  %v126_v47 = vand.u32 127, %v47_v2  ;;  %s149_s15 = smov [#allocation5] }
   0x7   : > { %vm51_vm0 = vcmp.gt.s32.totalorder %v348_v4, %v351_v5  ;;  %v113_v4 = vmov %v348_v4  ;;  %vm364_vm10 = vcmp.eq.s32.totalorder %v126_v47, %v351_v5  ;;  %vm178_vm13 = vcmp.gt.s32.totalorder %v126_v47, %v351_v5 }
   0x8   : > { %vm117_vm7 = vcmp.gt.s32.totalorder %v113_v4, %v351_v5  ;;  %vm118_vm8 = vcmp.lt.s32.totalorder %v113_v4, 8  ;;  %v145_v59 = vld [vmem:[#allocation2] ss:$0 sm:$0xff]  ;;  %v152_v4 = vmov %v348_v4 }
   0x9   : > { %v46_v3 = vld [vmem:[#allocation1] sm:$0xff]  ;;  %vm119_vm9 = vmand %vm117_vm7, %vm118_vm8  ;;  %vm157_vm11 = vcmp.lt.s32.totalorder %v152_v4, 8  ;;  %v169_v4 = vmov %v348_v4 }
   0xa   : > { %v54_v6 = vsel %vm51_vm0, %v46_v3, 0.0  ;;  %v75_v14 = vld [vmem:[%s74_s0] ss:$0 sm:$0xff]  ;;  %vm186_vm12 = vcmp.ge.s32.totalorder %v169_v4, %v351_v5 }
   0xb   : > { %v55_v7 = vmul.f32 %v54_v6, %v54_v6  ;;  %v76_v15 = vand.u32 2147483647, %v75_v14  ;;  %vm101_vm6 = vcmp.lt.f32.partialorder %v75_v14, 0.0  ;;  %v114_v44 = vld [vmem:[%s110_s12] sm:$0xff]  ;;  %vm187_vm14 = vmand %vm364_vm10, %vm186_vm12 }
   0xc   : > { %v120_v48 = vsel %vm119_vm9, %v114_v44, 0.0  ;;  %v155_v62 = vld [vmem:[%s148_s14] sm:$0xff]  ;;  %s165_s14 = smov %s148_s14 }
   0xd   : > { %v56_v8 = vrot.slane %v55_v7, 4  ;;  %v77_v20 = vmax.f32 %v76_v15, 0.0  ;;  %s190_s16 = scalar_lea.vmem %s165_s14, %s320_s11  ;;  %s45_s11 = sadd.s32 1, %s320_s11  }
   0xe   : > { %p42_p0 = scmp.ge.s32.totalorder %s45_s11, 6  }
   0xf   : > { %v57_v9 = vadd.f32 %v56_v8, %v55_v7  ;;  %s324_s19 = smov (%p42_p0), [#allocation3]  }
  0x10   :  { %s242_s20 = sshll.u32 (%p42_p0), %s324_s19, 4  ;;  %s243_s20 = int_to_ptr.vmem [resolvable:$true] %s242_s20 }
  0x11   : > { %v58_v10 = vrot.slane %v57_v9, 2  ;;  %s290_s21 = scalar_lea.vmem (%p42_p0), %s243_s20, 16  ;;  %s294_s22 = scalar_lea.vmem (%p42_p0), %s243_s20, 32 }
  0x12   :  { %p291_p1 = scmp.ne.s32.totalorder (%p42_p0), %s243_s20, %s290_s21  ;;  %p295_p2 = scmp.lt.s32.totalorder (%p42_p0), %s243_s20, %s243_s20 }
  0x13   : > { %v59_v11 = vadd.f32 %v58_v10, %v57_v9  ;;  %p296_p3 = scmp.lt.s32.totalorder (%p42_p0), %s294_s22, %s290_s21 }
  0x15   : > { %v60_v12 = vrot.slane %v59_v11, 1  ;;  %p297_p4 = por (%p42_p0), %p296_p3, %p295_p2 }
  0x17   : > { %v61_v13 = vadd.f32 %v60_v12, %v59_v11  ;;  %v176_v12 = vld [vmem:[%s165_s14] sm:$0xff]  ;;  %p298_p5 = pnand (%p42_p0), %p297_p4, %p291_p1 }
  0x19   : > { %280 = vrsqrt.f32 %v61_v13  ;;  %vm64_vm1 = vcmp.eq.f32.partialorder %v61_v13, inf  ;;  %v67_v17 = vand.u32 2147483648, %v61_v13  ;;  %vm66_vm2 = vcmp.eq.f32.partialorder %v61_v13, 0.0 }
  0x23   : > { %v281_v16 = vpop.eup %280 }
  0x24   : > { %v63_v18 = vmul.f32 %v281_v16, %v61_v13 }
  0x26   : > { %v65_v19 = vsel %vm64_vm1, %v61_v13, %v63_v18 }
  0x27   : > { %v68_v21 = vsel %vm66_vm2, %v67_v17, %v65_v19 }
  0x28   : > { %v78_v22 = vand.u32 2147483647, %v68_v21 }
  0x2a   : > { %v79_v23 = vmax.f32 %v77_v20, %v78_v22 }
  0x2c   : > { %282 = vrcp.f32 %v79_v23  ;;  %vm91_vm5 = vcmp.eq.f32.partialorder %v79_v23, 0.0 }
  0x36   : > { %v283_v24 = vpop.eup %282 }
  0x37   : > { %v81_v25 = vmul.f32 %v283_v24, %v76_v15  ;;  %v84_v26 = vmul.f32 0.0, %v283_v24  ;;  %v88_v27 = vmul.f32 %v283_v24, %v78_v22 }
  0x39   : > { %v82_v28 = vmul.f32 %v81_v25, %v81_v25  ;;  %v85_v29 = vmul.f32 %v84_v26, %v84_v26  ;;  %v89_v30 = vmul.f32 %v88_v27, %v88_v27 }
  0x3b   : > { %v86_v31 = vadd.f32 %v85_v29, %v82_v28 }
  0x3d   : > { %v90_v32 = vadd.f32 %v89_v30, %v86_v31 }
  0x3f   : > { %284 = vrsqrt.f32 %v90_v32  ;;  %vm94_vm3 = vcmp.eq.f32.partialorder %v90_v32, inf  ;;  %v97_v34 = vand.u32 2147483648, %v90_v32  ;;  %vm96_vm4 = vcmp.eq.f32.partialorder %v90_v32, 0.0 }
  0x49   : > { %v285_v33 = vpop.eup %284 }
  0x4a   : > { %v93_v35 = vmul.f32 %v285_v33, %v90_v32 }
  0x4c   : > { %v95_v36 = vsel %vm94_vm3, %v90_v32, %v93_v35 }
  0x4d   : > { %v98_v37 = vsel %vm96_vm4, %v97_v34, %v95_v36 }
  0x4e   : > { %v99_v38 = vmul.f32 %v98_v37, %v79_v23 }
  0x50   : > { %v100_v39 = vsel %vm91_vm5, 0.0, %v99_v38 }
  0x51   : > { %v102_v40 = vxor.u32 2147483648, %v100_v39 }
  0x53   : > { %v103_v41 = vsel %vm101_vm6, %v100_v39, %v102_v40 }
  0x54   : > { %v358_v42 = vsel %vm66_vm2, %v75_v14, %v103_v41  ;;  %286 = vrcp.f32 %v103_v41  ;;  %v104_v45 = vsub.f32 %v103_v41, %v75_v14 }
  0x55   : > { %v109_v43 = vsub.f32 %v75_v14, %v358_v42 }
  0x57   : > { %288 = vrcp.f32 %v109_v43 }
  0x5e   : > { %v287_v46 = vpop.eup %286 }
  0x5f   : > { %v106_v49 = vmul.f32 %v287_v46, %v104_v45 }
  0x61   : > { %v289_v50 = vpop.eup %288  ;;  %v108_v54 = vsel %vm66_vm2, 0.0, %v106_v49 }
  0x62   : > { %v122_v51 = vmul.f32 %v289_v50, %v120_v48  ;;  %v138_v56 = vsel %vm364_vm10, %v108_v54, 0.0 }
  0x64   : > { %v123_v53 = vsel %vm66_vm2, 0.0, %v122_v51 }
  0x65   : > { %v128_v55 = vsel %vm364_vm10, %v123_v53, 0.0 }
  0x66   : > { %129 = vadd.xlane.f32.xlu0 %v128_v55 }
  0x6a   : > { %139 = vadd.xlane.f32.xlu0 %v138_v56 }
  0xf3   : > { %v130_v57 = vpop.xlane.xlu0 %129 }
  0xf4   : > { %131 = vst [vmem:[#allocation5] sm:$0xff] %v130_v57 }
  0xf5   : > { %133 = vst [vmem:[%s132_s13] sm:$0x1] %v323_v58 }
  0xf7   : > { %v140_v60 = vpop.xlane.xlu0 %139 }
  0xf8   : > { %v146_v61 = vsel %vm364_vm10, %v140_v60, %v145_v59 }
  0xf9   : > { %147 = vst [vmem:[#allocation2] sm:$0x1] %v146_v61 }
  0xfc   : > { %v154_v63 = vld [vmem:[%s149_s15] sm:$0xff]  ;;  %s166_s15 = smov %s149_s15 }
  0xfd   : > { %v156_v0 = vmul.f32 %v155_v62, %v154_v63  ;;  %v174_v11 = vld [vmem:[%s166_s15] sm:$0xff] }
  0xff   : > { %v158_v1 = vsel %vm157_vm11, %v156_v0, 0.0 }
 0x100   : > { %v159_v2 = vrot.slane %v158_v1, 4  ;;  %v201_v4 = vld [vmem:[#allocation2] sm:$0x1] (%p42_p0) }
 0x101   :  { %203 = vst [vmem:[#allocation3] sm:$0x1] (%p42_p0), %v201_v4 }
 0x102   : > { %v160_v3 = vadd.f32 %v159_v2, %v158_v1 }
 0x104   : > { %v161_v6 = vrot.slane %v160_v3, 2 }
 0x106   : > { %v162_v7 = vadd.f32 %v161_v6, %v160_v3 }
 0x108   : > { %v163_v8 = vrot.slane %v162_v7, 1 }
 0x10a   : > { %v164_v9 = vadd.f32 %v163_v8, %v162_v7 }
 0x10c   : > { %v170_v10 = vmul.f32 %v164_v9, %v140_v60 }
 0x10e   : > { %v175_v13 = vmul.f32 %v174_v11, %v170_v10 }
 0x110   : > { %v179_v14 = vsub.f32 %v176_v12, %v175_v13 }
 0x112   : > { %v180_v15 = vsel %vm178_vm13, %v179_v14, %v176_v12 }
 0x113   : > { %v188_v16 = vsel %vm187_vm14, %v174_v11, %v180_v15 }
 0x114   : > { %189 = vst [vmem:[%s165_s14] sm:$0xff] %v188_v16 }
 0x117   :  { %44 = sbr.rel (!%p42_p0) target bundleno = 3 (0x3), region = 105 }
 0x11b   : > { %v191_v17 = vld [vmem:[%s190_s16] ss:$0 sm:$0xff] }
 0x11c   : > { %v196_v18 = vsel %vm364_vm10, %v358_v42, %v191_v17 }
 0x11d   : > { %197 = vst [vmem:[%s190_s16] sm:$0x1] %v196_v18 }
 0x124   :  { %v231_v5 = vld [vmem:[#allocation1] sm:$0xff] }
 0x125   :  { %232 = vst [vmem:[%s406_s1] sm:$0xff] %v231_v5 }
 0x126   :  { %301 = shalt.err (!%p298_p5)
}
 0x127   :  { %s302_s25 = scalar_lea.hbm %s407_s2, 16 }
 0x128   :  { %p303_p6 = scmp.ne.s32.totalorder %s407_s2, %s302_s25  ;;  %p306_p7 = scmp.lt.u32.totalorder %s302_s25, %s407_s2 }
 0x12a   :  { %p308_p8 = pnand %p306_p7, %p303_p6 }
 0x12c   :  { %311 = shalt.err (!%p308_p8)
}
 0x12d   :  { %245 = dma.vmem_to_hbm [thread:$0]  %s243_s20, 16, %s407_s2, [#allocation4]  }
 0x12e   :  { %316 = dma.done.wait [#allocation4], 16  }
 0x12f   :  { %317 = vsyncadd [#allocation4], 4294967280 }
 0x130   :  { %249 = vsyncpa [#allocation4], 1 }

// kernel: custom-call.124
= control target key start
LH: loop header
LB: loop body
LE: loop exit
PB: predicated region body
PF: predicated region fallthrough
CT: control target
= control target key end

     0   :  { %v395_v2 = vmov 0.0   ;;  %s418_s13 = smov 0   ;;  %s502_s0 = inlined_call_operand.vmem [shape: f32[12,6], index: 0, kind: input, shape index: {}]   ;;  %s503_s1 = inlined_call_operand.vmem [shape: f32[12,6], index: 1, kind: output, shape index: {0}]   ;;  %s504_s2 = inlined_call_operand.vmem [shape: f32[6], index: 2, kind: output, shape index: {1}]  }
   0x1   :  { %v33_v0 = vld [vmem:[%s502_s0] sm:$0xff]  ;;  %v35_v1 = vld [vmem:[%s502_s0 + $0x8] sm:$0xff]  ;;  %46 = vst [vmem:[#allocation2] sm:$0x1] %v395_v2 }
   0x2   :  { %41 = vst [vmem:[#allocation1] sm:$0xff] %v33_v0  ;;  %45 = vst [vmem:[#allocation1 + $0x8] sm:$0xff] %v35_v1 }
   0x3 LB: > { %v54_v3 = vlaneseq  ;;  %v427_v6 = vstv %s393_s13  ;;  %s91_s0 = scalar_lea.vmem [#allocation1], %s393_s13  ;;  %s127_s14 = smov [#allocation1]  ;;  %s393_s13 = sphi %s418_s13, %s52_s13  }
   0x4   : > { %s167_s15 = scalar_lea.vmem [#allocation4], %s393_s13  ;;  %s183_s16 = smov [#allocation1] }
   0x5   : > { %v424_v5 = vshrl.u32 %v54_v3, 7  ;;  %v453_v54 = vand.u32 127, %v54_v3  ;;  %s184_s17 = smov [#allocation4] }
   0x7   : > { %vm58_vm0 = vcmp.gt.s32.totalorder %v424_v5, %v427_v6  ;;  %v65_v7 = vadd.s32 8, %v424_v5  ;;  %v130_v5 = vmov %v424_v5  ;;  %vm457_vm14 = vcmp.eq.s32.totalorder %v453_v54, %v427_v6 }
   0x8   : > { %v149_v50 = vadd.s32 8, %v130_v5  ;;  %vm134_vm12 = vcmp.gt.s32.totalorder %v130_v5, %v427_v6  ;;  %v187_v5 = vmov %v424_v5 }
   0x9   : > { %v53_v4 = vld [vmem:[#allocation1] sm:$0xff]  ;;  %v62_v9 = vld [vmem:[#allocation1 + $0x8] sm:$0xff]  ;;  %vm67_vm1 = vcmp.gt.s32.totalorder %v65_v7, %v427_v6  ;;  %vm68_vm2 = vcmp.lt.s32.totalorder %v65_v7, 12  ;;  %v180_v7 = vld [vmem:[#allocation2] ss:$0 sm:$0xff] }
   0xa   : > { %v59_v8 = vsel %vm58_vm0, %v53_v4, 0.0  ;;  %vm69_vm3 = vmand %vm67_vm1, %vm68_vm2  ;;  %v92_v20 = vld [vmem:[%s91_s0] ss:$0 sm:$0xff]  ;;  %vm151_vm10 = vcmp.gt.s32.totalorder %v149_v50, %v427_v6  ;;  %vm152_vm11 = vcmp.lt.s32.totalorder %v149_v50, 12  ;;  %v361_v53 = vld [vmem:[%s127_s14 + $0x8] sm:$0xff]  ;;  %vm220_vm2 = vcmp.gt.s32.totalorder %v453_v54, %v427_v6 }
   0xb   : > { %v60_v10 = vmul.f32 %v59_v8, %v59_v8  ;;  %v70_v11 = vsel %vm69_vm3, %v62_v9, 0.0  ;;  %v93_v21 = vand.u32 2147483647, %v92_v20  ;;  %vm118_vm9 = vcmp.lt.f32.partialorder %v92_v20, 0.0  ;;  %v131_v52 = vld [vmem:[%s127_s14] sm:$0xff]  ;;  %vm153_vm13 = vmand %vm151_vm10, %vm152_vm11 }
   0xc   : > { %v71_v12 = vmul.f32 %v70_v11, %v70_v11  ;;  %v135_v56 = vsel %vm134_vm12, %v131_v52, 0.0  ;;  %v154_v57 = vsel %vm153_vm13, %v361_v53, 0.0 }
   0xd   : > { %v94_v26 = vmax.f32 %v93_v21, 0.0 }
   0xe   : > { %v72_v13 = vadd.f32 %v71_v12, %v60_v10  ;;  %v396_v12 = vmov 1.0  }
  0x10   : > { %v73_v14 = vrot.slane %v72_v13, 4 }
  0x12   : > { %v74_v15 = vadd.f32 %v73_v14, %v72_v13  ;;  %v192_v13 = vadd.s32 8, %v187_v5  ;;  %v190_v14 = vld [vmem:[%s183_s16] sm:$0xff]  ;;  %v211_v5 = vmov %v424_v5 }
  0x13   : > { %vm228_vm0 = vcmp.ge.s32.totalorder %v211_v5, %v427_v6 }
  0x14   : > { %v75_v16 = vrot.slane %v74_v15, 2  ;;  %vm198_vm15 = vcmp.lt.s32.totalorder %v192_v13, 12  ;;  %vm229_vm3 = vmand %vm457_vm14, %vm228_vm0 }
  0x16   : > { %v76_v17 = vadd.f32 %v75_v16, %v74_v15  ;;  %v363_v15 = vld [vmem:[%s183_s16 + $0x8] sm:$0xff]  ;;  %s207_s16 = smov %s183_s16 }
  0x17   : > { %s253_s18 = scalar_lea.vmem %s207_s16, %s393_s13  ;;  %s52_s13 = sadd.s32 1, %s393_s13  }
  0x18   : > { %v77_v18 = vrot.slane %v76_v17, 1  ;;  %p49_p0 = scmp.ge.s32.totalorder %s52_s13, 6  }
  0x1a   : > { %v433_v19 = vadd.f32 %v77_v18, %v76_v17 }
  0x1c   : > { %377 = vrsqrt.f32 %v433_v19  ;;  %vm81_vm4 = vcmp.eq.f32.partialorder %v433_v19, inf  ;;  %v84_v23 = vand.u32 2147483648, %v433_v19  ;;  %vm83_vm5 = vcmp.eq.f32.partialorder %v433_v19, 0.0 }
  0x26   : > { %v378_v22 = vpop.eup %377 }
  0x27   : > { %v80_v24 = vmul.f32 %v378_v22, %v433_v19 }
  0x29   : > { %v82_v25 = vsel %vm81_vm4, %v433_v19, %v80_v24 }
  0x2a   : > { %v85_v27 = vsel %vm83_vm5, %v84_v23, %v82_v25 }
  0x2b   : > { %v95_v28 = vand.u32 2147483647, %v85_v27  ;;  %v232_v27 = vadd.s32 8, %v211_v5 }
  0x2d   : > { %v96_v29 = vmax.f32 %v94_v26, %v95_v28  ;;  %vm249_vm1 = vcmp.ge.s32.totalorder %v232_v27, %v427_v6 }
  0x2e   : > { %vm250_vm4 = vmand %vm457_vm14, %vm249_vm1 }
  0x2f   : > { %379 = vrcp.f32 %v96_v29  ;;  %vm108_vm8 = vcmp.eq.f32.partialorder %v96_v29, 0.0 }
  0x39   : > { %v380_v30 = vpop.eup %379 }
  0x3a   : > { %v98_v31 = vmul.f32 %v380_v30, %v93_v21  ;;  %v101_v32 = vmul.f32 0.0, %v380_v30  ;;  %v105_v33 = vmul.f32 %v380_v30, %v95_v28 }
  0x3c   : > { %v99_v34 = vmul.f32 %v98_v31, %v98_v31  ;;  %v102_v35 = vmul.f32 %v101_v32, %v101_v32  ;;  %v106_v36 = vmul.f32 %v105_v33, %v105_v33  ;;  %v365_v33 = vld [vmem:[%s207_s16 + $0x8] sm:$0xff] }
  0x3e   : > { %v103_v37 = vadd.f32 %v102_v35, %v99_v34 }
  0x40   : > { %v107_v38 = vadd.f32 %v106_v36, %v103_v37 }
  0x42   : > { %381 = vrsqrt.f32 %v107_v38  ;;  %vm111_vm6 = vcmp.eq.f32.partialorder %v107_v38, inf  ;;  %v114_v40 = vand.u32 2147483648, %v107_v38  ;;  %vm113_vm7 = vcmp.eq.f32.partialorder %v107_v38, 0.0 }
  0x4c   : > { %v382_v39 = vpop.eup %381 }
  0x4d   : > { %v110_v41 = vmul.f32 %v382_v39, %v107_v38 }
  0x4f   : > { %v112_v42 = vsel %vm111_vm6, %v107_v38, %v110_v41 }
  0x50   : > { %v115_v43 = vsel %vm113_vm7, %v114_v40, %v112_v42 }
  0x51   : > { %v116_v44 = vmul.f32 %v115_v43, %v96_v29  ;;  %v218_v29 = vld [vmem:[%s207_s16] sm:$0xff] }
  0x53   : > { %v117_v45 = vsel %vm108_vm8, 0.0, %v116_v44 }
  0x54   : > { %v119_v46 = vxor.u32 2147483648, %v117_v45 }
  0x56   : > { %v120_v47 = vsel %vm118_vm9, %v117_v45, %v119_v46 }
  0x57   : > { %v447_v48 = vsel %vm83_vm5, %v92_v20, %v120_v47  ;;  %383 = vrcp.f32 %v120_v47  ;;  %v121_v51 = vsub.f32 %v120_v47, %v92_v20 }
  0x58   : > { %v126_v49 = vsub.f32 %v92_v20, %v447_v48 }
  0x5a   : > { %385 = vrcp.f32 %v126_v49 }
  0x61   : > { %v384_v55 = vpop.eup %383 }
  0x62   : > { %v123_v58 = vmul.f32 %v384_v55, %v121_v51 }
  0x64   : > { %v386_v59 = vpop.eup %385  ;;  %v125_v61 = vsel %vm83_vm5, 0.0, %v123_v58 }
  0x65   : > { %v137_v62 = vmul.f32 %v386_v59, %v135_v56  ;;  %v156_v63 = vmul.f32 %v386_v59, %v154_v57  ;;  %v173_v0 = vsel %vm457_vm14, %v125_v61, 0.0 }
  0x66   : > { %174 = vadd.xlane.f32.xlu1 %v173_v0 }
  0x67   : > { %v138_v1 = vsel %vm83_vm5, 0.0, %v137_v62  ;;  %v157_v2 = vsel %vm83_vm5, 0.0, %v156_v63 }
  0x68   : > { %v143_v3 = vsel %vm457_vm14, %v138_v1, 0.0  ;;  %v162_v4 = vsel %vm457_vm14, %v157_v2, 0.0 }
  0x69   : > { %144 = vadd.xlane.f32.xlu0 %v143_v3 }
  0x6d   : > { %163 = vadd.xlane.f32.xlu0 %v162_v4 }
  0xf3   : > { %v175_v8 = vpop.xlane.xlu1 %174 }
  0xf4   : > { %v181_v9 = vsel %vm457_vm14, %v175_v8, %v180_v7 }
  0xf5   : > { %182 = vst [vmem:[#allocation2] sm:$0x1] %v181_v9 }
  0xf6   : > { %v145_v10 = vpop.xlane.xlu0 %144 }
  0xf7   : > { %146 = vst [vmem:[#allocation4] sm:$0xff] %v145_v10 }
  0xfa   : > { %v164_v11 = vpop.xlane.xlu0 %163 }
  0xfb   : > { %166 = vst [vmem:[#allocation4 + $0x8] sm:$0xff] %v164_v11 }
  0xfc   : > { %168 = vst [vmem:[%s167_s15] sm:$0x1] %v396_v12  ;;  %v264_v42 = vld [vmem:[#allocation2] sm:$0x1] (%p49_p0) }
  0xfd   :  { %266 = vst [vmem:[#allocation3] sm:$0x1] (%p49_p0), %v264_v42 }
 0x103   : > { %v189_v16 = vld [vmem:[%s184_s17] sm:$0xff]  ;;  %v362_v17 = vld [vmem:[%s184_s17 + $0x8] sm:$0xff]  ;;  %s208_s17 = smov %s184_s17 }
 0x104   : > { %v191_v18 = vmul.f32 %v190_v14, %v189_v16  ;;  %v197_v19 = vmul.f32 %v363_v15, %v362_v17  ;;  %v216_v31 = vld [vmem:[%s208_s17] sm:$0xff]  ;;  %v364_v32 = vld [vmem:[%s208_s17 + $0x8] sm:$0xff]  ;;  %v320_v45 = vld [vmem:[#allocation3] sm:$0x1] (%p49_p0) }
 0x105   :  { %321 = vst [vmem:[%s504_s2] sm:$0x1] (%p49_p0), %v320_v45 }
 0x106   : > { %v199_v20 = vsel %vm198_vm15, %v197_v19, 0.0 }
 0x107   : > { %v200_v21 = vadd.f32 %v199_v20, %v191_v18 }
 0x109   : > { %v201_v22 = vrot.slane %v200_v21, 4 }
 0x10b   : > { %v202_v23 = vadd.f32 %v201_v22, %v200_v21 }
 0x10d   : > { %v203_v24 = vrot.slane %v202_v23, 2 }
 0x10f   : > { %v204_v25 = vadd.f32 %v203_v24, %v202_v23 }
 0x111   : > { %v205_v26 = vrot.slane %v204_v25, 1 }
 0x113   : > { %v206_v28 = vadd.f32 %v205_v26, %v204_v25 }
 0x115   : > { %v212_v30 = vmul.f32 %v206_v28, %v175_v8 }
 0x117   : > { %v217_v34 = vmul.f32 %v216_v31, %v212_v30  ;;  %v237_v35 = vmul.f32 %v364_v32, %v212_v30 }
 0x119   : > { %v221_v36 = vsub.f32 %v218_v29, %v217_v34  ;;  %v242_v5 = vsub.f32 %v365_v33, %v237_v35 }
 0x11b   : > { %v222_v37 = vsel %vm220_vm2, %v221_v36, %v218_v29  ;;  %v243_v38 = vsel %vm220_vm2, %v242_v5, %v365_v33 }
 0x11c   : > { %v230_v39 = vsel %vm229_vm3, %v216_v31, %v222_v37  ;;  %v251_v40 = vsel %vm250_vm4, %v364_v32, %v243_v38 }
 0x11d   : > { %231 = vst [vmem:[%s207_s16] sm:$0xff] %v230_v39  ;;  %366 = vst [vmem:[%s207_s16 + $0x8] sm:$0xff] %v251_v40 }
 0x120   :  { %51 = sbr.rel (!%p49_p0) target bundleno = 3 (0x3), region = 148 }
 0x124   : > { %v254_v41 = vld [vmem:[%s253_s18] ss:$0 sm:$0xff] }
 0x125   : > { %v259_v6 = vsel %vm457_vm14, %v447_v48, %v254_v41 }
 0x126   : > { %260 = vst [vmem:[%s253_s18] sm:$0x1] %v259_v6 }
 0x12d   :  { %v296_v43 = vld [vmem:[#allocation1] sm:$0xff]  ;;  %v298_v44 = vld [vmem:[#allocation1 + $0x8] sm:$0xff] }
 0x12e   :  { %297 = vst [vmem:[%s503_s1] sm:$0xff] %v296_v43  ;;  %299 = vst [vmem:[%s503_s1 + $0x8] sm:$0xff] %v298_v44 }

// kernel: custom-call.125
= control target key start
LH: loop header
LB: loop body
LE: loop exit
PB: predicated region body
PF: predicated region fallthrough
CT: control target
= control target key end

     0   :  { %s415_s6 = smov [#allocation0]   ;;  %s455_s0 = inlined_call_operand.vmem [shape: f32[6,6], index: 0, kind: input, shape index: {}]   ;;  %s456_s1 = inlined_call_operand.vmem [shape: f32[6,6], index: 1, kind: output, shape index: {}]  }
   0x1   :  { %s419_s9 = smov %s455_s0  }
   0x2 LB: > { %v49_v0 = vld [vmem:[%s421_s9] sm:$0xff]  ;;  %s51_s9 = scalar_lea.vmem %s421_s9, 8   ;;  %s421_s9 = sphi %s419_s9, %s51_s9   ;;  %s417_s6 = sphi %s415_s6, %s52_s6  }
   0x3   : > { %50 = vst [vmem:[%s417_s6] sm:$0xff] %v49_v0  ;;  %s52_s6 = scalar_lea.vmem %s417_s6, 8   ;;  %p46_p0 = scmp.gt.s32.totalorder %s51_s9, %s455_s0 }
   0x4   :  { %v64_v1 = vlaneseq (%p46_p0)  ;;  %vm78_vm0 = vcmask (%p46_p0), 48128   ;;  %s423_s13 = smov (%p46_p0), %s456_s1   ;;  %s427_s14 = smov (%p46_p0), [#allocation1]  }
   0x5   :  { %48 = sbr.rel (!%p46_p0) target bundleno = 2 (0x2), region = 85 }
   0x6   :  { %v65_v3 = vand.u32 (%p46_p0), 127, %v64_v1  ;;  %v67_v4 = vshrl.u32 (%p46_p0), %v64_v1, 7 }
   0x8   :  { %vm69_vm1 = vcmp.eq.s32.totalorder (%p46_p0), %v65_v3, %v67_v4  ;;  %vm73_vm2 = vcmp.eq.s32.totalorder (%p46_p0), %v65_v3, 0  ;;  %vm82_vm3 = vcmp.eq.s32.totalorder (%p46_p0), %v65_v3, 1  ;;  %vm93_vm4 = vcmp.eq.s32.totalorder (%p46_p0), %v65_v3, 2 }
   0x9   :  { %vm104_vm5 = vcmp.eq.s32.totalorder (%p46_p0), %v65_v3, 3  ;;  %vm115_vm6 = vcmp.eq.s32.totalorder (%p46_p0), %v65_v3, 4  ;;  %vm126_vm7 = vcmp.eq.s32.totalorder (%p46_p0), %v65_v3, 5 }
   0xa   :  { %v77_v2 = vld [vmem:[#allocation0 + $0x1] ss:$0 sm:$0xff] (%p46_p0)  ;;  %v88_v10 = vld [vmem:[#allocation0 + $0x2] ss:$0 sm:$0xff] (%p46_p0)  ;;  %v99_v15 = vld [vmem:[#allocation0 + $0x3] ss:$0 sm:$0xff] (%p46_p0) }
   0xb   :  { %v70_v5 = vld [vmem:[#allocation0] sm:$0xff] (%p46_p0)  ;;  %v79_v6 = vsel (%p46_p0), %vm78_vm0, %v77_v2, 0.0  ;;  %v90_v11 = vsel (%p46_p0), %vm78_vm0, %v88_v10, 0.0  ;;  %v101_v16 = vsel (%p46_p0), %vm78_vm0, %v99_v15, 0.0 }
   0xc   :  { %v74_v7 = vsel %vm73_vm2, %v70_v5, 1.0  ;;  %v110_v20 = vld [vmem:[#allocation0 + $0x4] ss:$0 sm:$0xff]  ;;  %v121_v25 = vld [vmem:[#allocation0 + $0x5] ss:$0 sm:$0xff] }
   0xd   :  { %v75_v8 = vsel %vm69_vm1, %v74_v7, 0.0  ;;  %v112_v21 = vsel %vm78_vm0, %v110_v20, 0.0  ;;  %v123_v26 = vsel %vm78_vm0, %v121_v25, 0.0 }
   0xe   :  { %v83_v9 = vmul.f32 %v79_v6, %v75_v8 }
  0x10   :  { %84 = vadd.xlane.f32.xlu0 %v83_v9 }
  0x9d   :  { %v85_v12 = vpop.xlane.xlu0 %84 }
  0x9e   :  { %v86_v13 = vsel %vm82_vm3, %v85_v12, %v75_v8 }
  0x9f   :  { %v94_v14 = vmul.f32 %v90_v11, %v86_v13 }
  0xa1   :  { %95 = vadd.xlane.f32.xlu0 %v94_v14 }
 0x12e   :  { %v96_v17 = vpop.xlane.xlu0 %95 }
 0x12f   :  { %v97_v18 = vsel %vm93_vm4, %v96_v17, %v86_v13 }
 0x130   :  { %v105_v19 = vmul.f32 %v101_v16, %v97_v18 }
 0x132   :  { %106 = vadd.xlane.f32.xlu1 %v105_v19 }
 0x1bf   :  { %v107_v22 = vpop.xlane.xlu1 %106 }
 0x1c0   :  { %v108_v23 = vsel %vm104_vm5, %v107_v22, %v97_v18 }
 0x1c1   :  { %v116_v24 = vmul.f32 %v112_v21, %v108_v23 }
 0x1c3   :  { %117 = vadd.xlane.f32.xlu1 %v116_v24 }
 0x250   :  { %v118_v27 = vpop.xlane.xlu1 %117 }
 0x251   :  { %v119_v28 = vsel %vm115_vm6, %v118_v27, %v108_v23 }
 0x252   :  { %v127_v29 = vmul.f32 %v123_v26, %v119_v28 }
 0x254   :  { %128 = vadd.xlane.f32.xlu0 %v127_v29 }
 0x2e1   :  { %v129_v30 = vpop.xlane.xlu0 %128 }
 0x2e2   :  { %v130_v31 = vsel %vm126_vm7, %v129_v30, %v119_v28  }
 0x2e3   :  { %131 = vst [vmem:[#allocation1] sm:$0xff] %v130_v31 }
 0x2e4 LB:  { %s429_s14 = sphi %s427_s14, %s181_s14   ;;  %s425_s13 = sphi %s423_s13, %s182_s13  }
 0x2ea   : > { %v179_v32 = vld [vmem:[%s429_s14] sm:$0xff]  ;;  %s181_s14 = scalar_lea.vmem %s429_s14, 8  }
 0x2eb   : > { %180 = vst [vmem:[%s425_s13] sm:$0xff] %v179_v32  ;;  %s182_s13 = scalar_lea.vmem %s425_s13, 8   ;;  %p176_p1 = scmp.gt.s32.totalorder %s181_s14, [#allocation1] }
 0x2ed   :  { %178 = sbr.rel (!%p176_p1) target bundleno = 740 (0x2e4), region = 107 }

// kernel: custom-call.120
= control target key start
LH: loop header
LB: loop body
LE: loop exit
PB: predicated region body
PF: predicated region fallthrough
CT: control target
= control target key end

     0   :  { %v216_v0 = vmov 0.0   ;;  %vm35_vm0 = vcmask 7168   ;;  %vm53_vm1 = vcmask 15368   ;;  %vm70_vm2 = vcmask 1047553   ;;  %s242_s0 = inlined_call_operand.vmem [shape: f32[6,6], index: 0, kind: input, shape index: {}]   ;;  %s243_s1 = inlined_call_operand.vmem [shape: f32[6,6], index: 1, kind: output, shape index: {}]  }
   0x1   :  { %34 = vst [vmem:[#allocation1] sm:$0xff] %v216_v0  ;;  %v230_v4 = vld [vmem:[%s242_s0] sm:$0xff]  ;;  %vm71_vm3 = vmand %vm53_vm1, %vm70_vm2  ;;  %vm75_vm4 = vcmask 23568   ;;  %vm92_vm5 = vcmask 1047554   ;;  %vm97_vm7 = vcmask 31768   ;;  %vm114_vm8 = vcmask 1047555  }
   0x2   :  { %30 = vst [vmem:[#allocation0] sm:$0xff] %v230_v4  ;;  %vm93_vm6 = vmand %vm75_vm4, %vm92_vm5  ;;  %vm119_vm10 = vcmask 39968   ;;  %vm136_vm11 = vcmask 1047556   ;;  %vm141_vm13 = vcmask 48168   ;;  %vm158_vm14 = vcmask 1047557  }
   0x3   :  { %vm115_vm9 = vmand %vm97_vm7, %vm114_vm8 }
   0x4   :  { %vm137_vm12 = vmand %vm119_vm10, %vm136_vm11 }
   0x5   :  { %vm159_vm15 = vmand %vm141_vm13, %vm158_vm14 }
   0x8   :  { %v36_v1 = vld [vmem:[#allocation1] ss:$0 sm:$0xff] }
   0x9   :  { %v38_v2 = vmul.f32 %v36_v1, %v36_v1  ;;  %v45_v3 = vmul.f32 0.0, %v36_v1  ;;  %v37_v5 = vld [vmem:[#allocation0] ss:$0 sm:$0xff]  ;;  %v57_v16 = vld [vmem:[#allocation0 + $0x1] ss:$0 sm:$0xff] }
   0xa   :  { %v79_v28 = vld [vmem:[#allocation0 + $0x2] ss:$0 sm:$0xff]  ;;  %v101_v40 = vld [vmem:[#allocation0 + $0x3] ss:$0 sm:$0xff]  ;;  %v123_v52 = vld [vmem:[#allocation0 + $0x4] ss:$0 sm:$0xff] }
   0xb   :  { %39 = vadd.xlane.f32.xlu0 %v38_v2  ;;  %v145_v0 = vld [vmem:[#allocation0 + $0x5] ss:$0 sm:$0xff] }
   0xf   :  { %46 = vadd.xlane.f32.xlu0 %v45_v3 }
  0x98   :  { %v40_v6 = vpop.xlane.xlu0 %39 }
  0x99   :  { %v41_v7 = vsub.f32 %v37_v5, %v40_v6 }
  0x9b   :  { %204 = vrsqrt.f32 %v41_v7 }
  0x9c   :  { %v47_v8 = vpop.xlane.xlu0 %46 }
  0x9d   :  { %v48_v9 = vsub.f32 %v230_v4, %v47_v8 }
  0xa5   :  { %v205_v10 = vpop.eup %204 }
  0xa6   :  { %v49_v11 = vmul.f32 %v205_v10, %v48_v9 }
  0xa8   :  { %v50_v12 = vsel %vm35_vm0, %v49_v11, 0.0 }
  0xa9   :  { %52 = vst [vmem:[#allocation1] sm:$0xff] %v50_v12 }
  0xb0   :  { %v55_v13 = vld [vmem:[#allocation1 + $0x1] ss:$0 sm:$0xff] }
  0xb1   :  { %v58_v14 = vmul.f32 %v55_v13, %v55_v13  ;;  %v65_v15 = vmul.f32 %v55_v13, %v50_v12 }
  0xb3   :  { %59 = vadd.xlane.f32.xlu1 %v58_v14 }
  0xb7   :  { %66 = vadd.xlane.f32.xlu1 %v65_v15 }
 0x140   :  { %v60_v17 = vpop.xlane.xlu1 %59 }
 0x141   :  { %v61_v18 = vsub.f32 %v57_v16, %v60_v17 }
 0x143   :  { %206 = vrsqrt.f32 %v61_v18 }
 0x144   :  { %v67_v19 = vpop.xlane.xlu1 %66 }
 0x145   :  { %v68_v20 = vsub.f32 %v230_v4, %v67_v19 }
 0x14d   :  { %v207_v21 = vpop.eup %206 }
 0x14e   :  { %v69_v22 = vmul.f32 %v207_v21, %v68_v20 }
 0x150   :  { %v72_v23 = vsel %vm71_vm3, %v69_v22, 0.0 }
 0x151   :  { %v73_v24 = vadd.f32 %v72_v23, %v50_v12 }
 0x153   :  { %74 = vst [vmem:[#allocation1] sm:$0xff] %v73_v24 }
 0x15a   :  { %v77_v25 = vld [vmem:[#allocation1 + $0x2] ss:$0 sm:$0xff] }
 0x15b   :  { %v87_v26 = vmul.f32 %v77_v25, %v73_v24  ;;  %v80_v27 = vmul.f32 %v77_v25, %v77_v25 }
 0x15d   :  { %88 = vadd.xlane.f32.xlu1 %v87_v26  ;;  %81 = vadd.xlane.f32.xlu0 %v80_v27 }
 0x1ea   :  { %v82_v29 = vpop.xlane.xlu0 %81  ;;  %v89_v31 = vpop.xlane.xlu1 %88 }
 0x1eb   :  { %v83_v30 = vsub.f32 %v79_v28, %v82_v29  ;;  %v90_v32 = vsub.f32 %v230_v4, %v89_v31 }
 0x1ed   :  { %208 = vrsqrt.f32 %v83_v30 }
 0x1f7   :  { %v209_v33 = vpop.eup %208 }
 0x1f8   :  { %v91_v34 = vmul.f32 %v209_v33, %v90_v32 }
 0x1fa   :  { %v94_v35 = vsel %vm93_vm6, %v91_v34, 0.0 }
 0x1fb   :  { %v95_v36 = vadd.f32 %v94_v35, %v73_v24 }
 0x1fd   :  { %96 = vst [vmem:[#allocation1] sm:$0xff] %v95_v36 }
 0x204   :  { %v99_v37 = vld [vmem:[#allocation1 + $0x3] ss:$0 sm:$0xff] }
 0x205   :  { %v109_v38 = vmul.f32 %v99_v37, %v95_v36  ;;  %v102_v39 = vmul.f32 %v99_v37, %v99_v37 }
 0x207   :  { %110 = vadd.xlane.f32.xlu1 %v109_v38  ;;  %103 = vadd.xlane.f32.xlu0 %v102_v39 }
 0x294   :  { %v104_v41 = vpop.xlane.xlu0 %103  ;;  %v111_v43 = vpop.xlane.xlu1 %110 }
 0x295   :  { %v105_v42 = vsub.f32 %v101_v40, %v104_v41  ;;  %v112_v44 = vsub.f32 %v230_v4, %v111_v43 }
 0x297   :  { %210 = vrsqrt.f32 %v105_v42 }
 0x2a1   :  { %v211_v45 = vpop.eup %210 }
 0x2a2   :  { %v113_v46 = vmul.f32 %v211_v45, %v112_v44 }
 0x2a4   :  { %v116_v47 = vsel %vm115_vm9, %v113_v46, 0.0 }
 0x2a5   :  { %v117_v48 = vadd.f32 %v116_v47, %v95_v36 }
 0x2a7   :  { %118 = vst [vmem:[#allocation1] sm:$0xff] %v117_v48 }
 0x2ae   :  { %v121_v49 = vld [vmem:[#allocation1 + $0x4] ss:$0 sm:$0xff] }
 0x2af   :  { %v131_v50 = vmul.f32 %v121_v49, %v117_v48  ;;  %v124_v51 = vmul.f32 %v121_v49, %v121_v49 }
 0x2b1   :  { %132 = vadd.xlane.f32.xlu1 %v131_v50  ;;  %125 = vadd.xlane.f32.xlu0 %v124_v51 }
 0x33e   :  { %v126_v53 = vpop.xlane.xlu0 %125  ;;  %v133_v55 = vpop.xlane.xlu1 %132 }
 0x33f   :  { %v127_v54 = vsub.f32 %v123_v52, %v126_v53  ;;  %v134_v56 = vsub.f32 %v230_v4, %v133_v55 }
 0x341   :  { %212 = vrsqrt.f32 %v127_v54 }
 0x34b   :  { %v213_v57 = vpop.eup %212 }
 0x34c   :  { %v135_v58 = vmul.f32 %v213_v57, %v134_v56 }
 0x34e   :  { %v138_v59 = vsel %vm137_vm12, %v135_v58, 0.0 }
 0x34f   :  { %v139_v60 = vadd.f32 %v138_v59, %v117_v48 }
 0x351   :  { %140 = vst [vmem:[#allocation1] sm:$0xff] %v139_v60 }
 0x358   :  { %v143_v61 = vld [vmem:[#allocation1 + $0x5] ss:$0 sm:$0xff] }
 0x359   :  { %v153_v62 = vmul.f32 %v143_v61, %v139_v60  ;;  %v146_v63 = vmul.f32 %v143_v61, %v143_v61 }
 0x35b   :  { %154 = vadd.xlane.f32.xlu1 %v153_v62  ;;  %147 = vadd.xlane.f32.xlu0 %v146_v63 }
 0x3e8   :  { %v148_v1 = vpop.xlane.xlu0 %147  ;;  %v155_v3 = vpop.xlane.xlu1 %154 }
 0x3e9   :  { %v149_v2 = vsub.f32 %v145_v0, %v148_v1  ;;  %v156_v5 = vsub.f32 %v230_v4, %v155_v3 }
 0x3eb   :  { %214 = vrsqrt.f32 %v149_v2 }
 0x3f5   :  { %v215_v6 = vpop.eup %214 }
 0x3f6   :  { %v157_v7 = vmul.f32 %v215_v6, %v156_v5 }
 0x3f8   :  { %v160_v8 = vsel %vm159_vm15, %v157_v7, 0.0 }
 0x3f9   :  { %v161_v9 = vadd.f32 %v160_v8, %v139_v60 }
 0x3fb   :  { %162 = vst [vmem:[#allocation1] sm:$0xff] %v161_v9  ;;  %191 = vst [vmem:[%s243_s1] sm:$0xff] %v161_v9 }

// kernel: custom-call.121
= control target key start
LH: loop header
LB: loop body
LE: loop exit
PB: predicated region body
PF: predicated region fallthrough
CT: control target
= control target key end

     0   :  { %v34_v0 = vlaneseq  ;;  %v160_v9 = vmov -1.0   ;;  %s177_s0 = inlined_call_operand.vmem [shape: f32[1,6,6], index: 0, kind: input, shape index: {}]   ;;  %s178_s1 = inlined_call_operand.vmem [shape: f32[1,6,6], index: 1, kind: output, shape index: {}]  }
   0x1   :  { %v29_v1 = vld [vmem:[%s177_s0] sm:$0xff] }
   0x2   :  { %v35_v2 = vand.u32 127, %v34_v0  ;;  %v38_v3 = vshrl.u32 %v34_v0, 7 }
   0x4   :  { %vm36_vm0 = vcmp.lt.s32.totalorder %v35_v2, 6  ;;  %vm40_vm1 = vcmp.eq.s32.totalorder %v38_v3, %v35_v2  ;;  %vm45_vm2 = vcmp.ge.s32.totalorder %v38_v3, %v35_v2  ;;  %vm59_vm4 = vcmp.eq.s32.totalorder %v35_v2, 0 }
   0x5   :  { %v42_v4 = vsel %vm40_vm1, %v29_v1, 0.0  ;;  %vm46_vm3 = vmand %vm45_vm2, %vm36_vm0  ;;  %vm56_vm5 = vcmp.eq.s32.totalorder %v35_v2, %v38_v3  ;;  %v60_v10 = vsel %vm59_vm4, 1.0, %v160_v9  ;;  %vm67_vm6 = vcmp.eq.s32.totalorder %v35_v2, 1 }
   0x6   :  { %v47_v5 = vsel %vm46_vm3, %v29_v1, 0.0  ;;  %43 = vadd.xlane.f32.xlu0 %v42_v4  ;;  %v61_v11 = vsel %vm56_vm5, %v60_v10, 0.0  ;;  %vm77_vm7 = vcmp.eq.s32.totalorder %v35_v2, 2  ;;  %vm87_vm8 = vcmp.eq.s32.totalorder %v35_v2, 3 }
   0x7   :  { %vm97_vm9 = vcmp.eq.s32.totalorder %v35_v2, 4  ;;  %vm107_vm10 = vcmp.eq.s32.totalorder %v35_v2, 5 }
  0x93   :  { %v44_v6 = vpop.xlane.xlu0 %43 }
  0x94   :  { %158 = vrcp.f32 %v44_v6  ;;  %vm114_vm11 = vweird.f32 %v44_v6 }
  0x9e   :  { %v159_v7 = vpop.eup %158 }
  0x9f   :  { %v49_v8 = vmul.f32 %v159_v7, %v47_v5 }
  0xa1   :  { %50 = vst [vmem:[#allocation2] sm:$0xff] %v49_v8 }
  0xa8   :  { %v63_v12 = vld [vmem:[#allocation2 + $0x1] ss:$0 sm:$0xff]  ;;  %v73_v15 = vld [vmem:[#allocation2 + $0x2] ss:$0 sm:$0xff]  ;;  %v83_v20 = vld [vmem:[#allocation2 + $0x3] ss:$0 sm:$0xff] }
  0xa9   :  { %v64_v13 = vxor.u32 2147483648, %v63_v12  ;;  %v74_v17 = vxor.u32 2147483648, %v73_v15  ;;  %v84_v22 = vxor.u32 2147483648, %v83_v20  ;;  %v93_v25 = vld [vmem:[#allocation2 + $0x4] ss:$0 sm:$0xff] }
  0xaa   :  { %v94_v27 = vxor.u32 2147483648, %v93_v25  ;;  %v103_v30 = vld [vmem:[#allocation2 + $0x5] ss:$0 sm:$0xff] }
  0xab   :  { %v68_v14 = vmul.f32 %v64_v13, %v61_v11  ;;  %v104_v32 = vxor.u32 2147483648, %v103_v30 }
  0xad   :  { %69 = vadd.xlane.f32.xlu0 %v68_v14 }
 0x13a   :  { %v70_v16 = vpop.xlane.xlu0 %69 }
 0x13b   :  { %v71_v18 = vsel %vm67_vm6, %v70_v16, %v61_v11 }
 0x13c   :  { %v78_v19 = vmul.f32 %v74_v17, %v71_v18 }
 0x13e   :  { %79 = vadd.xlane.f32.xlu1 %v78_v19 }
 0x1cb   :  { %v80_v21 = vpop.xlane.xlu1 %79 }
 0x1cc   :  { %v81_v23 = vsel %vm77_vm7, %v80_v21, %v71_v18 }
 0x1cd   :  { %v88_v24 = vmul.f32 %v84_v22, %v81_v23 }
 0x1cf   :  { %89 = vadd.xlane.f32.xlu1 %v88_v24 }
 0x25c   :  { %v90_v26 = vpop.xlane.xlu1 %89 }
 0x25d   :  { %v91_v28 = vsel %vm87_vm8, %v90_v26, %v81_v23 }
 0x25e   :  { %v98_v29 = vmul.f32 %v94_v27, %v91_v28 }
 0x260   :  { %99 = vadd.xlane.f32.xlu0 %v98_v29 }
 0x2ed   :  { %v100_v31 = vpop.xlane.xlu0 %99 }
 0x2ee   :  { %v101_v33 = vsel %vm97_vm9, %v100_v31, %v91_v28 }
 0x2ef   :  { %v108_v34 = vmul.f32 %v104_v32, %v101_v33 }
 0x2f1   :  { %109 = vadd.xlane.f32.xlu1 %v108_v34 }
 0x37e   :  { %v110_v35 = vpop.xlane.xlu1 %109 }
 0x37f   :  { %v111_v36 = vsel %vm107_vm10, %v110_v35, %v101_v33 }
 0x380   :  { %v113_v37 = vmul.f32 %v159_v7, %v111_v36 }
 0x382   :  { %v115_v38 = vsel %vm114_vm11, %v111_v36, %v113_v37 }
 0x383   :  { %145 = vst [vmem:[%s178_s1] sm:$0xff] %v115_v38 }

// kernel: reverse.1
= control target key start
LH: loop header
LB: loop body
LE: loop exit
PB: predicated region body
PF: predicated region fallthrough
CT: control target
= control target key end

     0   :  { %v2_v0 = vlaneseq  ;;  %s123_s0 = inlined_call_operand.vmem [shape: f32[6], index: 0, kind: input, shape index: {}]   ;;  %s124_s1 = inlined_call_operand.vmem [shape: f32[6], index: 1, kind: output, shape index: {}]  }
   0x2   :  { %v3_v1 = vsub.s32 5, %v2_v0 }
   0x4   :  { %4 = vset.pattern.permute.xlu0 %v3_v1 }
   0x5   :  { %v43_v2 = vld [vmem:[#allocation1] sm:$0x1]  ;;  %v21_v3 = vld [vmem:[%s123_s0] sm:$0x1]  ;;  %v58_v10 = vshrl.u32 %v2_v0, 7 }
   0x6   :  { %44 = vst [vmem:[#allocation0] sm:$0x1] %v43_v2  ;;  %22 = vst [vmem:[#allocation1 + $0x1] sm:$0x1] %v21_v3 }
   0x7   :  { %vm59_vm0 = vcmp.lt.s32.totalorder %v58_v10, 1 }
   0xd   :  { %v46_v4 = vld [vmem:[#allocation0 + $0x7] ss:$-1 sm:$0xff]  ;;  %v40_v5 = vld [vmem:[#allocation1 + $0x1] sm:$0x1] }
   0xe   :  { %v47_v6 = vrot.slane %v46_v4, 7  ;;  %42 = vst [vmem:[#allocation0 + $0x8] sm:$0x1] %v40_v5 }
  0x10   :  { %48 = vperm.xlu0 %4, %v47_v6  }
  0x15   :  { %v53_v7 = vld [vmem:[#allocation0 + $0xf] ss:$-1 sm:$0xff] }
  0x16   :  { %v54_v8 = vrot.slane %v53_v7, 7 }
  0x18   :  { %55 = vperm.xlu0 %4, %v54_v8  }
  0x8f   :  { %v49_v9 = vpop.permute.xlu0 %48 }
  0x90   :  { %50 = vst [vmem:[#allocation2] sm:$0xff] %v49_v9 }
  0x97   :  { %v56_v11 = vpop.permute.xlu0 %55 }
  0x98   :  { %60 = vst.msk [vmem:[#allocation2] sm:$0xff] %vm59_vm0, %v56_v11 }
  0x9f   :  { %v64_v12 = vld [vmem:[#allocation2] sm:$0x1] }
  0xa0   :  { %66 = vst [vmem:[#allocation3] sm:$0x1] %v64_v12 }
  0xa7   :  { %v82_v13 = vld [vmem:[#allocation3] sm:$0x1] }
  0xa8   :  { %83 = vst [vmem:[%s124_s1] sm:$0x1] %v82_v13 }

// kernel: custom-call.55
= control target key start
LH: loop header
LB: loop body
LE: loop exit
PB: predicated region body
PF: predicated region fallthrough
CT: control target
= control target key end

     0   :  { %11 = vsyncpa [#allocation14], 0  ;;  %s1851_s0 = inlined_call_operand.vmem [shape: f32[3,3], index: 0, kind: input, shape index: {}]   ;;  %s1852_s1 = inlined_call_operand.vmem [shape: f32[3,3], index: 1, kind: input, shape index: {}]   ;;  %s1853_s2 = inlined_call_operand.vmem [shape: f32[3,3], index: 2, kind: input, shape index: {}]   ;;  %s1854_s3 = inlined_call_operand.vmem [shape: f32[3,3], index: 3, kind: input, shape index: {}]   ;;  %s1855_s4 = inlined_call_operand.vmem [shape: f32[3], index: 4, kind: output, shape index: {0}]   ;;  %s1856_s5 = inlined_call_operand.vmem [shape: f32[3], index: 5, kind: output, shape index: {1}]   ;;  %s1857_s6 = inlined_call_operand.hbm [shape: f32[3,3], index: 6, kind: output, shape index: {2}]   ;;  %s1858_s7 = inlined_call_operand.hbm [shape: f32[3,3], index: 7, kind: output, shape index: {3}]   ;;  %s1859_s8 = inlined_call_operand.hbm [shape: f32[3,3], index: 8, kind: output, shape index: {4}]   ;;  %s1860_s9 = inlined_call_operand.hbm [shape: f32[3,3], index: 9, kind: output, shape index: {5}]  }
   0x1   :  { %12 = vsyncpa [#allocation17], 0 }
   0x2   :  { %13 = vsyncpa [#allocation22], 0  ;;  %v74_v0 = vld [vmem:[%s1851_s0] sm:$0xf]  ;;  %v295_v2 = vlaneseq  ;;  %v1527_v7 = vmov 0.0   ;;  %s294_s0 = smov [#allocation12] }
   0x3   :  { %v136_v1 = vld [vmem:[%s1852_s1] sm:$0xf]  ;;  %75 = vst [vmem:[#allocation1] sm:$0xf] %v74_v0  ;;  %290 = vst [vmem:[#allocation12] sm:$0xff] %v1527_v7  ;;  %s307_s1 = smov [#allocation20] }
   0x4   :  { %137 = vst [vmem:[#allocation3] sm:$0xf] %v136_v1  ;;  %v198_v3 = vld [vmem:[%s1853_s2] sm:$0xf]  ;;  %v1596_v5 = vand.u32 127, %v295_v2  ;;  %v1598_v6 = vshrl.u32 %v295_v2, 7 }
   0x5   :  { %v260_v4 = vld [vmem:[%s1854_s3] sm:$0xf]  ;;  %199 = vst [vmem:[#allocation5] sm:$0xf] %v198_v3  ;;  %291 = vst [vmem:[#allocation15] sm:$0xff] %v1527_v7  ;;  %s278_s2 = smov [#allocation23] }
   0x6   :  { %261 = vst [vmem:[#allocation7] sm:$0xf] %v260_v4  ;;  %292 = vst [vmem:[#allocation18] sm:$0xff] %v1527_v7  ;;  %v297_v5 = vmov %v1596_v5  ;;  %v300_v6 = vmov %v1598_v6  ;;  %s281_s3 = smov [#allocation24]  ;;  %s284_s17 = smov [#allocation25]  ;;  %vm1223_vm2 = vcmp.lt.s32.totalorder %v1596_v5, 3 }
   0x7   :  { %293 = vst [vmem:[#allocation20] sm:$0xff] %v1527_v7  ;;  %v310_v5 = vmov %v1596_v5  ;;  %v313_v6 = vmov %v1598_v6  ;;  %vm304_vm0 = vcmp.eq.s32.totalorder %v300_v6, %v297_v5  ;;  %s287_s18 = smov [#allocation26]  ;;  %s1219_s19 = smov [#allocation23] }
   0x8   :  { %vm317_vm1 = vcmp.eq.s32.totalorder %v313_v6, %v310_v5  ;;  %s1236_s20 = smov [#allocation24]  ;;  %v1215_v5 = vmov %v1596_v5  ;;  %v1218_v6 = vmov %v1598_v6  ;;  %s1253_s21 = smov [#allocation25] }
   0x9   :  { %s1270_s22 = smov [#allocation26]  ;;  %vm1228_vm3 = vcmp.eq.s32.totalorder %v1218_v6, %v1215_v5  ;;  %v1266_v5 = vmov %v1596_v5  ;;  %v1235_v6 = vmov %v1598_v6 }
   0xa   :  { %v264_v8 = vld [vmem:[#allocation1] sm:$0xf]  ;;  %v301_v12 = vld [vmem:[%s294_s0] sm:$0x7]  ;;  %v1232_v5 = vmov %v1596_v5  ;;  %v1269_v6 = vmov %v1598_v6 }
   0xb   :  { %v268_v9 = vld [vmem:[#allocation3] sm:$0xf]  ;;  %265 = vst [vmem:[#allocation0] sm:$0xf] %v264_v8  ;;  %v305_v14 = vsel %vm304_vm0, 1.0, %v301_v12  ;;  %v1249_v5 = vmov %v1596_v5  ;;  %v1252_v6 = vmov %v1598_v6  ;;  %vm1279_vm4 = vcmp.eq.s32.totalorder %v1269_v6, %v1266_v5 }
   0xc   :  { %269 = vst [vmem:[#allocation2] sm:$0xf] %v268_v9  ;;  %v272_v10 = vld [vmem:[#allocation5] sm:$0xf]  ;;  %306 = vst [vmem:[%s294_s0] sm:$0x7] %v305_v14 }
   0xd   :  { %v276_v11 = vld [vmem:[#allocation7] sm:$0xf]  ;;  %273 = vst [vmem:[#allocation4] sm:$0xf] %v272_v10 }
   0xe   :  { %277 = vst [vmem:[#allocation6] sm:$0xf] %v276_v11  ;;  %v314_v13 = vld [vmem:[%s307_s1] sm:$0x7] }
   0xf   :  { %v318_v15 = vsel %vm317_vm1, 1.0, %v314_v13 }
  0x10   :  { %319 = vst [vmem:[%s307_s1] sm:$0x7] %v318_v15 }
  0x12   :  { %v279_v16 = vld [vmem:[#allocation0] sm:$0xff] }
  0x13   :  { %v282_v17 = vld [vmem:[#allocation2] sm:$0xff]  ;;  %280 = vst [vmem:[%s278_s2] sm:$0xff] %v279_v16 }
  0x14   :  { %283 = vst [vmem:[%s281_s3] sm:$0xff] %v282_v17  ;;  %v285_v18 = vld [vmem:[#allocation4] sm:$0xff] }
  0x15   :  { %v288_v19 = vld [vmem:[#allocation6] sm:$0xff]  ;;  %286 = vst [vmem:[%s284_s17] sm:$0xff] %v285_v18 }
  0x16   :  { %289 = vst [vmem:[%s287_s18] sm:$0xff] %v288_v19 }
  0x1a   :  { %v1225_v20 = vld [vmem:[%s1219_s19] sm:$0x7] }
  0x1b   :  { %v1242_v21 = vld [vmem:[%s1236_s20] sm:$0x7]  ;;  %v1226_v22 = vsel %vm1223_vm2, %v1225_v20, 0.0 }
  0x1c   :  { %v1243_v23 = vsel %vm1223_vm2, %v1242_v21, 0.0  ;;  %v1259_v24 = vld [vmem:[%s1253_s21] sm:$0x7]  ;;  %v1227_v26 = vmul.f32 %v1226_v22, %v1226_v22 }
  0x1d   :  { %v1276_v25 = vld [vmem:[%s1270_s22] sm:$0x7]  ;;  %v1244_v27 = vmul.f32 %v1243_v23, %v1243_v23  ;;  %v1260_v28 = vsel %vm1223_vm2, %v1259_v24, 0.0 }
  0x1e   :  { %v1277_v29 = vsel %vm1223_vm2, %v1276_v25, 0.0  ;;  %v1261_v30 = vmul.f32 %v1260_v28, %v1260_v28  ;;  %v1229_v33 = vsel %vm1228_vm3, 0.0, %v1227_v26 }
  0x1f   :  { %v1246_v31 = vadd.f32 %v1244_v27, %v1227_v26  ;;  %v1278_v32 = vmul.f32 %v1277_v29, %v1277_v29  ;;  %v1245_v34 = vadd.f32 %v1244_v27, %v1229_v33 }
  0x21   :  { %v1263_v35 = vadd.f32 %v1261_v30, %v1246_v31  ;;  %v1262_v36 = vadd.f32 %v1261_v30, %v1245_v34  ;;  %v1280_v37 = vsel %vm1279_vm4, 0.0, %v1278_v32 }
  0x23   :  { %v1282_v38 = vadd.f32 %v1278_v32, %v1263_v35  ;;  %v1281_v39 = vadd.f32 %v1280_v37, %v1262_v36 }
  0x25   :  { %1283 = vadd.xlane.f32.xlu0 %v1282_v38 }
  0x29   :  { %1291 = vadd.xlane.f32.xlu0 %v1281_v39 }
  0xb2   :  { %v1284_v40 = vpop.xlane.xlu0 %1283 }
  0xb3   :  { %v1285_v41 = vrot.slane %v1284_v40, 4 }
  0xb5   :  { %v1286_v42 = vadd.f32 %v1285_v41, %v1284_v40 }
  0xb6   :  { %v1292_v43 = vpop.xlane.xlu0 %1291 }
  0xb7   :  { %v1287_v44 = vrot.slane %v1286_v42, 2  ;;  %v1293_v45 = vrot.slane %v1292_v43, 4 }
  0xb9   :  { %v1294_v46 = vadd.f32 %v1293_v45, %v1292_v43  ;;  %v1288_v47 = vadd.f32 %v1287_v44, %v1286_v42 }
  0xbb   :  { %v1295_v48 = vrot.slane %v1294_v46, 2  ;;  %v1289_v50 = vrot.slane %v1288_v47, 1 }
  0xbd   :  { %v1296_v49 = vadd.f32 %v1295_v48, %v1294_v46  ;;  %v1290_v53 = vadd.f32 %v1289_v50, %v1288_v47 }
  0xbf   :  { %v1297_v51 = vrot.slane %v1296_v49, 1 }
  0xc1   :  { %v1298_v52 = vadd.f32 %v1297_v51, %v1296_v49 }
  0xc3   :  { %1378 = vpush %v1298_v52 }
  0xc4   :  { %1380 = vpush %v1290_v53 }
  0xf4   :  { %s1379_s23 = spop %1378 }
  0xf5   :  { %s1381_s24 = spop %1380 }
  0xf6   :  { %s1301_s25 = smul.f32 1e-10, %s1381_s24 }
  0xf8   :  { %p1302_p0 = scmp.le.f32.partialorder %s1379_s23, %s1301_s25 }
  0xf9   :  { %s1622_s26 = smov (!%p1302_p0), 0  }
  0xfa   :  { %1305 = sbr.rel (%p1302_p0) target bundleno = 932 (0x3a4), region = 324 }
 0x101 LB: > { %s1627_s27 = smov 0   ;;  %s1521_s26 = sphi %s1622_s26, %s1861_s26  }
 0x102 LB: >> { %s424_s28 = smov [#allocation23]  ;;  %v428_v5 = vmov %v1596_v5  ;;  %v431_v6 = vmov %v1598_v6  ;;  %s444_s29 = smov [#allocation24]  ;;  %vm747_vm14 = vcmp.eq.s32.totalorder %v1598_v6, 0  ;;  %vm759_vm15 = vcmp.eq.s32.totalorder %v1598_v6, 2  ;;  %s1525_s27 = sphi %s1627_s27, %s423_s27  }
 0x103   : >> { %v448_v5 = vmov %v1596_v5  ;;  %v451_v6 = vmov %v1598_v6  ;;  %v432_v54 = vld [vmem:[%s424_s28] sm:$0x7]  ;;  %vm435_vm5 = vcmp.eq.s32.totalorder %v431_v6, %v428_v5  ;;  %s464_s30 = smov [#allocation26]  ;;  %s425_s10 = smov [#allocation27] }
 0x104   : >> { %vm455_vm6 = vcmp.eq.s32.totalorder %v451_v6, %v448_v5  ;;  %v468_v5 = vmov %v1596_v5  ;;  %v471_v6 = vmov %v1598_v6  ;;  %v436_v55 = vsel %vm435_vm5, %v432_v54, 0.0  ;;  %v452_v56 = vld [vmem:[%s444_s29] sm:$0x7]  ;;  %s445_s11 = smov [#allocation28]  ;;  %s465_s12 = smov [#allocation29] }
 0x105   : >> { %vm475_vm7 = vcmp.eq.s32.totalorder %v471_v6, %v468_v5  ;;  %v437_v57 = vrot.slane %v436_v55, 4  ;;  %v456_v58 = vsel %vm455_vm6, %v452_v56, 0.0  ;;  %v472_v59 = vld [vmem:[%s464_s30] sm:$0x7]  ;;  %s488_s13 = smov [#allocation28]  ;;  %s486_s14 = smov [#allocation27]  ;;  %v537_v5 = vmov %v1596_v5 }
 0x106   : >> { %v457_v60 = vrot.slane %v456_v58, 4  ;;  %v476_v61 = vsel %vm475_vm7, %v472_v59, 0.0  ;;  %s490_s15 = smov [#allocation29]  ;;  %s525_s16 = smov [#allocation30]  ;;  %v540_v6 = vmov %v1598_v6  ;;  %v552_v5 = vmov %v1596_v5 }
 0x107   : >> { %v438_v62 = vadd.f32 %v437_v57, %v436_v55  ;;  %v477_v63 = vrot.slane %v476_v61, 4  ;;  %s527_s0 = smov [#allocation31]  ;;  %s484_s1 = smov [#allocation32]  ;;  %v555_v6 = vmov %v1598_v6  ;;  %vm542_vm12 = vcmp.eq.s32.totalorder %v540_v6, %v537_v5 }
 0x108   : >> { %v458_v0 = vadd.f32 %v457_v60, %v456_v58  ;;  %s485_s2 = smov [#allocation33]  ;;  %s529_s1 = smov %s484_s1  ;;  %vm557_vm13 = vcmp.eq.s32.totalorder %v555_v6, %v552_v5  ;;  %v650_v5 = vmov %v1596_v5  ;;  %v653_v6 = vmov %v1598_v6 }
 0x109   : >> { %v439_v1 = vrot.slane %v438_v62, 2  ;;  %v478_v2 = vadd.f32 %v477_v63, %v476_v61  ;;  %s531_s2 = smov %s485_s2  ;;  %s533_s3 = smov [#allocation32]  ;;  %v664_v5 = vmov %v1596_v5  ;;  %v667_v6 = vmov %v1598_v6 }
 0x10a   : >> { %v459_v3 = vrot.slane %v458_v0, 2  ;;  %s548_s17 = smov [#allocation33]  ;;  %s546_s18 = smov [#allocation34]  ;;  %vm657_vm0 = vcmp.eq.s32.totalorder %v653_v6, %v650_v5  ;;  %v623_v5 = vmov %v1596_v5  ;;  %v626_v6 = vmov %v1598_v6 }
 0x10b   : >> { %v440_v4 = vadd.f32 %v439_v1, %v438_v62  ;;  %v479_v7 = vrot.slane %v478_v2, 2  ;;  %s563_s19 = smov [#allocation34]  ;;  %s1642_s20 = smov [#allocation23]  ;;  %v637_v5 = vmov %v1596_v5  ;;  %v640_v6 = vmov %v1598_v6 }
 0x10c   : >> { %v460_v8 = vadd.f32 %v459_v3, %v458_v0  ;;  %s561_s21 = smov [#allocation35]  ;;  %s1644_s22 = smov [#allocation24]  ;;  %v571_v53 = vld [vmem:[%s1642_s20] sm:$0x7]  ;;  %vm672_vm1 = vcmp.eq.s32.totalorder %v667_v6, %v664_v5  ;;  %vm631_vm3 = vcmp.eq.s32.totalorder %v626_v6, %v623_v5  ;;  %vm644_vm4 = vcmp.eq.s32.totalorder %v640_v6, %v637_v5 }
 0x10d   : >> { %v441_v9 = vrot.slane %v440_v4, 1  ;;  %v480_v10 = vadd.f32 %v479_v7, %v478_v2  ;;  %s1646_s23 = smov [#allocation25]  ;;  %s1648_s24 = smov [#allocation26]  ;;  %v572_v54 = vld [vmem:[%s1644_s22] sm:$0x7]  ;;  %vm686_vm5 = vcmp.eq.s32.totalorder %v1596_v5, 0 }
 0x10e   : >> { %v461_v11 = vrot.slane %v460_v8, 1  ;;  %s1650_s25 = smov [#allocation12]  ;;  %s1652_s28 = smov [#allocation15]  ;;  %v573_v55 = vld [vmem:[%s1646_s23] sm:$0x7]  ;;  %vm690_vm6 = vcmp.eq.s32.totalorder %v1596_v5, 1 }
 0x10f   : >> { %v442_v12 = vadd.f32 %v441_v9, %v440_v4  ;;  %v481_v13 = vrot.slane %v480_v10, 1  ;;  %s1654_s29 = smov [#allocation18]  ;;  %s787_s30 = smov [#allocation34]  ;;  %v574_v56 = vld [vmem:[%s1648_s24] sm:$0x7]  ;;  %vm703_vm7 = vcmp.eq.s32.totalorder %v1596_v5, 2 }
 0x110   : >> { %v462_v14 = vadd.f32 %v461_v11, %v460_v8  ;;  %v795_v57 = vld [vmem:[%s1650_s25] sm:$0x7]  ;;  %s423_s27 = sadd.s32 1, %s1525_s27  }
 0x111   : >> { %443 = vst [vmem:[%s425_s10] sm:$0x1] %v442_v12  ;;  %v482_v15 = vadd.f32 %v481_v13, %v480_v10  ;;  %s1658_s10 = smov [#allocation20]  ;;  %v796_v58 = vld [vmem:[%s1652_s28] sm:$0x7]  ;;  %p420_p1 = scmp.ge.s32.totalorder %s423_s27, 5  }
 0x112   : >> { %463 = vst [vmem:[%s445_s11] sm:$0x1] %v462_v14  ;;  %v797_v59 = vld [vmem:[%s1654_s29] sm:$0x7]  ;;  %s565_s11 = smov [#allocation35]  ;;  %v324_v5 = vmov (%p420_p1), %v1596_v5  ;;  %v327_v6 = vmov (%p420_p1), %v1598_v6 }
 0x113   : >> { %483 = vst [vmem:[%s465_s12] sm:$0x1] %v482_v15  ;;  %v798_v61 = vld [vmem:[%s1658_s10] sm:$0x7]  ;;  %s789_s12 = smov [#allocation35]  ;;  %v377_v5 = vmov (%p420_p1), %v1596_v5 }
 0x118   : >> { %v487_v18 = vld [vmem:[%s486_s14] sm:$0xff]  ;;  %s593_s14 = smov [#allocation33] }
 0x119   : >> { %v489_v16 = vld [vmem:[%s488_s13] sm:$0xff]  ;;  %v510_v31 = vand.u32 2147483647, %v487_v18  ;;  %s591_s13 = smov [#allocation32] }
 0x11a   : >> { %v493_v17 = vmul.f32 2.0, %v489_v16  ;;  %v491_v19 = vld [vmem:[%s490_s15] sm:$0xff]  ;;  %v511_v36 = vand.u32 2147483647, %v489_v16  ;;  %s1674_s15 = smov [#allocation12] }
 0x11b   : >> { %v492_v20 = vsub.f32 %v491_v19, %v487_v18  ;;  %v512_v32 = vand.u32 2147483647, %v491_v19 }
 0x11c   : >> { %1409 = vrcp.f32 %v493_v17 }
 0x11d   : >> { %v513_v35 = vmin.f32 %v510_v31, %v512_v32 }
 0x11f   : >> { %v514_v37 = vmul.f32 1.1920929e-08, %v513_v35 }
 0x121   : >> { %vm515_vm11 = vcmp.le.f32.partialorder %v511_v36, %v514_v37 }
 0x126   : >> { %v1410_v21 = vpop.eup %1409 }
 0x127   : >> { %v495_v22 = vmul.f32 %v1410_v21, %v492_v20 }
 0x129   : >> { %v497_v23 = vmul.f32 %v495_v22, %v495_v22  ;;  %vm496_vm10 = vcmp.ge.f32.partialorder %v495_v22, 0.0 }
 0x12b   : >> { %v498_v24 = vadd.f32 1.0, %v497_v23 }
 0x12d   : >> { %1411 = vrsqrt.f32 %v498_v24  ;;  %vm501_vm8 = vcmp.eq.f32.partialorder %v498_v24, inf  ;;  %v504_v26 = vand.u32 2147483648, %v498_v24  ;;  %vm503_vm9 = vcmp.eq.f32.partialorder %v498_v24, 0.0 }
 0x137   : >> { %v1412_v25 = vpop.eup %1411 }
 0x138   : >> { %v500_v27 = vmul.f32 %v1412_v25, %v498_v24 }
 0x13a   : >> { %v502_v28 = vsel %vm501_vm8, %v498_v24, %v500_v27  ;;  %vm339_vm8 = vcmp.eq.s32.totalorder (%p420_p1), %v327_v6, %v324_v5  ;;  %v380_v6 = vmov (%p420_p1), %v1598_v6  ;;  %v343_v5 = vmov (%p420_p1), %v1596_v5 }
 0x13b   : >> { %v505_v29 = vsel %vm503_vm9, %v504_v26, %v502_v28  ;;  %v346_v6 = vmov (%p420_p1), %v1598_v6  ;;  %v360_v5 = vmov (%p420_p1), %v1596_v5  ;;  %vm392_vm9 = vcmp.eq.s32.totalorder (%p420_p1), %v380_v6, %v377_v5 }
 0x13c   : >> { %v506_v30 = vxor.u32 2147483648, %v505_v29  ;;  %v363_v6 = vmov (%p420_p1), %v1598_v6 }
 0x13e   : >> { %v507_v33 = vsel %vm496_vm10, %v505_v29, %v506_v30 }
 0x13f   : >> { %v508_v34 = vadd.f32 %v507_v33, %v495_v22 }
 0x141   : >> { %1413 = vrcp.f32 %v508_v34 }
 0x14b   : >> { %v1414_v38 = vpop.eup %1413 }
 0x14c   : >> { %v516_v39 = vsel %vm515_vm11, 0.0, %v1414_v38 }
 0x14d   : >> { %v517_v40 = vmul.f32 %v516_v39, %v516_v39  ;;  %v521_v41 = vmul.f32 %v516_v39, %v489_v16 }
 0x14f   : >> { %v518_v42 = vadd.f32 1.0, %v517_v40  ;;  %v522_v43 = vsub.f32 %v487_v18, %v521_v41  ;;  %v524_v44 = vadd.f32 %v521_v41, %v491_v19 }
 0x151   : >> { %1415 = vrsqrt.f32 %v518_v42  ;;  %526 = vst [vmem:[%s525_s16] sm:$0xff] %v522_v43  ;;  %528 = vst [vmem:[%s527_s0] sm:$0xff] %v524_v44  ;;  %s1676_s16 = smov [#allocation25]  ;;  %s1678_s0 = smov [#allocation26] }
 0x15b   : >> { %v1416_v45 = vpop.eup %1415 }
 0x15c   : >> { %530 = vst [vmem:[%s529_s1] sm:$0xff] %v1416_v45  ;;  %v520_v46 = vmul.f32 %v1416_v45, %v516_v39  ;;  %s1680_s1 = smov [#allocation23] }
 0x15e   : >> { %532 = vst [vmem:[%s531_s2] sm:$0xff] %v520_v46  ;;  %s1682_s2 = smov [#allocation18] }
 0x163   : >> { %v534_v47 = vld [vmem:[%s533_s3] ss:$0 sm:$0xff]  ;;  %s1684_s3 = smov [#allocation15] }
 0x164   : >> { %v543_v48 = vsel %vm542_vm12, %v534_v47, 0.0  ;;  %v592_v27 = vld [vmem:[%s591_s13] ss:$0 sm:$0xff]  ;;  %s763_s13 = smov [#allocation24] }
 0x165   : >> { %544 = vadd.xlane.f32.xlu0 %v543_v48  ;;  %v549_v49 = vld [vmem:[%s548_s17] ss:$0 sm:$0xff]  ;;  %s1688_s17 = smov [#allocation20] }
 0x166   : >> { %v558_v50 = vsel %vm557_vm13, %v549_v49, 0.0  ;;  %v594_v28 = vld [vmem:[%s593_s14] ss:$0 sm:$0xff]  ;;  %s740_s14 = smov [#allocation25] }
 0x169   : >> { %559 = vadd.xlane.f32.xlu0 %v558_v50 }
 0x1f2   : >> { %v545_v51 = vpop.xlane.xlu0 %544 }
 0x1f3   : >> { %547 = vst [vmem:[%s546_s18] sm:$0xff] %v545_v51  ;;  %s1690_s18 = smov [#allocation24] }
 0x1f6   : >> { %v560_v52 = vpop.xlane.xlu0 %559 }
 0x1f7   : >> { %562 = vst [vmem:[%s561_s21] sm:$0xff] %v560_v52  ;;  %s660_s21 = smov [#allocation26] }
 0x1fa   : >> { %v564_v60 = vld [vmem:[%s563_s19] sm:$0xff]  ;;  %s661_s19 = smov [#allocation31] }
 0x1fb   : >> { %v788_v62 = vld [vmem:[%s787_s30] sm:$0xff]  ;;  %v575_v63 = vmul.f32 %v571_v53, %v564_v60  ;;  %v578_v0 = vmul.f32 %v572_v54, %v564_v60  ;;  %v582_v1 = vmul.f32 %v573_v55, %v564_v60  ;;  %v585_v2 = vmul.f32 %v574_v56, %v564_v60  ;;  %s676_s30 = smov [#allocation24] }
 0x1fc   : >> { %v799_v3 = vmul.f32 %v795_v57, %v788_v62  ;;  %v802_v4 = vmul.f32 %v796_v58, %v788_v62  ;;  %v806_v7 = vmul.f32 %v797_v59, %v788_v62  ;;  %v809_v8 = vmul.f32 %v798_v61, %v788_v62 }
 0x1fe   : >> { %v566_v9 = vld [vmem:[%s565_s11] sm:$0xff]  ;;  %s1735_s11 = smov [#allocation26] }
 0x1ff   : >> { %v790_v10 = vld [vmem:[%s789_s12] sm:$0xff]  ;;  %v576_v11 = vmul.f32 %v573_v55, %v566_v9  ;;  %v579_v12 = vmul.f32 %v574_v56, %v566_v9  ;;  %v581_v13 = vmul.f32 %v571_v53, %v566_v9  ;;  %v584_v14 = vmul.f32 %v572_v54, %v566_v9  ;;  %s739_s12 = smov [#allocation23] }
 0x200   : >> { %v800_v15 = vmul.f32 %v797_v59, %v790_v10  ;;  %v803_v16 = vmul.f32 %v798_v61, %v790_v10  ;;  %v805_v17 = vmul.f32 %v795_v57, %v790_v10  ;;  %v808_v18 = vmul.f32 %v796_v58, %v790_v10  ;;  %v668_v59 = vld [vmem:[%s661_s19] ss:$0 sm:$0xff] }
 0x201   : >> { %v577_v19 = vsub.f32 %v575_v63, %v576_v11  ;;  %v580_v20 = vsub.f32 %v578_v0, %v579_v12  ;;  %v583_v21 = vadd.f32 %v582_v1, %v581_v13  ;;  %v586_v22 = vadd.f32 %v585_v2, %v584_v14 }
 0x202   : >> { %v801_v23 = vsub.f32 %v799_v3, %v800_v15  ;;  %v804_v24 = vsub.f32 %v802_v4, %v803_v16  ;;  %v807_v25 = vadd.f32 %v806_v7, %v805_v17  ;;  %v810_v26 = vadd.f32 %v809_v8, %v808_v18 }
 0x203   : >> { %588 = vst [vmem:[%s1644_s22] sm:$0x7] %v580_v20  ;;  %590 = vst [vmem:[%s1648_s24] sm:$0x7] %v586_v22  ;;  %s620_s22 = smov [#allocation30]  ;;  %s634_s24 = smov [#allocation24] }
 0x204   : >> { %587 = vst [vmem:[%s1642_s20] sm:$0x7] %v577_v19  ;;  %589 = vst [vmem:[%s1646_s23] sm:$0x7] %v583_v21  ;;  %s647_s20 = smov [#allocation25]  ;;  %s619_s23 = smov [#allocation23]  ;;  %v627_v63 = vld [vmem:[%s620_s22] ss:$0 sm:$0xff] }
 0x205   : >> { %811 = vst [vmem:[%s1650_s25] sm:$0x7] %v801_v23  ;;  %812 = vst [vmem:[%s1652_s28] sm:$0x7] %v804_v24  ;;  %s1732_s25 = smov [#allocation25]  ;;  %s1528_s28 = smov 1  }
 0x206   : >> { %813 = vst [vmem:[%s1654_s29] sm:$0x7] %v807_v25  ;;  %814 = vst [vmem:[%s1658_s10] sm:$0x7] %v810_v26  ;;  %s675_s29 = smov [#allocation23]  ;;  %s1529_s10 = smov 127  }
 0x20a   : >> { %v602_v30 = vld [vmem:[%s1678_s0] sm:$0x7] }
 0x20b   : >> { %v601_v29 = vld [vmem:[%s1676_s16] sm:$0x7]  ;;  %v610_v36 = vmul.f32 %v602_v30, %v594_v28  ;;  %v613_v42 = vmul.f32 %v602_v30, %v592_v27 }
 0x20c   : >> { %v599_v31 = vld [vmem:[%s1680_s1] sm:$0x7]  ;;  %v609_v35 = vmul.f32 %v601_v29, %v592_v27  ;;  %v612_v37 = vmul.f32 %v601_v29, %v594_v28 }
 0x20d   : >> { %v817_v32 = vld [vmem:[%s1674_s15] ss:$0 sm:$0xff]  ;;  %v1365_v34 = vld [vmem:[%s1674_s15 + $0x2] ss:$0 sm:$0xff]  ;;  %v603_v48 = vmul.f32 %v599_v31, %v592_v27  ;;  %v606_v49 = vmul.f32 %v599_v31, %v594_v28 }
 0x20e   : >> { %v1364_v33 = vld [vmem:[%s1674_s15 - $0x1] sm:$0x6]  ;;  %v1369_v45 = vld [vmem:[%s1684_s3 + $0x2] ss:$0 sm:$0xff]  ;;  %v611_v47 = vsub.f32 %v609_v35, %v610_v36  ;;  %v614_v53 = vadd.f32 %v613_v42, %v612_v37 }
 0x20f   : >> { %v824_v38 = vsel %vm747_vm14, %v817_v32, %v1364_v33  ;;  %v828_v39 = vld [vmem:[%s1682_s2] ss:$0 sm:$0xff]  ;;  %v1367_v40 = vld [vmem:[%s1682_s2 + $0x1] sm:$0x3] }
 0x210   : >> { %v841_v41 = vld [vmem:[%s1684_s3] ss:$0 sm:$0xff]  ;;  %827 = vst [vmem:[%s1674_s15] sm:$0x7] %v824_v38  ;;  %v836_v43 = vsel %vm759_vm15, %v1365_v34, %v1367_v40  ;;  %v1371_v51 = vld [vmem:[%s1688_s17 + $0x1] sm:$0x3]  ;;  %617 = vst [vmem:[%s1676_s16] sm:$0x7] %v611_v47 }
 0x211   : >> { %v1368_v44 = vld [vmem:[%s1684_s3 - $0x1] sm:$0x6]  ;;  %1366 = vst [vmem:[%s1674_s15 + $0x1] sm:$0x1] %v828_v39  ;;  %838 = vst [vmem:[%s1682_s2] sm:$0x7] %v836_v43  ;;  %v860_v54 = vsel %vm759_vm15, %v1369_v45, %v1371_v51  ;;  %s764_s15 = smov [#allocation26] }
 0x212   : >> { %v852_v46 = vld [vmem:[%s1688_s17] ss:$0 sm:$0xff]  ;;  %v848_v50 = vsel %vm747_vm14, %v841_v41, %v1368_v44  ;;  %618 = vst [vmem:[%s1678_s0] sm:$0x7] %v614_v53  ;;  %s863_s16 = sadd.s32 (%p420_p1), 1, %s1521_s26   ;;  %s328_s0 = smov (%p420_p1), [#allocation23] }
 0x213   : >> { %v600_v52 = vld [vmem:[%s1690_s18] sm:$0x7]  ;;  %851 = vst [vmem:[%s1684_s3] sm:$0x7] %v848_v50  ;;  %862 = vst [vmem:[%s1688_s17] sm:$0x7] %v860_v54  ;;  %s364_s2 = smov (%p420_p1), [#allocation25]  ;;  %p416_p2 = scmp.ge.s32.totalorder (%p420_p1), %s863_s16, 15 }
 0x214   : >> { %v604_v55 = vmul.f32 %v600_v52, %v594_v28  ;;  %v607_v56 = vmul.f32 %v600_v52, %v592_v27  ;;  %1370 = vst [vmem:[%s1684_s3 + $0x1] sm:$0x1] %v852_v46  ;;  %s381_s3 = smov (%p420_p1), [#allocation26]  ;;  %s1861_s26 = smov (%p420_p1), %s863_s16 }
 0x216   : >> { %v605_v57 = vsub.f32 %v603_v48, %v604_v55  ;;  %v608_v58 = vadd.f32 %v607_v56, %v606_v49 }
 0x217   : >> { %v654_v60 = vld [vmem:[%s647_s20] sm:$0x7] }
 0x218   : >> { %615 = vst [vmem:[%s1680_s1] sm:$0x7] %v605_v57  ;;  %616 = vst [vmem:[%s1690_s18] sm:$0x7] %v608_v58  ;;  %v658_v61 = vsel %vm657_vm0, 0.0, %v654_v60  ;;  %s347_s1 = smov (%p420_p1), [#allocation24] }
 0x219   : >> { %v669_v62 = vld [vmem:[%s660_s21] sm:$0x7]  ;;  %659 = vst [vmem:[%s647_s20] sm:$0x7] %v658_v61 }
 0x21a   : >> { %v673_v0 = vsel %vm672_vm1, %v668_v59, %v669_v62 }
 0x21b   : >> { %674 = vst [vmem:[%s660_s21] sm:$0x7] %v673_v0 }
 0x21f   : >> { %v628_v1 = vld [vmem:[%s619_s23] sm:$0x7] }
 0x220   : >> { %v641_v2 = vld [vmem:[%s634_s24] sm:$0x7]  ;;  %v632_v3 = vsel %vm631_vm3, %v627_v63, %v628_v1 }
 0x221   : >> { %v645_v4 = vsel %vm644_vm4, 0.0, %v641_v2  ;;  %633 = vst [vmem:[%s619_s23] sm:$0x7] %v632_v3  ;;  %v713_v7 = vld [vmem:[%s1732_s25] sm:$0x7] }
 0x222   : >> { %646 = vst [vmem:[%s634_s24] sm:$0x7] %v645_v4  ;;  %714 = vrot.lane.b32.xlu0 %v713_v7, %s1528_s28  ;;  %v709_v11 = vld [vmem:[%s1735_s11] sm:$0x7] }
 0x223   : >> { %v730_v12 = vld [vmem:[%s1735_s11] sm:$0x7] }
 0x224   : >> { %v712_v30 = vld [vmem:[%s1732_s25] sm:$0x7] }
 0x228   : >> { %v681_v8 = vld [vmem:[%s675_s29] sm:$0x7] }
 0x229   : >> { %682 = vrot.lane.b32.xlu1 %v681_v8, %s1528_s28  ;;  %v677_v9 = vld [vmem:[%s676_s30] sm:$0x7] }
 0x22a   : >> { %v698_v10 = vld [vmem:[%s676_s30] sm:$0x7] }
 0x22b   : >> { %v680_v18 = vld [vmem:[%s675_s29] sm:$0x7] }
 0x22d   : >> { %678 = vrot.lane.b32.xlu1 %v677_v9, %s1528_s28 }
 0x231   : >> { %699 = vrot.lane.b32.xlu1 %v698_v10, %s1529_s10 }
 0x235   : >> { %710 = vrot.lane.b32.xlu1 %v709_v11, %s1528_s28 }
 0x239   : >> { %731 = vrot.lane.b32.xlu1 %v730_v12, %s1529_s10 }
 0x294   : >> { %v715_v20 = vpop.permute.xlu0 %714 }
 0x295   : >> { %v719_v22 = vsel %vm686_vm5, %v713_v7, %v715_v20 }
 0x29b   : >> { %v683_v13 = vpop.permute.xlu1 %682 }
 0x29c   : >> { %v687_v14 = vsel %vm686_vm5, %v681_v8, %v683_v13 }
 0x29f   : >> { %v679_v15 = vpop.permute.xlu1 %678 }
 0x2a0   : >> { %v691_v16 = vsel %vm690_vm6, %v679_v15, %v687_v14 }
 0x2a1   : >> { %v697_v17 = vsel %vm1223_vm2, %v691_v16, 0.0 }
 0x2a2   : >> { %705 = vst [vmem:[%s675_s29] sm:$0x7] %v697_v17 }
 0x2a3   : >> { %v700_v19 = vpop.permute.xlu1 %699 }
 0x2a4   : >> { %v704_v21 = vsel %vm703_vm7, %v680_v18, %v700_v19 }
 0x2a5   : >> { %706 = vst [vmem:[%s676_s30] sm:$0x7] %v704_v21 }
 0x2a7   : >> { %v711_v23 = vpop.permute.xlu1 %710 }
 0x2a8   : >> { %v723_v24 = vsel %vm690_vm6, %v711_v23, %v719_v22 }
 0x2a9   : >> { %v741_v25 = vld [vmem:[%s739_s12] ss:$0 sm:$0xff]  ;;  %v1357_v27 = vld [vmem:[%s739_s12 + $0x2] ss:$0 sm:$0xff]  ;;  %v729_v29 = vsel %vm1223_vm2, %v723_v24, 0.0 }
 0x2aa   : >> { %v1356_v26 = vld [vmem:[%s739_s12 - $0x1] sm:$0x6]  ;;  %737 = vst [vmem:[%s1732_s25] sm:$0x7] %v729_v29 }
 0x2ab   : >> { %v748_v28 = vsel %vm747_vm14, %v741_v25, %v1356_v26  ;;  %v732_v31 = vpop.permute.xlu1 %731 }
 0x2ac   : >> { %751 = vst [vmem:[%s739_s12] sm:$0x7] %v748_v28  ;;  %v765_v32 = vld [vmem:[%s763_s13] ss:$0 sm:$0xff]  ;;  %v1361_v34 = vld [vmem:[%s763_s13 + $0x2] ss:$0 sm:$0xff]  ;;  %v736_v35 = vsel %vm703_vm7, %v712_v30, %v732_v31 }
 0x2ad   : >> { %v1360_v33 = vld [vmem:[%s763_s13 - $0x1] sm:$0x6]  ;;  %738 = vst [vmem:[%s1735_s11] sm:$0x7] %v736_v35 }
 0x2ae   : >> { %v772_v36 = vsel %vm747_vm14, %v765_v32, %v1360_v33 }
 0x2af   : >> { %775 = vst [vmem:[%s763_s13] sm:$0x7] %v772_v36 }
 0x2b1   : >> { %v752_v37 = vld [vmem:[%s740_s14] ss:$0 sm:$0xff]  ;;  %v1359_v38 = vld [vmem:[%s740_s14 + $0x1] sm:$0x3] }
 0x2b2   : >> { %1358 = vst [vmem:[%s739_s12 + $0x1] sm:$0x1] %v752_v37  ;;  %v760_v39 = vsel %vm759_vm15, %v1357_v27, %v1359_v38  ;;  %422 = sbr.rel (!%p420_p1) target bundleno = 258 (0x102), region = 319 }
 0x2b3   : >> { %762 = vst [vmem:[%s740_s14] sm:$0x7] %v760_v39 }
 0x2b4   : >> { %v776_v40 = vld [vmem:[%s764_s15] ss:$0 sm:$0xff]  ;;  %v1363_v41 = vld [vmem:[%s764_s15 + $0x1] sm:$0x3] }
 0x2b5   : >> { %1362 = vst [vmem:[%s763_s13 + $0x1] sm:$0x1] %v776_v40  ;;  %v784_v42 = vsel %vm759_vm15, %v1361_v34, %v1363_v41 }
 0x2b6   : >> { %786 = vst [vmem:[%s764_s15] sm:$0x7] %v784_v42 }
 0x2b9   : > { %v334_v43 = vld [vmem:[%s328_s0] sm:$0x7] }
 0x2ba   : > { %v335_v45 = vsel %vm1223_vm2, %v334_v43, 0.0  ;;  %v370_v47 = vld [vmem:[%s364_s2] sm:$0x7] }
 0x2bb   : > { %v336_v49 = vmul.f32 %v335_v45, %v335_v45  ;;  %v371_v51 = vsel %vm1223_vm2, %v370_v47, 0.0 }
 0x2bc   : > { %v353_v44 = vld [vmem:[%s347_s1] sm:$0x7]  ;;  %v372_v53 = vmul.f32 %v371_v51, %v371_v51 }
 0x2bd   : > { %v354_v46 = vsel %vm1223_vm2, %v353_v44, 0.0  ;;  %v387_v48 = vld [vmem:[%s381_s3] sm:$0x7]  ;;  %v340_v56 = vsel %vm339_vm8, 0.0, %v336_v49 }
 0x2be   : > { %v355_v50 = vmul.f32 %v354_v46, %v354_v46  ;;  %v388_v52 = vsel %vm1223_vm2, %v387_v48, 0.0 }
 0x2bf   : > { %v389_v55 = vmul.f32 %v388_v52, %v388_v52 }
 0x2c0   : > { %v357_v54 = vadd.f32 %v355_v50, %v336_v49  ;;  %v356_v57 = vadd.f32 %v355_v50, %v340_v56 }
 0x2c1   : > { %v393_v60 = vsel %vm392_vm9, 0.0, %v389_v55 }
 0x2c2   : > { %v374_v58 = vadd.f32 %v372_v53, %v357_v54  ;;  %v373_v59 = vadd.f32 %v372_v53, %v356_v57 }
 0x2c4   : > { %v395_v61 = vadd.f32 %v389_v55, %v374_v58  ;;  %v394_v62 = vadd.f32 %v393_v60, %v373_v59 }
 0x2c6   : > { %396 = vadd.xlane.f32.xlu0 %v395_v61 }
 0x2ca   : > { %404 = vadd.xlane.f32.xlu0 %v394_v62 }
 0x353   : > { %v397_v63 = vpop.xlane.xlu0 %396 }
 0x354   : > { %v398_v0 = vrot.slane %v397_v63, 4 }
 0x356   : > { %v399_v1 = vadd.f32 %v398_v0, %v397_v63 }
 0x357   : > { %v405_v2 = vpop.xlane.xlu0 %404 }
 0x358   : > { %v400_v3 = vrot.slane %v399_v1, 2  ;;  %v406_v4 = vrot.slane %v405_v2, 4 }
 0x35a   : > { %v407_v7 = vadd.f32 %v406_v4, %v405_v2  ;;  %v401_v8 = vadd.f32 %v400_v3, %v399_v1 }
 0x35c   : > { %v408_v9 = vrot.slane %v407_v7, 2  ;;  %v402_v11 = vrot.slane %v401_v8, 1 }
 0x35e   : > { %v409_v10 = vadd.f32 %v408_v9, %v407_v7  ;;  %v403_v14 = vadd.f32 %v402_v11, %v401_v8 }
 0x360   : > { %v410_v12 = vrot.slane %v409_v10, 1 }
 0x362   : > { %v411_v13 = vadd.f32 %v410_v12, %v409_v10 }
 0x364   : > { %1382 = vpush %v411_v13 }
 0x365   : > { %1384 = vpush %v403_v14 }
 0x395   : > { %s1383_s27 = spop %1382 }
 0x396   : > { %s1385_s17 = spop %1384 }
 0x397   : > { %s414_s18 = smul.f32 1e-10, %s1385_s17 }
 0x399   : > { %p415_p3 = scmp.le.f32.partialorder %s1383_s27, %s414_s18 }
 0x39b   : > { %p417_p4 = por %p416_p2, %p415_p3 }
 0x39d   :  { %865 = sbr.rel (!%p417_p4) target bundleno = 257 (0x101), region = 330 }
 0x3a4 PF:  { %v927_v15 = vld [vmem:[#allocation15] sm:$0xf]  ;;  %s866_s19 = smov [#allocation23]  ;;  %v870_v5 = vmov %v1596_v5  ;;  %v873_v6 = vmov %v1598_v6  ;;  %v921_v16 = vld [vmem:[#allocation12] sm:$0xf]  ;;  %s1530_s20 = smov [#allocation16]  }
 0x3a5   :  { %v890_v5 = vmov %v1596_v5  ;;  %v893_v6 = vmov %v1598_v6  ;;  %929 = vst [vmem:[#allocation16] sm:$0xf] %v927_v15  ;;  %s1080_s21 = sshll.u32 %s1530_s20, 4  ;;  %v874_v17 = vld [vmem:[%s866_s19] sm:$0x7]  ;;  %vm877_vm10 = vcmp.eq.s32.totalorder %v873_v6, %v870_v5  ;;  %s886_s26 = smov [#allocation26]  ;;  %s1081_s21 = int_to_ptr.vmem [resolvable:$true] %s1080_s21 }
 0x3a6   :  { %vm897_vm11 = vcmp.eq.s32.totalorder %v893_v6, %v890_v5  ;;  %923 = vst [vmem:[#allocation13] sm:$0xf] %v921_v16  ;;  %v933_v18 = vld [vmem:[#allocation18] sm:$0xf]  ;;  %v878_v19 = vsel %vm877_vm10, %v874_v17, 0.0  ;;  %s1417_s22 = scalar_lea.vmem %s1081_s21, 64  ;;  %p1422_p6 = scmp.lt.s32.totalorder %s1081_s21, %s1081_s21 }
 0x3a7   :  { %935 = vst [vmem:[#allocation19] sm:$0xf] %v933_v18  ;;  %v939_v20 = vld [vmem:[#allocation20] sm:$0xf]  ;;  %p1418_p5 = scmp.ne.s32.totalorder %s1081_s21, %s1417_s22  ;;  %p1423_p7 = scmp.lt.s32.totalorder %s1417_s22, %s1417_s22 }
 0x3a9   :  { %p1424_p8 = por %p1423_p7, %p1422_p6 }
 0x3ab   :  { %p1425_p9 = pnand %p1424_p8, %p1418_p5 }
 0x3ad   :  { %1428 = shalt.err (!%p1425_p9)
}
 0x3ae   :  { %s1429_s25 = scalar_lea.hbm %s1858_s7, 64 }
 0x3af   :  { %p1430_p10 = scmp.ne.s32.totalorder %s1858_s7, %s1429_s25  ;;  %p1433_p11 = scmp.lt.u32.totalorder %s1429_s25, %s1858_s7 }
 0x3b1   :  { %p1435_p12 = pnand %p1433_p11, %p1430_p10 }
 0x3b3   :  { %1438 = shalt.err (!%p1435_p12)
}
 0x3b4   :  { %1083 = dma.vmem_to_hbm [thread:$0]  %s1081_s21, 64, %s1858_s7, [#allocation17]   ;;  %v879_v21 = vrot.slane %v878_v19, 4  ;;  %v894_v22 = vld [vmem:[%s886_s26] sm:$0x7] }
 0x3b5   :  { %941 = vst [vmem:[#allocation21] sm:$0xf] %v939_v20  ;;  %v898_v23 = vsel %vm897_vm11, %v894_v22, 0.0  ;;  %s1531_s13 = smov [#allocation13]   ;;  %s1532_s15 = smov [#allocation19]  }
 0x3b6   :  { %v880_v24 = vadd.f32 %v879_v21, %v878_v19  ;;  %v899_v25 = vrot.slane %v898_v23, 4  ;;  %s1073_s14 = sshll.u32 %s1531_s13, 4  ;;  %s1087_s16 = sshll.u32 %s1532_s15, 4  ;;  %s1074_s14 = int_to_ptr.vmem [resolvable:$true] %s1073_s14  ;;  %s1088_s16 = int_to_ptr.vmem [resolvable:$true] %s1087_s16 }
 0x3b7   :  { %s1439_s0 = scalar_lea.vmem %s1074_s14, 64  ;;  %p1444_p0 = scmp.lt.s32.totalorder %s1074_s14, %s1074_s14 }
 0x3b8   :  { %v881_v26 = vrot.slane %v880_v24, 2  ;;  %v900_v27 = vadd.f32 %v899_v25, %v898_v23  ;;  %p1440_p13 = scmp.ne.s32.totalorder %s1074_s14, %s1439_s0  ;;  %p1445_p1 = scmp.lt.s32.totalorder %s1439_s0, %s1439_s0 }
 0x3ba   :  { %p1446_p2 = por %p1445_p1, %p1444_p0 }
 0x3bc   :  { %p1447_p3 = pnand %p1446_p2, %p1440_p13 }
 0x3be   :  { %1450 = shalt.err (!%p1447_p3)
}
 0x3bf   :  { %s1451_s2 = scalar_lea.hbm %s1857_s6, 64 }
 0x3c0   :  { %p1452_p4 = scmp.ne.s32.totalorder %s1857_s6, %s1451_s2  ;;  %p1455_p5 = scmp.lt.u32.totalorder %s1451_s2, %s1857_s6 }
 0x3c2   :  { %p1457_p6 = pnand %p1455_p5, %p1452_p4 }
 0x3c4   :  { %1460 = shalt.err (!%p1457_p6)
}
 0x3c5   :  { %1076 = dma.vmem_to_hbm [thread:$0]  %s1074_s14, 64, %s1857_s6, [#allocation14]   ;;  %v882_v5 = vadd.f32 %v881_v26, %v880_v24  ;;  %v901_v6 = vrot.slane %v900_v27, 2 }
 0x3c6   :  { %s1461_s21 = scalar_lea.vmem %s1088_s16, 64  ;;  %p1466_p8 = scmp.lt.s32.totalorder %s1088_s16, %s1088_s16 }
 0x3c7   :  { %p1462_p7 = scmp.ne.s32.totalorder %s1088_s16, %s1461_s21  ;;  %p1467_p9 = scmp.lt.s32.totalorder %s1461_s21, %s1461_s21 }
 0x3c9   :  { %p1468_p10 = por %p1467_p9, %p1466_p8 }
 0x3cb   :  { %p1469_p11 = pnand %p1468_p10, %p1462_p7 }
 0x3cd   :  { %1472 = shalt.err (!%p1469_p11)
}
 0x3ce   :  { %s1473_s23 = scalar_lea.hbm %s1859_s8, 64 }
 0x3cf   :  { %p1474_p12 = scmp.ne.s32.totalorder %s1859_s8, %s1473_s23  ;;  %p1477_p13 = scmp.lt.u32.totalorder %s1473_s23, %s1859_s8 }
 0x3d1   :  { %p1479_p0 = pnand %p1477_p13, %p1474_p12 }
 0x3d3   :  { %1482 = shalt.err (!%p1479_p0)
}
 0x3d4   :  { %1090 = dma.vmem_to_hbm [thread:$0]  %s1088_s16, 64, %s1859_s8, [#allocation17]   ;;  %v883_v28 = vrot.slane %v882_v5, 1  ;;  %v902_v29 = vadd.f32 %v901_v6, %v900_v27 }
 0x3d5   :  { %s1533_s10 = smov [#allocation21]   ;;  %s867_s12 = smov [#allocation8] }
 0x3d6   :  { %s1094_s11 = sshll.u32 %s1533_s10, 4  ;;  %s1095_s11 = int_to_ptr.vmem [resolvable:$true] %s1094_s11 }
 0x3d7   :  { %s1483_s13 = scalar_lea.vmem %s1095_s11, 64  ;;  %p1488_p2 = scmp.lt.s32.totalorder %s1095_s11, %s1095_s11 }
 0x3d8   :  { %p1484_p1 = scmp.ne.s32.totalorder %s1095_s11, %s1483_s13  ;;  %p1489_p3 = scmp.lt.s32.totalorder %s1483_s13, %s1483_s13 }
 0x3da   :  { %p1490_p4 = por %p1489_p3, %p1488_p2 }
 0x3dc   :  { %p1491_p5 = pnand %p1490_p4, %p1484_p1 }
 0x3de   :  { %1494 = shalt.err (!%p1491_p5)
}
 0x3df   :  { %s1495_s0 = scalar_lea.hbm %s1860_s9, 64 }
 0x3e0   :  { %p1496_p6 = scmp.ne.s32.totalorder %s1860_s9, %s1495_s0  ;;  %p1499_p7 = scmp.lt.u32.totalorder %s1495_s0, %s1860_s9 }
 0x3e2   :  { %p1501_p8 = pnand %p1499_p7, %p1496_p6 }
 0x3e4   :  { %1504 = shalt.err (!%p1501_p8)
}
 0x3e5   :  { %1097 = dma.vmem_to_hbm [thread:$0]  %s1095_s11, 64, %s1860_s9, [#allocation22]   ;;  %v884_v30 = vadd.f32 %v883_v28, %v882_v5  ;;  %v903_v31 = vrot.slane %v902_v29, 1 }
 0x3e6   :  { %s887_s27 = smov [#allocation10] }
 0x3e7   :  { %885 = vst [vmem:[%s867_s12] sm:$0x1] %v884_v30  ;;  %v904_v32 = vadd.f32 %v903_v31, %v902_v29 }
 0x3e9   :  { %905 = vst [vmem:[%s887_s27] sm:$0x1] %v904_v32 }
 0x3ee   :  { %v909_v33 = vld [vmem:[#allocation8] sm:$0x1] }
 0x3ef   :  { %911 = vst [vmem:[#allocation9] sm:$0x1] %v909_v33 }
 0x3f0   :  { %v915_v34 = vld [vmem:[#allocation10] sm:$0x1] }
 0x3f1   :  { %917 = vst [vmem:[#allocation11] sm:$0x1] %v915_v34 }
 0x3f6   :  { %v1004_v35 = vld [vmem:[#allocation9] sm:$0x1] }
 0x3f7   :  { %1005 = vst [vmem:[%s1855_s4] sm:$0x1] %v1004_v35 }
 0x3f8   :  { %v1068_v36 = vld [vmem:[#allocation11] sm:$0x1] }
 0x3f9   :  { %1069 = vst [vmem:[%s1856_s5] sm:$0x1] %v1068_v36 }
 0x3fa   :  { %1513 = dma.done.wait [#allocation14], 64  }
 0x3fb   :  { %1514 = vsyncadd [#allocation14], 4294967232 }
 0x3fc   :  { %1515 = dma.done.wait [#allocation17], 128  }
 0x3fd   :  { %1516 = vsyncadd [#allocation17], 4294967168 }
 0x3fe   :  { %1517 = dma.done.wait [#allocation22], 64  }
 0x3ff   :  { %1518 = vsyncadd [#allocation22], 4294967232 }
 0x400   :  { %1106 = vsyncpa [#allocation14], 1 }
 0x401   :  { %1107 = vsyncpa [#allocation17], 1 }
 0x402   :  { %1108 = vsyncpa [#allocation22], 1 }

// kernel: custom-call.50
= control target key start
LH: loop header
LB: loop body
LE: loop exit
PB: predicated region body
PF: predicated region fallthrough
CT: control target
= control target key end

     0   :  { %4 = vsyncpa [#allocation4], 0  ;;  %v396_v2 = vmov 0.0   ;;  %s420_s13 = smov 0   ;;  %s513_s0 = inlined_call_operand.vmem [shape: f32[16,10], index: 0, kind: input, shape index: {}]   ;;  %s514_s1 = inlined_call_operand.vmem [shape: f32[16,10], index: 1, kind: output, shape index: {0}]   ;;  %s515_s2 = inlined_call_operand.hbm [shape: f32[10], index: 2, kind: output, shape index: {1}]  }
   0x1   :  { %v34_v0 = vld [vmem:[%s513_s0] sm:$0xff]  ;;  %v36_v1 = vld [vmem:[%s513_s0 + $0x8] sm:$0xff]  ;;  %47 = vst [vmem:[#allocation2] sm:$0x1] %v396_v2 }
   0x2   :  { %42 = vst [vmem:[#allocation1] sm:$0xff] %v34_v0  ;;  %46 = vst [vmem:[#allocation1 + $0x8] sm:$0xff] %v36_v1 }
   0x3 LB: > { %v55_v3 = vlaneseq  ;;  %v429_v6 = vstv %s394_s13  ;;  %s92_s0 = scalar_lea.vmem [#allocation1], %s394_s13  ;;  %s128_s14 = smov [#allocation1]  ;;  %s394_s13 = sphi %s420_s13, %s53_s13  }
   0x4   : > { %s168_s15 = scalar_lea.vmem [#allocation5], %s394_s13  ;;  %s184_s16 = smov [#allocation1] }
   0x5   : > { %v426_v5 = vshrl.u32 %v55_v3, 7  ;;  %v455_v54 = vand.u32 127, %v55_v3  ;;  %s185_s17 = smov [#allocation5] }
   0x7   : > { %vm59_vm0 = vcmp.gt.s32.totalorder %v426_v5, %v429_v6  ;;  %v66_v8 = vadd.s32 8, %v426_v5  ;;  %v131_v5 = vmov %v426_v5  ;;  %vm459_vm12 = vcmp.eq.s32.totalorder %v455_v54, %v429_v6 }
   0x8   : > { %v150_v50 = vadd.s32 8, %v131_v5  ;;  %vm135_vm10 = vcmp.gt.s32.totalorder %v131_v5, %v429_v6  ;;  %v188_v5 = vmov %v426_v5 }
   0x9   : > { %v54_v4 = vld [vmem:[#allocation1] sm:$0xff]  ;;  %v63_v7 = vld [vmem:[#allocation1 + $0x8] sm:$0xff]  ;;  %vm68_vm1 = vcmp.gt.s32.totalorder %v66_v8, %v429_v6 }
   0xa   : > { %v60_v9 = vsel %vm59_vm0, %v54_v4, 0.0  ;;  %v71_v11 = vsel %vm68_vm1, %v63_v7, 0.0  ;;  %v93_v20 = vld [vmem:[%s92_s0] ss:$0 sm:$0xff]  ;;  %vm152_vm8 = vcmp.gt.s32.totalorder %v150_v50, %v429_v6  ;;  %vm153_vm9 = vcmp.lt.s32.totalorder %v150_v50, 16  ;;  %v337_v53 = vld [vmem:[%s128_s14 + $0x8] sm:$0xff] }
   0xb   : > { %v61_v10 = vmul.f32 %v60_v9, %v60_v9  ;;  %v72_v12 = vmul.f32 %v71_v11, %v71_v11  ;;  %v94_v21 = vand.u32 2147483647, %v93_v20  ;;  %vm119_vm7 = vcmp.lt.f32.partialorder %v93_v20, 0.0  ;;  %v132_v52 = vld [vmem:[%s128_s14] sm:$0xff]  ;;  %vm154_vm11 = vmand %vm152_vm8, %vm153_vm9  ;;  %v181_v7 = vld [vmem:[#allocation2] ss:$0 sm:$0xff] }
   0xc   : > { %v136_v56 = vsel %vm135_vm10, %v132_v52, 0.0  ;;  %v155_v57 = vsel %vm154_vm11, %v337_v53, 0.0  ;;  %vm221_vm0 = vcmp.gt.s32.totalorder %v455_v54, %v429_v6 }
   0xd   : > { %v73_v13 = vadd.f32 %v72_v12, %v61_v10  ;;  %v95_v26 = vmax.f32 %v94_v21, 0.0  ;;  %v397_v12 = vmov 1.0  }
   0xf   : > { %v74_v14 = vrot.slane %v73_v13, 4 }
  0x11   : > { %v75_v15 = vadd.f32 %v74_v14, %v73_v13  ;;  %v193_v13 = vadd.s32 8, %v188_v5  ;;  %v191_v14 = vld [vmem:[%s184_s16] sm:$0xff]  ;;  %v212_v5 = vmov %v426_v5 }
  0x12   : > { %vm229_vm14 = vcmp.ge.s32.totalorder %v212_v5, %v429_v6 }
  0x13   : > { %v76_v16 = vrot.slane %v75_v15, 2  ;;  %vm199_vm13 = vcmp.lt.s32.totalorder %v193_v13, 16  ;;  %vm230_vm1 = vmand %vm459_vm12, %vm229_vm14 }
  0x15   : > { %v77_v17 = vadd.f32 %v76_v16, %v75_v15  ;;  %v339_v15 = vld [vmem:[%s184_s16 + $0x8] sm:$0xff]  ;;  %s208_s16 = smov %s184_s16 }
  0x16   : > { %s254_s18 = scalar_lea.vmem %s208_s16, %s394_s13  ;;  %s53_s13 = sadd.s32 1, %s394_s13  }
  0x17   : > { %v78_v18 = vrot.slane %v77_v17, 1  ;;  %p50_p0 = scmp.ge.s32.totalorder %s53_s13, 10  }
  0x18   :  { %s398_s23 = smov (%p50_p0), [#allocation3]  }
  0x19   : > { %v435_v19 = vadd.f32 %v78_v18, %v77_v17  ;;  %s310_s24 = sshll.u32 (%p50_p0), %s398_s23, 4  ;;  %s311_s24 = int_to_ptr.vmem [resolvable:$true] %s310_s24 }
  0x1a   :  { %s364_s25 = scalar_lea.vmem (%p50_p0), %s311_s24, 16  ;;  %s368_s26 = scalar_lea.vmem (%p50_p0), %s311_s24, 32 }
  0x1b   : > { %354 = vrsqrt.f32 %v435_v19  ;;  %vm82_vm2 = vcmp.eq.f32.partialorder %v435_v19, inf  ;;  %v85_v23 = vand.u32 2147483648, %v435_v19  ;;  %vm84_vm3 = vcmp.eq.f32.partialorder %v435_v19, 0.0  ;;  %p365_p1 = scmp.ne.s32.totalorder (%p50_p0), %s311_s24, %s364_s25  ;;  %p369_p2 = scmp.lt.s32.totalorder (%p50_p0), %s311_s24, %s311_s24 }
  0x1c   :  { %p370_p3 = scmp.lt.s32.totalorder (%p50_p0), %s368_s26, %s364_s25 }
  0x1e   :  { %p371_p4 = por (%p50_p0), %p370_p3, %p369_p2 }
  0x20   :  { %p372_p5 = pnand (%p50_p0), %p371_p4, %p365_p1 }
  0x25   : > { %v355_v22 = vpop.eup %354 }
  0x26   : > { %v81_v24 = vmul.f32 %v355_v22, %v435_v19 }
  0x28   : > { %v83_v25 = vsel %vm82_vm2, %v435_v19, %v81_v24 }
  0x29   : > { %v86_v27 = vsel %vm84_vm3, %v85_v23, %v83_v25 }
  0x2a   : > { %v96_v28 = vand.u32 2147483647, %v86_v27  ;;  %v233_v27 = vadd.s32 8, %v212_v5 }
  0x2c   : > { %v97_v29 = vmax.f32 %v95_v26, %v96_v28  ;;  %vm250_vm15 = vcmp.ge.s32.totalorder %v233_v27, %v429_v6 }
  0x2d   : > { %vm251_vm2 = vmand %vm459_vm12, %vm250_vm15 }
  0x2e   : > { %356 = vrcp.f32 %v97_v29  ;;  %vm109_vm6 = vcmp.eq.f32.partialorder %v97_v29, 0.0 }
  0x38   : > { %v357_v30 = vpop.eup %356 }
  0x39   : > { %v99_v31 = vmul.f32 %v357_v30, %v94_v21  ;;  %v102_v32 = vmul.f32 0.0, %v357_v30  ;;  %v106_v33 = vmul.f32 %v357_v30, %v96_v28 }
  0x3b   : > { %v100_v34 = vmul.f32 %v99_v31, %v99_v31  ;;  %v103_v35 = vmul.f32 %v102_v32, %v102_v32  ;;  %v107_v36 = vmul.f32 %v106_v33, %v106_v33  ;;  %v341_v33 = vld [vmem:[%s208_s16 + $0x8] sm:$0xff] }
  0x3d   : > { %v104_v37 = vadd.f32 %v103_v35, %v100_v34 }
  0x3f   : > { %v108_v38 = vadd.f32 %v107_v36, %v104_v37 }
  0x41   : > { %358 = vrsqrt.f32 %v108_v38  ;;  %vm112_vm4 = vcmp.eq.f32.partialorder %v108_v38, inf  ;;  %v115_v40 = vand.u32 2147483648, %v108_v38  ;;  %vm114_vm5 = vcmp.eq.f32.partialorder %v108_v38, 0.0 }
  0x4b   : > { %v359_v39 = vpop.eup %358 }
  0x4c   : > { %v111_v41 = vmul.f32 %v359_v39, %v108_v38 }
  0x4e   : > { %v113_v42 = vsel %vm112_vm4, %v108_v38, %v111_v41 }
  0x4f   : > { %v116_v43 = vsel %vm114_vm5, %v115_v40, %v113_v42 }
  0x50   : > { %v117_v44 = vmul.f32 %v116_v43, %v97_v29  ;;  %v219_v29 = vld [vmem:[%s208_s16] sm:$0xff] }
  0x52   : > { %v118_v45 = vsel %vm109_vm6, 0.0, %v117_v44 }
  0x53   : > { %v120_v46 = vxor.u32 2147483648, %v118_v45 }
  0x55   : > { %v121_v47 = vsel %vm119_vm7, %v118_v45, %v120_v46 }
  0x56   : > { %v449_v48 = vsel %vm84_vm3, %v93_v20, %v121_v47  ;;  %360 = vrcp.f32 %v121_v47  ;;  %v122_v51 = vsub.f32 %v121_v47, %v93_v20 }
  0x57   : > { %v127_v49 = vsub.f32 %v93_v20, %v449_v48 }
  0x59   : > { %362 = vrcp.f32 %v127_v49 }
  0x60   : > { %v361_v55 = vpop.eup %360 }
  0x61   : > { %v124_v58 = vmul.f32 %v361_v55, %v122_v51 }
  0x63   : > { %v363_v59 = vpop.eup %362  ;;  %v126_v61 = vsel %vm84_vm3, 0.0, %v124_v58 }
  0x64   : > { %v138_v62 = vmul.f32 %v363_v59, %v136_v56  ;;  %v157_v63 = vmul.f32 %v363_v59, %v155_v57  ;;  %v174_v0 = vsel %vm459_vm12, %v126_v61, 0.0 }
  0x65   : > { %175 = vadd.xlane.f32.xlu1 %v174_v0 }
  0x66   : > { %v139_v1 = vsel %vm84_vm3, 0.0, %v138_v62  ;;  %v158_v2 = vsel %vm84_vm3, 0.0, %v157_v63 }
  0x67   : > { %v144_v3 = vsel %vm459_vm12, %v139_v1, 0.0  ;;  %v163_v4 = vsel %vm459_vm12, %v158_v2, 0.0 }
  0x68   : > { %145 = vadd.xlane.f32.xlu0 %v144_v3 }
  0x6c   : > { %164 = vadd.xlane.f32.xlu0 %v163_v4 }
  0xf2   : > { %v176_v8 = vpop.xlane.xlu1 %175 }
  0xf3   : > { %v182_v9 = vsel %vm459_vm12, %v176_v8, %v181_v7 }
  0xf4   : > { %183 = vst [vmem:[#allocation2] sm:$0x1] %v182_v9 }
  0xf5   : > { %v146_v10 = vpop.xlane.xlu0 %145 }
  0xf6   : > { %147 = vst [vmem:[#allocation5] sm:$0xff] %v146_v10 }
  0xf9   : > { %v165_v11 = vpop.xlane.xlu0 %164 }
  0xfa   : > { %167 = vst [vmem:[#allocation5 + $0x8] sm:$0xff] %v165_v11 }
  0xfb   : > { %169 = vst [vmem:[%s168_s15] sm:$0x1] %v397_v12  ;;  %v265_v42 = vld [vmem:[#allocation2] sm:$0x1] (%p50_p0) }
  0xfc   :  { %267 = vst [vmem:[#allocation3] sm:$0x1] (%p50_p0), %v265_v42 }
 0x102   : > { %v190_v16 = vld [vmem:[%s185_s17] sm:$0xff]  ;;  %v338_v17 = vld [vmem:[%s185_s17 + $0x8] sm:$0xff]  ;;  %s209_s17 = smov %s185_s17 }
 0x103   : > { %v192_v18 = vmul.f32 %v191_v14, %v190_v16  ;;  %v198_v19 = vmul.f32 %v339_v15, %v338_v17  ;;  %v217_v31 = vld [vmem:[%s209_s17] sm:$0xff]  ;;  %v340_v32 = vld [vmem:[%s209_s17 + $0x8] sm:$0xff] }
 0x105   : > { %v200_v20 = vsel %vm199_vm13, %v198_v19, 0.0 }
 0x106   : > { %v201_v21 = vadd.f32 %v200_v20, %v192_v18 }
 0x108   : > { %v202_v22 = vrot.slane %v201_v21, 4 }
 0x10a   : > { %v203_v23 = vadd.f32 %v202_v22, %v201_v21 }
 0x10c   : > { %v204_v24 = vrot.slane %v203_v23, 2 }
 0x10e   : > { %v205_v25 = vadd.f32 %v204_v24, %v203_v23 }
 0x110   : > { %v206_v26 = vrot.slane %v205_v25, 1 }
 0x112   : > { %v207_v28 = vadd.f32 %v206_v26, %v205_v25 }
 0x114   : > { %v213_v30 = vmul.f32 %v207_v28, %v176_v8 }
 0x116   : > { %v218_v34 = vmul.f32 %v217_v31, %v213_v30  ;;  %v238_v35 = vmul.f32 %v340_v32, %v213_v30 }
 0x118   : > { %v222_v36 = vsub.f32 %v219_v29, %v218_v34  ;;  %v243_v5 = vsub.f32 %v341_v33, %v238_v35 }
 0x11a   : > { %v223_v37 = vsel %vm221_vm0, %v222_v36, %v219_v29  ;;  %v244_v38 = vsel %vm221_vm0, %v243_v5, %v341_v33 }
 0x11b   : > { %v231_v39 = vsel %vm230_vm1, %v217_v31, %v223_v37  ;;  %v252_v40 = vsel %vm251_vm2, %v340_v32, %v244_v38 }
 0x11c   : > { %232 = vst [vmem:[%s208_s16] sm:$0xff] %v231_v39  ;;  %342 = vst [vmem:[%s208_s16 + $0x8] sm:$0xff] %v252_v40 }
 0x11f   :  { %52 = sbr.rel (!%p50_p0) target bundleno = 3 (0x3), region = 114 }
 0x123   : > { %v255_v41 = vld [vmem:[%s254_s18] ss:$0 sm:$0xff] }
 0x124   : > { %v260_v6 = vsel %vm459_vm12, %v449_v48, %v255_v41 }
 0x125   : > { %261 = vst [vmem:[%s254_s18] sm:$0x1] %v260_v6 }
 0x12c   :  { %v297_v43 = vld [vmem:[#allocation1] sm:$0xff]  ;;  %v299_v44 = vld [vmem:[#allocation1 + $0x8] sm:$0xff] }
 0x12d   :  { %298 = vst [vmem:[%s514_s1] sm:$0xff] %v297_v43  ;;  %300 = vst [vmem:[%s514_s1 + $0x8] sm:$0xff] %v299_v44 }
 0x12e   :  { %375 = shalt.err (!%p372_p5)
}
 0x12f   :  { %s376_s29 = scalar_lea.hbm %s515_s2, 16 }
 0x130   :  { %p377_p6 = scmp.ne.s32.totalorder %s515_s2, %s376_s29  ;;  %p380_p7 = scmp.lt.u32.totalorder %s376_s29, %s515_s2 }
 0x132   :  { %p382_p8 = pnand %p380_p7, %p377_p6 }
 0x134   :  { %385 = shalt.err (!%p382_p8)
}
 0x135   :  { %313 = dma.vmem_to_hbm [thread:$0]  %s311_s24, 16, %s515_s2, [#allocation4]  }
 0x136   :  { %390 = dma.done.wait [#allocation4], 16  }
 0x137   :  { %391 = vsyncadd [#allocation4], 4294967280 }
 0x138   :  { %317 = vsyncpa [#allocation4], 1 }

// kernel: custom-call.122
= control target key start
LH: loop header
LB: loop body
LE: loop exit
PB: predicated region body
PF: predicated region fallthrough
CT: control target
= control target key end

     0   :  { %v469_v3 = vmov 0.0   ;;  %s495_s15 = smov 0   ;;  %s607_s0 = inlined_call_operand.vmem [shape: f32[20,10], index: 0, kind: input, shape index: {}]   ;;  %s608_s1 = inlined_call_operand.vmem [shape: f32[20,10], index: 1, kind: output, shape index: {0}]   ;;  %s609_s2 = inlined_call_operand.vmem [shape: f32[10], index: 2, kind: output, shape index: {1}]  }
   0x1   :  { %v35_v0 = vld [vmem:[%s607_s0] sm:$0xff]  ;;  %v37_v1 = vld [vmem:[%s607_s0 + $0x8] sm:$0xff]  ;;  %v39_v2 = vld [vmem:[%s607_s0 + $0x10] sm:$0xff]  ;;  %54 = vst [vmem:[#allocation2] sm:$0x1] %v469_v3 }
   0x2   :  { %45 = vst [vmem:[#allocation1] sm:$0xff] %v35_v0  ;;  %49 = vst [vmem:[#allocation1 + $0x8] sm:$0xff] %v37_v1 }
   0x3   :  { %53 = vst [vmem:[#allocation1 + $0x10] sm:$0xff] %v39_v2 }
   0x4 LB: > { %v62_v4 = vlaneseq  ;;  %v504_v7 = vstv %s467_s15  ;;  %s109_s0 = scalar_lea.vmem [#allocation1], %s467_s15  ;;  %s145_s16 = smov [#allocation1]  ;;  %s467_s15 = sphi %s495_s15, %s60_s15  }
   0x5   : > { %s203_s17 = scalar_lea.vmem [#allocation4], %s467_s15  ;;  %s219_s18 = smov [#allocation1] }
   0x6   : > { %v501_v6 = vshrl.u32 %v62_v4, 7  ;;  %v533_v63 = vand.u32 127, %v62_v4  ;;  %s220_s19 = smov [#allocation4] }
   0x8   : > { %vm66_vm0 = vcmp.gt.s32.totalorder %v501_v6, %v504_v7  ;;  %v73_v9 = vadd.s32 8, %v501_v6  ;;  %v83_v10 = vadd.s32 16, %v501_v6  ;;  %v148_v6 = vmov %v501_v6 }
   0x9   : > { %v61_v5 = vld [vmem:[#allocation1] sm:$0xff]  ;;  %v70_v8 = vld [vmem:[#allocation1 + $0x8] sm:$0xff]  ;;  %v185_v56 = vadd.s32 16, %v148_v6  ;;  %v167_v57 = vadd.s32 8, %v148_v6  ;;  %vm152_vm13 = vcmp.gt.s32.totalorder %v148_v6, %v504_v7  ;;  %v223_v6 = vmov %v501_v6 }
   0xa   : > { %v67_v11 = vsel %vm66_vm0, %v61_v5, 0.0  ;;  %v80_v12 = vld [vmem:[#allocation1 + $0x10] sm:$0xff]  ;;  %vm75_vm1 = vcmp.gt.s32.totalorder %v73_v9, %v504_v7  ;;  %vm85_vm2 = vcmp.gt.s32.totalorder %v83_v10, %v504_v7  ;;  %vm86_vm3 = vcmp.lt.s32.totalorder %v83_v10, 20  ;;  %v110_v26 = vld [vmem:[%s109_s0] ss:$0 sm:$0xff]  ;;  %v429_v60 = vld [vmem:[%s145_s16 + $0x8] sm:$0xff] }
   0xb   : > { %v68_v13 = vmul.f32 %v67_v11, %v67_v11  ;;  %v76_v14 = vsel %vm75_vm1, %v70_v8, 0.0  ;;  %vm87_vm4 = vmand %vm85_vm2, %vm86_vm3  ;;  %v111_v27 = vand.u32 2147483647, %v110_v26  ;;  %vm136_vm10 = vcmp.lt.f32.partialorder %v110_v26, 0.0  ;;  %v149_v58 = vld [vmem:[%s145_s16] sm:$0xff]  ;;  %v430_v59 = vld [vmem:[%s145_s16 + $0x10] sm:$0xff] }
   0xc   : > { %v77_v15 = vmul.f32 %v76_v14, %v76_v14  ;;  %v88_v16 = vsel %vm87_vm4, %v80_v12, 0.0  ;;  %vm187_vm11 = vcmp.gt.s32.totalorder %v185_v56, %v504_v7  ;;  %vm188_vm12 = vcmp.lt.s32.totalorder %v185_v56, 20 }
   0xd   : > { %v89_v17 = vmul.f32 %v88_v16, %v88_v16  ;;  %v112_v32 = vmax.f32 %v111_v27, 0.0  ;;  %vm189_vm14 = vmand %vm187_vm11, %vm188_vm12  ;;  %vm169_vm15 = vcmp.gt.s32.totalorder %v167_v57, %v504_v7  ;;  %v153_v0 = vsel %vm152_vm13, %v149_v58, 0.0 }
   0xe   : > { %v78_v18 = vadd.f32 %v77_v15, %v68_v13  ;;  %v190_v1 = vsel %vm189_vm14, %v430_v59, 0.0  ;;  %v170_v2 = vsel %vm169_vm15, %v429_v60, 0.0  ;;  %vm537_vm0 = vcmp.eq.s32.totalorder %v533_v63, %v504_v7 }
  0x10   : > { %v90_v19 = vadd.f32 %v89_v17, %v78_v18 }
  0x12   : > { %v91_v20 = vrot.slane %v90_v19, 4 }
  0x14   : > { %v92_v21 = vadd.f32 %v91_v20, %v90_v19 }
  0x16   : > { %v93_v22 = vrot.slane %v92_v21, 2 }
  0x18   : > { %v94_v23 = vadd.f32 %v93_v22, %v92_v21  ;;  %v216_v21 = vld [vmem:[#allocation2] ss:$0 sm:$0xff] }
  0x1a   : > { %v95_v24 = vrot.slane %v94_v23, 1 }
  0x1c   : > { %v512_v25 = vadd.f32 %v95_v24, %v94_v23 }
  0x1e   : > { %451 = vrsqrt.f32 %v512_v25  ;;  %vm99_vm5 = vcmp.eq.f32.partialorder %v512_v25, inf  ;;  %v102_v29 = vand.u32 2147483648, %v512_v25  ;;  %vm101_vm6 = vcmp.eq.f32.partialorder %v512_v25, 0.0 }
  0x28   : > { %v452_v28 = vpop.eup %451 }
  0x29   : > { %v98_v30 = vmul.f32 %v452_v28, %v512_v25  ;;  %v432_v28 = vld [vmem:[%s219_s18 + $0x8] sm:$0xff] }
  0x2b   : > { %v100_v31 = vsel %vm99_vm5, %v512_v25, %v98_v30  ;;  %v470_v25 = vmov 1.0  }
  0x2c   : > { %v103_v33 = vsel %vm101_vm6, %v102_v29, %v100_v31  ;;  %v434_v29 = vld [vmem:[%s219_s18 + $0x10] sm:$0xff] }
  0x2d   : > { %v113_v34 = vand.u32 2147483647, %v103_v33 }
  0x2f   : > { %v114_v35 = vmax.f32 %v112_v32, %v113_v34 }
  0x31   : > { %453 = vrcp.f32 %v114_v35  ;;  %vm126_vm9 = vcmp.eq.f32.partialorder %v114_v35, 0.0 }
  0x3b   : > { %v454_v36 = vpop.eup %453 }
  0x3c   : > { %v116_v37 = vmul.f32 %v454_v36, %v111_v27  ;;  %v119_v38 = vmul.f32 0.0, %v454_v36  ;;  %v123_v39 = vmul.f32 %v454_v36, %v113_v34  ;;  %v226_v27 = vld [vmem:[%s219_s18] sm:$0xff]  ;;  %s562_s18 = smov %s219_s18 }
  0x3d   : > { %s317_s20 = scalar_lea.vmem %s562_s18, %s467_s15  ;;  %s60_s15 = sadd.s32 1, %s467_s15  }
  0x3e   : > { %v117_v40 = vmul.f32 %v116_v37, %v116_v37  ;;  %v120_v41 = vmul.f32 %v119_v38, %v119_v38  ;;  %v124_v42 = vmul.f32 %v123_v39, %v123_v39  ;;  %p57_p0 = scmp.ge.s32.totalorder %s60_s15, 10  }
  0x40   : > { %v121_v43 = vadd.f32 %v120_v41, %v117_v40 }
  0x42   : > { %v125_v44 = vadd.f32 %v124_v42, %v121_v43 }
  0x44   : > { %455 = vrsqrt.f32 %v125_v44  ;;  %vm129_vm7 = vcmp.eq.f32.partialorder %v125_v44, inf  ;;  %v132_v46 = vand.u32 2147483648, %v125_v44  ;;  %vm131_vm8 = vcmp.eq.f32.partialorder %v125_v44, 0.0 }
  0x4e   : > { %v456_v45 = vpop.eup %455 }
  0x4f   : > { %v128_v47 = vmul.f32 %v456_v45, %v125_v44 }
  0x51   : > { %v130_v48 = vsel %vm129_vm7, %v125_v44, %v128_v47  ;;  %v261_v47 = vld [vmem:[%s562_s18] sm:$0xff] }
  0x52   : > { %v133_v49 = vsel %vm131_vm8, %v132_v46, %v130_v48  ;;  %v436_v48 = vld [vmem:[%s562_s18 + $0x8] sm:$0xff] }
  0x53   : > { %v134_v50 = vmul.f32 %v133_v49, %v114_v35  ;;  %v439_v49 = vld [vmem:[%s562_s18 + $0x10] sm:$0xff] }
  0x55   : > { %v135_v51 = vsel %vm126_vm9, 0.0, %v134_v50 }
  0x56   : > { %v137_v52 = vxor.u32 2147483648, %v135_v51 }
  0x58   : > { %v138_v53 = vsel %vm136_vm10, %v135_v51, %v137_v52 }
  0x59   : > { %v526_v54 = vsel %vm101_vm6, %v110_v26, %v138_v53  ;;  %457 = vrcp.f32 %v138_v53  ;;  %v139_v61 = vsub.f32 %v138_v53, %v110_v26 }
  0x5a   : > { %v144_v55 = vsub.f32 %v110_v26, %v526_v54  ;;  %v235_v26 = vadd.s32 16, %v223_v6  ;;  %v254_v6 = vmov %v501_v6 }
  0x5b   : > { %v275_v44 = vadd.s32 8, %v254_v6  ;;  %v296_v45 = vadd.s32 16, %v254_v6  ;;  %vm271_vm2 = vcmp.ge.s32.totalorder %v254_v6, %v504_v7 }
  0x5c   : > { %459 = vrcp.f32 %v144_v55  ;;  %vm241_vm1 = vcmp.lt.s32.totalorder %v235_v26, 20  ;;  %vm572_vm5 = vmand %vm537_vm0, %vm271_vm2 }
  0x5d   : > { %vm292_vm3 = vcmp.ge.s32.totalorder %v275_v44, %v504_v7  ;;  %vm313_vm4 = vcmp.ge.s32.totalorder %v296_v45, %v504_v7 }
  0x5e   : > { %vm293_vm7 = vmand %vm537_vm0, %vm292_vm3 }
  0x5f   : > { %vm314_vm8 = vmand %vm537_vm0, %vm313_vm4 }
  0x63   : > { %v458_v62 = vpop.eup %457 }
  0x64   : > { %v141_v3 = vmul.f32 %v458_v62, %v139_v61 }
  0x66   : > { %v460_v5 = vpop.eup %459  ;;  %v143_v14 = vsel %vm101_vm6, 0.0, %v141_v3 }
  0x67   : > { %v155_v8 = vmul.f32 %v460_v5, %v153_v0  ;;  %v192_v10 = vmul.f32 %v460_v5, %v190_v1  ;;  %v172_v11 = vmul.f32 %v460_v5, %v170_v2  ;;  %v209_v18 = vsel %vm537_vm0, %v143_v14, 0.0 }
  0x69   : > { %v156_v12 = vsel %vm101_vm6, 0.0, %v155_v8  ;;  %v193_v4 = vsel %vm101_vm6, 0.0, %v192_v10  ;;  %v173_v13 = vsel %vm101_vm6, 0.0, %v172_v11  ;;  %vm263_vm6 = vcmp.gt.s32.totalorder %v533_v63, %v504_v7 }
  0x6a   : > { %v161_v15 = vsel %vm537_vm0, %v156_v12, 0.0  ;;  %v198_v16 = vsel %vm537_vm0, %v193_v4, 0.0  ;;  %v178_v17 = vsel %vm537_vm0, %v173_v13, 0.0 }
  0x6b   : > { %162 = vadd.xlane.f32.xlu0 %v161_v15  ;;  %199 = vadd.xlane.f32.xlu1 %v198_v16 }
  0x6f   : > { %179 = vadd.xlane.f32.xlu0 %v178_v17  ;;  %210 = vadd.xlane.f32.xlu1 %v209_v18 }
  0xf8   : > { %v163_v19 = vpop.xlane.xlu0 %162  ;;  %v200_v20 = vpop.xlane.xlu1 %199 }
  0xf9   : > { %164 = vst [vmem:[#allocation4] sm:$0xff] %v163_v19  ;;  %202 = vst [vmem:[#allocation4 + $0x10] sm:$0xff] %v200_v20 }
  0xfc   : > { %v180_v22 = vpop.xlane.xlu0 %179  ;;  %v211_v23 = vpop.xlane.xlu1 %210 }
  0xfd   : > { %182 = vst [vmem:[#allocation4 + $0x8] sm:$0xff] %v180_v22  ;;  %v217_v24 = vsel %vm537_vm0, %v211_v23, %v216_v21 }
  0xfe   : > { %204 = vst [vmem:[%s203_s17] sm:$0x1] %v470_v25  ;;  %218 = vst [vmem:[#allocation2] sm:$0x1] %v217_v24 }
 0x105   : > { %v225_v30 = vld [vmem:[%s220_s19] sm:$0xff]  ;;  %v431_v31 = vld [vmem:[%s220_s19 + $0x8] sm:$0xff]  ;;  %v433_v32 = vld [vmem:[%s220_s19 + $0x10] sm:$0xff]  ;;  %s251_s19 = smov %s220_s19 }
 0x106   : > { %v227_v33 = vmul.f32 %v226_v27, %v225_v30  ;;  %v233_v34 = vmul.f32 %v432_v28, %v431_v31  ;;  %v240_v35 = vmul.f32 %v434_v29, %v433_v32  ;;  %v259_v51 = vld [vmem:[%s251_s19] sm:$0xff]  ;;  %v435_v52 = vld [vmem:[%s251_s19 + $0x8] sm:$0xff]  ;;  %v438_v53 = vld [vmem:[%s251_s19 + $0x10] sm:$0xff] }
 0x107   :  { %v328_v5 = vld [vmem:[#allocation2] sm:$0x1] (%p57_p0) }
 0x108   : > { %v234_v36 = vadd.f32 %v233_v34, %v227_v33  ;;  %v242_v37 = vsel %vm241_vm1, %v240_v35, 0.0  ;;  %330 = vst [vmem:[#allocation3] sm:$0x1] (%p57_p0), %v328_v5 }
 0x10a   : > { %v243_v38 = vadd.f32 %v242_v37, %v234_v36 }
 0x10c   : > { %v244_v39 = vrot.slane %v243_v38, 4 }
 0x10e   : > { %v245_v40 = vadd.f32 %v244_v39, %v243_v38 }
 0x10f   :  { %v388_v9 = vld [vmem:[#allocation3] sm:$0x1] (%p57_p0) }
 0x110   : > { %v246_v41 = vrot.slane %v245_v40, 2  ;;  %389 = vst [vmem:[%s609_s2] sm:$0x1] (%p57_p0), %v388_v9 }
 0x112   : > { %v247_v42 = vadd.f32 %v246_v41, %v245_v40 }
 0x114   : > { %v248_v43 = vrot.slane %v247_v42, 1 }
 0x116   : > { %v249_v46 = vadd.f32 %v248_v43, %v247_v42 }
 0x118   : > { %v255_v50 = vmul.f32 %v249_v46, %v211_v23 }
 0x11a   : > { %v260_v56 = vmul.f32 %v259_v51, %v255_v50  ;;  %v280_v6 = vmul.f32 %v435_v52, %v255_v50  ;;  %v301_v57 = vmul.f32 %v438_v53, %v255_v50 }
 0x11c   : > { %v264_v58 = vsub.f32 %v261_v47, %v260_v56  ;;  %v285_v59 = vsub.f32 %v436_v48, %v280_v6  ;;  %v306_v60 = vsub.f32 %v439_v49, %v301_v57 }
 0x11e   : > { %v265_v61 = vsel %vm263_vm6, %v264_v58, %v261_v47  ;;  %v286_v62 = vsel %vm263_vm6, %v285_v59, %v436_v48  ;;  %v307_v0 = vsel %vm263_vm6, %v306_v60, %v439_v49 }
 0x11f   : > { %v273_v1 = vsel %vm572_vm5, %v259_v51, %v265_v61  ;;  %v294_v2 = vsel %vm293_vm7, %v435_v52, %v286_v62  ;;  %v315_v3 = vsel %vm314_vm8, %v438_v53, %v307_v0 }
 0x120   : > { %274 = vst [vmem:[%s562_s18] sm:$0xff] %v273_v1  ;;  %437 = vst [vmem:[%s562_s18 + $0x8] sm:$0xff] %v294_v2 }
 0x121   : > { %440 = vst [vmem:[%s562_s18 + $0x10] sm:$0xff] %v315_v3 }
 0x124   :  { %59 = sbr.rel (!%p57_p0) target bundleno = 4 (0x4), region = 157 }
 0x128   : > { %v318_v7 = vld [vmem:[%s317_s20] ss:$0 sm:$0xff] }
 0x129   : > { %v323_v63 = vsel %vm537_vm0, %v526_v54, %v318_v7 }
 0x12a   : > { %324 = vst [vmem:[%s317_s20] sm:$0x1] %v323_v63 }
 0x131   :  { %v362_v8 = vld [vmem:[#allocation1] sm:$0xff]  ;;  %v364_v10 = vld [vmem:[#allocation1 + $0x8] sm:$0xff]  ;;  %v366_v54 = vld [vmem:[#allocation1 + $0x10] sm:$0xff] }
 0x132   :  { %363 = vst [vmem:[%s608_s1] sm:$0xff] %v362_v8  ;;  %365 = vst [vmem:[%s608_s1 + $0x8] sm:$0xff] %v364_v10 }
 0x133   :  { %367 = vst [vmem:[%s608_s1 + $0x10] sm:$0xff] %v366_v54 }

// kernel: custom-call.123
= control target key start
LH: loop header
LB: loop body
LE: loop exit
PB: predicated region body
PF: predicated region fallthrough
CT: control target
= control target key end

     0   :  { %s539_s0 = inlined_call_operand.vmem [shape: f32[10,10], index: 0, kind: input, shape index: {}]   ;;  %s540_s1 = inlined_call_operand.vmem [shape: f32[10,10], index: 1, kind: output, shape index: {}]  }
   0x1   :  { %s15_s8 = scalar_lea.vmem %s539_s0, 8 }
   0x2   :  { %p275_p0 = scmp.gt.s32.totalorder %s539_s0, %s15_s8 }
   0x3   :  { %s477_s11 = smov (!%p275_p0), [#allocation0]   ;;  %s481_s14 = smov (!%p275_p0), %s539_s0  }
   0x4   :  { %276 = sbr.rel (%p275_p0) target bundleno = 21 (0x15), region = 84 }
   0xb LB: > { %v49_v0 = vld [vmem:[%s483_s14] sm:$0xff]  ;;  %s51_s14 = scalar_lea.vmem %s483_s14, 8   ;;  %s483_s14 = sphi %s481_s14, %s51_s14   ;;  %s479_s11 = sphi %s477_s11, %s52_s11  }
   0xc   : > { %50 = vst [vmem:[%s479_s11] sm:$0xff] %v49_v0  ;;  %s52_s11 = scalar_lea.vmem %s479_s11, 8   ;;  %p46_p1 = scmp.gt.s32.totalorder %s51_s14, %s15_s8 }
   0xe   :  { %48 = sbr.rel (!%p46_p1) target bundleno = 11 (0xb), region = 90 }
  0x15 PF:  { %v64_v1 = vlaneseq  ;;  %v84_v2 = vld [vmem:[#allocation0 + $0x1] ss:$0 sm:$0xff]  ;;  %vm85_vm0 = vcmask 80896   ;;  %v95_v10 = vld [vmem:[#allocation0 + $0x2] ss:$0 sm:$0xff]  ;;  %v493_v41 = vmov 0.0   ;;  %s485_s16 = smov %s540_s1  }
  0x16   :  { %v70_v5 = vld [vmem:[#allocation0] sm:$0xff]  ;;  %v86_v6 = vsel %vm85_vm0, %v84_v2, 0.0  ;;  %v97_v11 = vsel %vm85_vm0, %v95_v10, 0.0  ;;  %v161_v37 = vld [vmem:[#allocation0 + $0x8] ss:$0 sm:$0xff]  ;;  %s489_s17 = smov [#allocation1]  }
  0x17   :  { %v513_v3 = vand.u32 127, %v64_v1  ;;  %v67_v4 = vshrl.u32 %v64_v1, 7  ;;  %v106_v15 = vld [vmem:[#allocation0 + $0x3] ss:$0 sm:$0xff]  ;;  %v117_v20 = vld [vmem:[#allocation0 + $0x4] ss:$0 sm:$0xff] }
  0x18   :  { %v108_v16 = vsel %vm85_vm0, %v106_v15, 0.0  ;;  %v119_v21 = vsel %vm85_vm0, %v117_v20, 0.0  ;;  %v128_v25 = vld [vmem:[#allocation0 + $0x5] ss:$0 sm:$0xff]  ;;  %v139_v30 = vld [vmem:[#allocation0 + $0x6] ss:$0 sm:$0xff] }
  0x19   :  { %vm69_vm1 = vcmp.eq.s32.totalorder %v513_v3, %v67_v4  ;;  %vm73_vm2 = vcmp.eq.s32.totalorder %v513_v3, 0  ;;  %vm89_vm3 = vcmp.eq.s32.totalorder %v513_v3, 1  ;;  %vm100_vm4 = vcmp.eq.s32.totalorder %v513_v3, 2  ;;  %v150_v36 = vld [vmem:[#allocation0 + $0x7] ss:$0 sm:$0xff] }
  0x1a   :  { %v74_v7 = vsel %vm73_vm2, %v70_v5, 1.0  ;;  %vm111_vm5 = vcmp.eq.s32.totalorder %v513_v3, 3  ;;  %vm122_vm6 = vcmp.eq.s32.totalorder %v513_v3, 4  ;;  %v130_v26 = vsel %vm85_vm0, %v128_v25, 0.0  ;;  %v176_v47 = vld [vmem:[#allocation0 + $0x9] ss:$0 sm:$0xff] }
  0x1b   :  { %v75_v8 = vsel %vm69_vm1, %v74_v7, 0.0  ;;  %vm133_vm7 = vcmp.eq.s32.totalorder %v513_v3, 5  ;;  %v141_v31 = vsel %vm85_vm0, %v139_v30, 0.0  ;;  %v80_v35 = vadd.s32 8, %v67_v4 }
  0x1c   :  { %v90_v9 = vmul.f32 %v86_v6, %v75_v8  ;;  %vm144_vm8 = vcmp.eq.s32.totalorder %v513_v3, 6  ;;  %v152_v38 = vsel %vm85_vm0, %v150_v36, 0.0  ;;  %v163_v43 = vsel %vm85_vm0, %v161_v37, 0.0 }
  0x1d   :  { %vm81_vm9 = vcmp.eq.s32.totalorder %v513_v3, %v80_v35  ;;  %vm155_vm10 = vcmp.eq.s32.totalorder %v513_v3, 7  ;;  %vm166_vm11 = vcmp.eq.s32.totalorder %v513_v3, 8  ;;  %v178_v50 = vsel %vm85_vm0, %v176_v47, 0.0 }
  0x1e   :  { %91 = vadd.xlane.f32.xlu0 %v90_v9  ;;  %v82_v42 = vsel %vm81_vm9, 1.0, %v493_v41  ;;  %vm181_vm12 = vcmp.eq.s32.totalorder %v513_v3, 9 }
  0x1f   :  { %v171_v45 = vmul.f32 %v163_v43, %v82_v42 }
  0xab   :  { %v92_v12 = vpop.xlane.xlu0 %91 }
  0xac   :  { %v93_v13 = vsel %vm89_vm3, %v92_v12, %v75_v8 }
  0xad   :  { %v101_v14 = vmul.f32 %v97_v11, %v93_v13 }
  0xaf   :  { %102 = vadd.xlane.f32.xlu0 %v101_v14 }
 0x13c   :  { %v103_v17 = vpop.xlane.xlu0 %102 }
 0x13d   :  { %v104_v18 = vsel %vm100_vm4, %v103_v17, %v93_v13 }
 0x13e   :  { %v112_v19 = vmul.f32 %v108_v16, %v104_v18 }
 0x140   :  { %113 = vadd.xlane.f32.xlu1 %v112_v19 }
 0x1cd   :  { %v114_v22 = vpop.xlane.xlu1 %113 }
 0x1ce   :  { %v115_v23 = vsel %vm111_vm5, %v114_v22, %v104_v18 }
 0x1cf   :  { %v123_v24 = vmul.f32 %v119_v21, %v115_v23 }
 0x1d1   :  { %124 = vadd.xlane.f32.xlu1 %v123_v24 }
 0x25e   :  { %v125_v27 = vpop.xlane.xlu1 %124 }
 0x25f   :  { %v126_v28 = vsel %vm122_vm6, %v125_v27, %v115_v23 }
 0x260   :  { %v134_v29 = vmul.f32 %v130_v26, %v126_v28 }
 0x262   :  { %135 = vadd.xlane.f32.xlu0 %v134_v29 }
 0x2ef   :  { %v136_v32 = vpop.xlane.xlu0 %135 }
 0x2f0   :  { %v137_v33 = vsel %vm133_vm7, %v136_v32, %v126_v28 }
 0x2f1   :  { %v145_v34 = vmul.f32 %v141_v31, %v137_v33 }
 0x2f3   :  { %146 = vadd.xlane.f32.xlu1 %v145_v34 }
 0x380   :  { %v147_v39 = vpop.xlane.xlu1 %146 }
 0x381   :  { %v148_v40 = vsel %vm144_vm8, %v147_v39, %v137_v33 }
 0x382   :  { %v156_v44 = vmul.f32 %v152_v38, %v148_v40 }
 0x384   :  { %157 = vadd.xlane.f32.xlu0 %v156_v44 }
 0x388   :  { %172 = vadd.xlane.f32.xlu0 %v171_v45 }
 0x411   :  { %v158_v46 = vpop.xlane.xlu0 %157 }
 0x412   :  { %v159_v48 = vsel %vm155_vm10, %v158_v46, %v148_v40 }
 0x413   :  { %v167_v49 = vmul.f32 %v163_v43, %v159_v48 }
 0x415   :  { %168 = vadd.xlane.f32.xlu1 %v167_v49  ;;  %v173_v51 = vpop.xlane.xlu0 %172 }
 0x416   :  { %v174_v52 = vsel %vm166_vm11, %v173_v51, %v82_v42 }
 0x417   :  { %v186_v53 = vmul.f32 %v178_v50, %v174_v52 }
 0x419   :  { %187 = vadd.xlane.f32.xlu0 %v186_v53 }
 0x4a2   :  { %v169_v54 = vpop.xlane.xlu1 %168 }
 0x4a3   :  { %v170_v55 = vsel %vm166_vm11, %v169_v54, %v159_v48 }
 0x4a4   :  { %v182_v56 = vmul.f32 %v178_v50, %v170_v55 }
 0x4a6   :  { %183 = vadd.xlane.f32.xlu1 %v182_v56  ;;  %v188_v57 = vpop.xlane.xlu0 %187 }
 0x4a7   :  { %v189_v58 = vsel %vm181_vm12, %v188_v57, %v174_v52 }
 0x4a8   :  { %192 = vst [vmem:[#allocation1 + $0x8] sm:$0xff] %v189_v58 }
 0x533   :  { %v184_v59 = vpop.xlane.xlu1 %183 }
 0x534   :  { %v185_v60 = vsel %vm181_vm12, %v184_v59, %v170_v55  }
 0x535   :  { %190 = vst [vmem:[#allocation1] sm:$0xff] %v185_v60 }
 0x536 LB:  { %s491_s17 = sphi %s489_s17, %s242_s17   ;;  %s487_s16 = sphi %s485_s16, %s243_s16  }
 0x53c   : > { %v240_v61 = vld [vmem:[%s491_s17] sm:$0xff]  ;;  %s242_s17 = scalar_lea.vmem %s491_s17, 8  }
 0x53d   : > { %241 = vst [vmem:[%s487_s16] sm:$0xff] %v240_v61  ;;  %s243_s16 = scalar_lea.vmem %s487_s16, 8   ;;  %p237_p2 = scmp.gt.s32.totalorder %s242_s17, [#allocation1 + $0x8] }
 0x53f   :  { %239 = sbr.rel (!%p237_p2) target bundleno = 1334 (0x536), region = 112 }

// kernel: custom-call.118
= control target key start
LH: loop header
LB: loop body
LE: loop exit
PB: predicated region body
PF: predicated region fallthrough
CT: control target
= control target key end

     0   :  { %v430_v0 = vmov 0.0   ;;  %vm41_vm0 = vcmask 7168   ;;  %vm72_vm1 = vcmask 15368   ;;  %vm89_vm2 = vcmask 1047553   ;;  %s481_s0 = inlined_call_operand.vmem [shape: f32[10,10], index: 0, kind: input, shape index: {}]   ;;  %s482_s1 = inlined_call_operand.vmem [shape: f32[10,10], index: 1, kind: output, shape index: {}]  }
   0x1   :  { %38 = vst [vmem:[#allocation1] sm:$0xff] %v430_v0  ;;  %v444_v4 = vld [vmem:[%s481_s0] sm:$0xff]  ;;  %v450_v5 = vld [vmem:[%s481_s0 + $0x8] sm:$0xff]  ;;  %vm90_vm3 = vmand %vm72_vm1, %vm89_vm2  ;;  %vm107_vm4 = vcmask 23568   ;;  %vm124_vm5 = vcmask 1047554   ;;  %vm142_vm7 = vcmask 31768  }
   0x2   :  { %32 = vst [vmem:[#allocation0] sm:$0xff] %v444_v4  ;;  %34 = vst [vmem:[#allocation0 + $0x8] sm:$0xff] %v450_v5  ;;  %vm159_vm8 = vcmask 1047555   ;;  %vm177_vm10 = vcmask 39968   ;;  %vm194_vm11 = vcmask 1047556   ;;  %vm212_vm13 = vcmask 48168  }
   0x3   :  { %vm125_vm6 = vmand %vm107_vm4, %vm124_vm5  ;;  %vm229_vm14 = vcmask 1047557   ;;  %vm299_vm5 = vcmask 1047559  }
   0x4   :  { %vm160_vm9 = vmand %vm142_vm7, %vm159_vm8  ;;  %vm340_vm8 = vcmask 80968  }
   0x5   :  { %vm195_vm12 = vmand %vm177_vm10, %vm194_vm11 }
   0x6   :  { %vm230_vm15 = vmand %vm212_vm13, %vm229_vm14 }
   0x8   :  { %v42_v1 = vld [vmem:[#allocation1] ss:$0 sm:$0xff] }
   0x9   :  { %v44_v2 = vmul.f32 %v42_v1, %v42_v1  ;;  %v63_v3 = vmul.f32 0.0, %v42_v1  ;;  %v43_v6 = vld [vmem:[#allocation0] ss:$0 sm:$0xff]  ;;  %v76_v22 = vld [vmem:[#allocation0 + $0x1] ss:$0 sm:$0xff] }
   0xa   :  { %v111_v40 = vld [vmem:[#allocation0 + $0x2] ss:$0 sm:$0xff]  ;;  %v146_v58 = vld [vmem:[#allocation0 + $0x3] ss:$0 sm:$0xff] }
   0xb   :  { %45 = vadd.xlane.f32.xlu0 %v44_v2  ;;  %64 = vadd.xlane.f32.xlu1 %v63_v3 }
   0xf   :  { %52 = vadd.xlane.f32.xlu0 %v63_v3 }
  0x98   :  { %v46_v7 = vpop.xlane.xlu0 %45  ;;  %v65_v13 = vpop.xlane.xlu1 %64 }
  0x99   :  { %v47_v8 = vsub.f32 %v43_v6, %v46_v7  ;;  %v66_v15 = vsub.f32 %v450_v5, %v65_v13 }
  0x9b   :  { %410 = vrsqrt.f32 %v47_v8 }
  0x9c   :  { %v53_v9 = vpop.xlane.xlu0 %52 }
  0x9d   :  { %v54_v10 = vsub.f32 %v444_v4, %v53_v9 }
  0xa5   :  { %v411_v11 = vpop.eup %410 }
  0xa6   :  { %v55_v12 = vmul.f32 %v411_v11, %v54_v10  ;;  %v67_v16 = vmul.f32 %v411_v11, %v66_v15 }
  0xa8   :  { %v56_v14 = vsel %vm41_vm0, %v55_v12, 0.0  ;;  %v68_v17 = vsel %vm41_vm0, %v67_v16, 0.0  ;;  %vm247_vm0 = vcmask 56368  }
  0xa9   :  { %58 = vst [vmem:[#allocation1] sm:$0xff] %v56_v14 }
  0xb0   :  { %v74_v18 = vld [vmem:[#allocation1 + $0x1] ss:$0 sm:$0xff] }
  0xb1   :  { %v84_v19 = vmul.f32 %v74_v18, %v56_v14  ;;  %v77_v20 = vmul.f32 %v74_v18, %v74_v18  ;;  %v98_v21 = vmul.f32 %v74_v18, %v68_v17 }
  0xb3   :  { %85 = vadd.xlane.f32.xlu0 %v84_v19  ;;  %78 = vadd.xlane.f32.xlu1 %v77_v20 }
  0xb7   :  { %99 = vadd.xlane.f32.xlu1 %v98_v21 }
 0x140   :  { %v79_v23 = vpop.xlane.xlu1 %78  ;;  %v86_v25 = vpop.xlane.xlu0 %85 }
 0x141   :  { %v80_v24 = vsub.f32 %v76_v22, %v79_v23  ;;  %v87_v26 = vsub.f32 %v444_v4, %v86_v25 }
 0x143   :  { %412 = vrsqrt.f32 %v80_v24 }
 0x144   :  { %v100_v31 = vpop.xlane.xlu1 %99 }
 0x145   :  { %v101_v32 = vsub.f32 %v450_v5, %v100_v31 }
 0x14d   :  { %v413_v27 = vpop.eup %412 }
 0x14e   :  { %v88_v28 = vmul.f32 %v413_v27, %v87_v26  ;;  %v102_v33 = vmul.f32 %v413_v27, %v101_v32  ;;  %v216_v32 = vld [vmem:[#allocation0 + $0x5] ss:$0 sm:$0xff] }
 0x150   :  { %v91_v29 = vsel %vm90_vm3, %v88_v28, 0.0  ;;  %v103_v34 = vsel %vm72_vm1, %v102_v33, 0.0  ;;  %vm264_vm1 = vcmask 1047558  }
 0x151   :  { %v92_v30 = vadd.f32 %v91_v29, %v56_v14  ;;  %v104_v38 = vadd.f32 %v103_v34, %v68_v17  ;;  %v181_v14 = vld [vmem:[#allocation0 + $0x4] ss:$0 sm:$0xff]  ;;  %vm265_vm3 = vmand %vm247_vm0, %vm264_vm1 }
 0x153   :  { %93 = vst [vmem:[#allocation1] sm:$0xff] %v92_v30 }
 0x15a   :  { %v109_v35 = vld [vmem:[#allocation1 + $0x2] ss:$0 sm:$0xff] }
 0x15b   :  { %v119_v36 = vmul.f32 %v109_v35, %v92_v30  ;;  %v112_v37 = vmul.f32 %v109_v35, %v109_v35  ;;  %v133_v39 = vmul.f32 %v109_v35, %v104_v38 }
 0x15d   :  { %120 = vadd.xlane.f32.xlu1 %v119_v36  ;;  %113 = vadd.xlane.f32.xlu0 %v112_v37 }
 0x161   :  { %134 = vadd.xlane.f32.xlu0 %v133_v39 }
 0x1ea   :  { %v114_v41 = vpop.xlane.xlu0 %113  ;;  %v121_v43 = vpop.xlane.xlu1 %120 }
 0x1eb   :  { %v115_v42 = vsub.f32 %v111_v40, %v114_v41  ;;  %v122_v44 = vsub.f32 %v444_v4, %v121_v43 }
 0x1ed   :  { %414 = vrsqrt.f32 %v115_v42 }
 0x1ee   :  { %v135_v49 = vpop.xlane.xlu0 %134 }
 0x1ef   :  { %v136_v50 = vsub.f32 %v450_v5, %v135_v49 }
 0x1f7   :  { %v415_v45 = vpop.eup %414 }
 0x1f8   :  { %v123_v46 = vmul.f32 %v415_v45, %v122_v44  ;;  %v137_v51 = vmul.f32 %v415_v45, %v136_v50  ;;  %v251_v50 = vld [vmem:[#allocation0 + $0x6] ss:$0 sm:$0xff] }
 0x1fa   :  { %v126_v47 = vsel %vm125_vm6, %v123_v46, 0.0  ;;  %v138_v52 = vsel %vm107_vm4, %v137_v51, 0.0  ;;  %vm282_vm4 = vcmask 64568  }
 0x1fb   :  { %v127_v48 = vadd.f32 %v126_v47, %v92_v30  ;;  %v139_v56 = vadd.f32 %v138_v52, %v104_v38  ;;  %vm300_vm6 = vmand %vm282_vm4, %vm299_vm5 }
 0x1fd   :  { %128 = vst [vmem:[#allocation1] sm:$0xff] %v127_v48 }
 0x204   :  { %v144_v53 = vld [vmem:[#allocation1 + $0x3] ss:$0 sm:$0xff] }
 0x205   :  { %v154_v54 = vmul.f32 %v144_v53, %v127_v48  ;;  %v147_v55 = vmul.f32 %v144_v53, %v144_v53  ;;  %v168_v57 = vmul.f32 %v144_v53, %v139_v56 }
 0x207   :  { %155 = vadd.xlane.f32.xlu0 %v154_v54  ;;  %148 = vadd.xlane.f32.xlu1 %v147_v55 }
 0x20b   :  { %169 = vadd.xlane.f32.xlu1 %v168_v57 }
 0x294   :  { %v149_v59 = vpop.xlane.xlu1 %148  ;;  %v156_v61 = vpop.xlane.xlu0 %155 }
 0x295   :  { %v150_v60 = vsub.f32 %v146_v58, %v149_v59  ;;  %v157_v62 = vsub.f32 %v444_v4, %v156_v61 }
 0x297   :  { %416 = vrsqrt.f32 %v150_v60 }
 0x298   :  { %v170_v3 = vpop.xlane.xlu1 %169 }
 0x299   :  { %v171_v6 = vsub.f32 %v450_v5, %v170_v3  ;;  %v286_v3 = vld [vmem:[#allocation0 + $0x7] ss:$0 sm:$0xff] }
 0x2a1   :  { %v417_v63 = vpop.eup %416 }
 0x2a2   :  { %v158_v0 = vmul.f32 %v417_v63, %v157_v62  ;;  %v172_v7 = vmul.f32 %v417_v63, %v171_v6 }
 0x2a4   :  { %v161_v1 = vsel %vm160_vm9, %v158_v0, 0.0  ;;  %v173_v8 = vsel %vm142_vm7, %v172_v7, 0.0  ;;  %vm317_vm7 = vcmask 72768   ;;  %vm360_vm9 = vmand %vm340_vm8, %vm89_vm2 }
 0x2a5   :  { %v162_v2 = vadd.f32 %v161_v1, %v127_v48  ;;  %v174_v12 = vadd.f32 %v173_v8, %v139_v56 }
 0x2a7   :  { %163 = vst [vmem:[#allocation1] sm:$0xff] %v162_v2 }
 0x2ae   :  { %v179_v9 = vld [vmem:[#allocation1 + $0x4] ss:$0 sm:$0xff] }
 0x2af   :  { %v189_v10 = vmul.f32 %v179_v9, %v162_v2  ;;  %v182_v11 = vmul.f32 %v179_v9, %v179_v9  ;;  %v203_v13 = vmul.f32 %v179_v9, %v174_v12 }
 0x2b1   :  { %190 = vadd.xlane.f32.xlu1 %v189_v10  ;;  %183 = vadd.xlane.f32.xlu0 %v182_v11 }
 0x2b5   :  { %204 = vadd.xlane.f32.xlu0 %v203_v13 }
 0x33e   :  { %v184_v15 = vpop.xlane.xlu0 %183  ;;  %v191_v17 = vpop.xlane.xlu1 %190 }
 0x33f   :  { %v185_v16 = vsub.f32 %v181_v14, %v184_v15  ;;  %v192_v18 = vsub.f32 %v444_v4, %v191_v17 }
 0x341   :  { %418 = vrsqrt.f32 %v185_v16 }
 0x342   :  { %v205_v23 = vpop.xlane.xlu0 %204 }
 0x343   :  { %v206_v24 = vsub.f32 %v450_v5, %v205_v23 }
 0x34b   :  { %v419_v19 = vpop.eup %418 }
 0x34c   :  { %v193_v20 = vmul.f32 %v419_v19, %v192_v18  ;;  %v207_v25 = vmul.f32 %v419_v19, %v206_v24  ;;  %v321_v18 = vld [vmem:[#allocation0 + $0x8] ss:$0 sm:$0xff] }
 0x34e   :  { %v196_v21 = vsel %vm195_vm12, %v193_v20, 0.0  ;;  %v208_v26 = vsel %vm177_vm10, %v207_v25, 0.0 }
 0x34f   :  { %v197_v22 = vadd.f32 %v196_v21, %v162_v2  ;;  %v209_v30 = vadd.f32 %v208_v26, %v174_v12 }
 0x351   :  { %198 = vst [vmem:[#allocation1] sm:$0xff] %v197_v22 }
 0x358   :  { %v214_v27 = vld [vmem:[#allocation1 + $0x5] ss:$0 sm:$0xff] }
 0x359   :  { %v224_v28 = vmul.f32 %v214_v27, %v197_v22  ;;  %v217_v29 = vmul.f32 %v214_v27, %v214_v27  ;;  %v238_v31 = vmul.f32 %v214_v27, %v209_v30 }
 0x35b   :  { %225 = vadd.xlane.f32.xlu0 %v224_v28  ;;  %218 = vadd.xlane.f32.xlu1 %v217_v29 }
 0x35f   :  { %239 = vadd.xlane.f32.xlu1 %v238_v31 }
 0x3e8   :  { %v219_v33 = vpop.xlane.xlu1 %218  ;;  %v226_v35 = vpop.xlane.xlu0 %225 }
 0x3e9   :  { %v220_v34 = vsub.f32 %v216_v32, %v219_v33  ;;  %v227_v36 = vsub.f32 %v444_v4, %v226_v35 }
 0x3eb   :  { %420 = vrsqrt.f32 %v220_v34  ;;  %v344_v34 = vld [vmem:[#allocation0 + $0x9] ss:$0 sm:$0xff] }
 0x3ec   :  { %v240_v41 = vpop.xlane.xlu1 %239 }
 0x3ed   :  { %v241_v42 = vsub.f32 %v450_v5, %v240_v41 }
 0x3f5   :  { %v421_v37 = vpop.eup %420 }
 0x3f6   :  { %v228_v38 = vmul.f32 %v421_v37, %v227_v36  ;;  %v242_v43 = vmul.f32 %v421_v37, %v241_v42 }
 0x3f8   :  { %v231_v39 = vsel %vm230_vm15, %v228_v38, 0.0  ;;  %v243_v44 = vsel %vm212_vm13, %v242_v43, 0.0 }
 0x3f9   :  { %v232_v40 = vadd.f32 %v231_v39, %v197_v22  ;;  %v244_v48 = vadd.f32 %v243_v44, %v209_v30 }
 0x3fb   :  { %233 = vst [vmem:[#allocation1] sm:$0xff] %v232_v40 }
 0x402   :  { %v249_v45 = vld [vmem:[#allocation1 + $0x6] ss:$0 sm:$0xff] }
 0x403   :  { %v259_v46 = vmul.f32 %v249_v45, %v232_v40  ;;  %v252_v47 = vmul.f32 %v249_v45, %v249_v45  ;;  %v273_v49 = vmul.f32 %v249_v45, %v244_v48 }
 0x405   :  { %260 = vadd.xlane.f32.xlu1 %v259_v46  ;;  %253 = vadd.xlane.f32.xlu0 %v252_v47 }
 0x409   :  { %274 = vadd.xlane.f32.xlu0 %v273_v49 }
 0x492   :  { %v254_v51 = vpop.xlane.xlu0 %253  ;;  %v261_v53 = vpop.xlane.xlu1 %260 }
 0x493   :  { %v255_v52 = vsub.f32 %v251_v50, %v254_v51  ;;  %v262_v54 = vsub.f32 %v444_v4, %v261_v53 }
 0x495   :  { %422 = vrsqrt.f32 %v255_v52 }
 0x496   :  { %v275_v56 = vpop.xlane.xlu0 %274 }
 0x497   :  { %v276_v59 = vsub.f32 %v450_v5, %v275_v56 }
 0x49f   :  { %v423_v55 = vpop.eup %422 }
 0x4a0   :  { %v263_v57 = vmul.f32 %v423_v55, %v262_v54  ;;  %v277_v61 = vmul.f32 %v423_v55, %v276_v59 }
 0x4a2   :  { %v266_v58 = vsel %vm265_vm3, %v263_v57, 0.0  ;;  %v278_v62 = vsel %vm247_vm0, %v277_v61, 0.0 }
 0x4a3   :  { %v267_v60 = vadd.f32 %v266_v58, %v232_v40  ;;  %v279_v63 = vadd.f32 %v278_v62, %v244_v48 }
 0x4a5   :  { %268 = vst [vmem:[#allocation1] sm:$0xff] %v267_v60 }
 0x4ac   :  { %v284_v0 = vld [vmem:[#allocation1 + $0x7] ss:$0 sm:$0xff] }
 0x4ad   :  { %v308_v1 = vmul.f32 %v284_v0, %v279_v63  ;;  %v287_v2 = vmul.f32 %v284_v0, %v284_v0  ;;  %v294_v17 = vmul.f32 %v284_v0, %v267_v60 }
 0x4af   :  { %309 = vadd.xlane.f32.xlu0 %v308_v1  ;;  %288 = vadd.xlane.f32.xlu1 %v287_v2 }
 0x53c   :  { %v289_v6 = vpop.xlane.xlu1 %288  ;;  %v310_v8 = vpop.xlane.xlu0 %309 }
 0x53d   :  { %v290_v7 = vsub.f32 %v286_v3, %v289_v6  ;;  %v311_v9 = vsub.f32 %v450_v5, %v310_v8 }
 0x53f   :  { %424 = vrsqrt.f32 %v290_v7 }
 0x549   :  { %v425_v10 = vpop.eup %424 }
 0x54a   :  { %v312_v11 = vmul.f32 %v425_v10, %v311_v9 }
 0x54c   :  { %v313_v12 = vsel %vm282_vm4, %v312_v11, 0.0 }
 0x54d   :  { %v314_v13 = vadd.f32 %v313_v12, %v279_v63 }
 0x54f   :  { %316 = vst [vmem:[#allocation1 + $0x8] sm:$0xff] %v314_v13 }
 0x556   :  { %v319_v14 = vld [vmem:[#allocation1 + $0x8] ss:$0 sm:$0xff] }
 0x557   :  { %v331_v15 = vmul.f32 %v319_v14, %v314_v13  ;;  %v322_v16 = vmul.f32 %v319_v14, %v319_v14 }
 0x559   :  { %332 = vadd.xlane.f32.xlu0 %v331_v15  ;;  %323 = vadd.xlane.f32.xlu1 %v322_v16 }
 0x55d   :  { %295 = vadd.xlane.f32.xlu0 %v294_v17 }
 0x5e6   :  { %v333_v19 = vpop.xlane.xlu0 %332  ;;  %v324_v20 = vpop.xlane.xlu1 %323 }
 0x5e7   :  { %v325_v21 = vsub.f32 %v321_v18, %v324_v20  ;;  %v334_v27 = vsub.f32 %v450_v5, %v333_v19 }
 0x5e9   :  { %426 = vrsqrt.f32 %v325_v21 }
 0x5ea   :  { %v296_v22 = vpop.xlane.xlu0 %295 }
 0x5eb   :  { %v297_v23 = vsub.f32 %v444_v4, %v296_v22 }
 0x5ed   :  { %v298_v24 = vmul.f32 %v425_v10, %v297_v23 }
 0x5ef   :  { %v301_v25 = vsel %vm300_vm6, %v298_v24, 0.0 }
 0x5f0   :  { %v302_v26 = vadd.f32 %v301_v25, %v267_v60 }
 0x5f2   :  { %303 = vst [vmem:[#allocation1] sm:$0xff] %v302_v26  ;;  %395 = vst [vmem:[%s482_s1] sm:$0xff] %v302_v26 }
 0x5f3   :  { %v427_v28 = vpop.eup %426 }
 0x5f4   :  { %v335_v29 = vmul.f32 %v427_v28, %v334_v27 }
 0x5f6   :  { %v336_v30 = vsel %vm317_vm7, %v335_v29, 0.0 }
 0x5f7   :  { %v337_v31 = vadd.f32 %v336_v30, %v314_v13 }
 0x5f9   :  { %339 = vst [vmem:[#allocation1 + $0x8] sm:$0xff] %v337_v31 }
 0x600   :  { %v342_v32 = vld [vmem:[#allocation1 + $0x9] ss:$0 sm:$0xff] }
 0x601   :  { %v345_v4 = vmul.f32 %v342_v32, %v342_v32  ;;  %v354_v33 = vmul.f32 %v342_v32, %v337_v31 }
 0x603   :  { %346 = vadd.xlane.f32.xlu1 %v345_v4 }
 0x607   :  { %355 = vadd.xlane.f32.xlu1 %v354_v33 }
 0x690   :  { %v347_v35 = vpop.xlane.xlu1 %346 }
 0x691   :  { %v348_v36 = vsub.f32 %v344_v34, %v347_v35 }
 0x693   :  { %428 = vrsqrt.f32 %v348_v36 }
 0x694   :  { %v356_v37 = vpop.xlane.xlu1 %355 }
 0x695   :  { %v357_v38 = vsub.f32 %v450_v5, %v356_v37 }
 0x69d   :  { %v429_v39 = vpop.eup %428 }
 0x69e   :  { %v358_v40 = vmul.f32 %v429_v39, %v357_v38 }
 0x6a0   :  { %v361_v41 = vsel %vm360_vm9, %v358_v40, 0.0 }
 0x6a1   :  { %v362_v42 = vadd.f32 %v361_v41, %v337_v31 }
 0x6a3   :  { %364 = vst [vmem:[#allocation1 + $0x8] sm:$0xff] %v362_v42  ;;  %397 = vst [vmem:[%s482_s1 + $0x8] sm:$0xff] %v362_v42 }

// kernel: custom-call.119
= control target key start
LH: loop header
LB: loop body
LE: loop exit
PB: predicated region body
PF: predicated region fallthrough
CT: control target
= control target key end

     0   :  { %v38_v0 = vlaneseq  ;;  %v248_v9 = vmov -1.0   ;;  %v249_v53 = vmov 0.0   ;;  %s303_s0 = inlined_call_operand.vmem [shape: f32[1,10,10], index: 0, kind: input, shape index: {}]   ;;  %s304_s1 = inlined_call_operand.vmem [shape: f32[1,10,10], index: 1, kind: output, shape index: {}]  }
   0x1   :  { %v31_v1 = vld [vmem:[%s303_s0] sm:$0xff]  ;;  %v33_v36 = vld [vmem:[%s303_s0 + $0x8] sm:$0xff] }
   0x2   :  { %v263_v2 = vand.u32 127, %v38_v0  ;;  %v42_v3 = vshrl.u32 %v38_v0, 7 }
   0x4   :  { %vm44_vm0 = vcmp.eq.s32.totalorder %v42_v3, %v263_v2  ;;  %vm40_vm1 = vcmp.lt.s32.totalorder %v263_v2, 10  ;;  %vm49_vm2 = vcmp.ge.s32.totalorder %v42_v3, %v263_v2  ;;  %vm79_vm4 = vcmp.eq.s32.totalorder %v263_v2, 0 }
   0x5   :  { %v46_v4 = vsel %vm44_vm0, %v31_v1, 0.0  ;;  %vm50_vm3 = vmand %vm49_vm2, %vm40_vm1  ;;  %vm76_vm5 = vcmp.eq.s32.totalorder %v263_v2, %v42_v3  ;;  %v80_v10 = vsel %vm79_vm4, 1.0, %v248_v9  ;;  %vm94_vm6 = vcmp.eq.s32.totalorder %v263_v2, 1 }
   0x6   :  { %47 = vadd.xlane.f32.xlu0 %v46_v4  ;;  %v51_v6 = vsel %vm50_vm3, %v31_v1, 0.0  ;;  %v81_v11 = vsel %vm76_vm5, %v80_v10, 0.0  ;;  %vm104_vm7 = vcmp.eq.s32.totalorder %v263_v2, 2  ;;  %vm114_vm8 = vcmp.eq.s32.totalorder %v263_v2, 3 }
   0x7   :  { %vm124_vm9 = vcmp.eq.s32.totalorder %v263_v2, 4  ;;  %v59_v31 = vadd.s32 8, %v42_v3  ;;  %vm134_vm11 = vcmp.eq.s32.totalorder %v263_v2, 5  ;;  %vm144_vm14 = vcmp.eq.s32.totalorder %v263_v2, 6 }
   0x8   :  { %vm154_vm0 = vcmp.eq.s32.totalorder %v263_v2, 7  ;;  %vm178_vm2 = vcmp.eq.s32.totalorder %v263_v2, 9 }
   0x9   :  { %vm60_vm10 = vcmp.eq.s32.totalorder %v59_v31, %v263_v2  ;;  %vm65_vm12 = vcmp.ge.s32.totalorder %v59_v31, %v263_v2  ;;  %vm87_vm15 = vcmp.eq.s32.totalorder %v263_v2, %v59_v31 }
   0xa   :  { %v62_v37 = vsel %vm60_vm10, %v33_v36, 0.0  ;;  %vm66_vm13 = vmand %vm65_vm12, %vm40_vm1  ;;  %v88_v54 = vsel %vm87_vm15, -1.0, %v249_v53  ;;  %vm164_vm1 = vcmp.eq.s32.totalorder %v263_v2, 8 }
   0xb   :  { %v67_v44 = vsel %vm66_vm13, %v33_v36, 0.0 }
  0x93   :  { %v266_v5 = vpop.xlane.xlu0 %47 }
  0x94   :  { %244 = vrcp.f32 %v266_v5  ;;  %vm189_vm4 = vweird.f32 %v266_v5 }
  0x9e   :  { %v273_v7 = vpop.eup %244 }
  0x9f   :  { %v53_v8 = vmul.f32 %v273_v7, %v51_v6 }
  0xa1   :  { %54 = vst [vmem:[#allocation2] sm:$0xff] %v53_v8 }
  0xa8   :  { %v90_v12 = vld [vmem:[#allocation2 + $0x1] ss:$0 sm:$0xff]  ;;  %v100_v15 = vld [vmem:[#allocation2 + $0x2] ss:$0 sm:$0xff]  ;;  %v110_v20 = vld [vmem:[#allocation2 + $0x3] ss:$0 sm:$0xff] }
  0xa9   :  { %v91_v13 = vxor.u32 2147483648, %v90_v12  ;;  %v101_v17 = vxor.u32 2147483648, %v100_v15  ;;  %v111_v22 = vxor.u32 2147483648, %v110_v20  ;;  %v120_v25 = vld [vmem:[#allocation2 + $0x4] ss:$0 sm:$0xff] }
  0xaa   :  { %v121_v27 = vxor.u32 2147483648, %v120_v25  ;;  %v130_v30 = vld [vmem:[#allocation2 + $0x5] ss:$0 sm:$0xff]  ;;  %v140_v38 = vld [vmem:[#allocation2 + $0x6] ss:$0 sm:$0xff] }
  0xab   :  { %v95_v14 = vmul.f32 %v91_v13, %v81_v11  ;;  %v131_v33 = vxor.u32 2147483648, %v130_v30  ;;  %v141_v40 = vxor.u32 2147483648, %v140_v38  ;;  %v150_v47 = vld [vmem:[#allocation2 + $0x7] ss:$0 sm:$0xff] }
  0xac   :  { %v151_v50 = vxor.u32 2147483648, %v150_v47 }
  0xad   :  { %96 = vadd.xlane.f32.xlu0 %v95_v14 }
 0x13a   :  { %v97_v16 = vpop.xlane.xlu0 %96 }
 0x13b   :  { %v98_v18 = vsel %vm94_vm6, %v97_v16, %v81_v11 }
 0x13c   :  { %v105_v19 = vmul.f32 %v101_v17, %v98_v18 }
 0x13e   :  { %106 = vadd.xlane.f32.xlu1 %v105_v19 }
 0x1cb   :  { %v107_v21 = vpop.xlane.xlu1 %106 }
 0x1cc   :  { %v108_v23 = vsel %vm104_vm7, %v107_v21, %v98_v18 }
 0x1cd   :  { %v115_v24 = vmul.f32 %v111_v22, %v108_v23 }
 0x1cf   :  { %116 = vadd.xlane.f32.xlu1 %v115_v24 }
 0x25c   :  { %v117_v26 = vpop.xlane.xlu1 %116 }
 0x25d   :  { %v118_v28 = vsel %vm114_vm8, %v117_v26, %v108_v23 }
 0x25e   :  { %v125_v29 = vmul.f32 %v121_v27, %v118_v28 }
 0x260   :  { %126 = vadd.xlane.f32.xlu0 %v125_v29 }
 0x2ed   :  { %v127_v32 = vpop.xlane.xlu0 %126 }
 0x2ee   :  { %v128_v34 = vsel %vm124_vm9, %v127_v32, %v118_v28 }
 0x2ef   :  { %v135_v35 = vmul.f32 %v131_v33, %v128_v34 }
 0x2f1   :  { %136 = vadd.xlane.f32.xlu1 %v135_v35 }
 0x2f5   :  { %63 = vadd.xlane.f32.xlu1 %v62_v37 }
 0x37e   :  { %v137_v39 = vpop.xlane.xlu1 %136 }
 0x37f   :  { %v138_v41 = vsel %vm134_vm11, %v137_v39, %v128_v34 }
 0x380   :  { %v145_v42 = vmul.f32 %v141_v40, %v138_v41 }
 0x382   :  { %146 = vadd.xlane.f32.xlu0 %v145_v42  ;;  %v64_v43 = vpop.xlane.xlu1 %63 }
 0x383   :  { %246 = vrcp.f32 %v64_v43  ;;  %vm194_vm3 = vweird.f32 %v64_v43 }
 0x38d   :  { %v247_v45 = vpop.eup %246 }
 0x38e   :  { %v69_v46 = vmul.f32 %v247_v45, %v67_v44 }
 0x390   :  { %70 = vst [vmem:[#allocation2 + $0x8] sm:$0xff] %v69_v46 }
 0x397   :  { %v160_v48 = vld [vmem:[#allocation2 + $0x8] ss:$0 sm:$0xff]  ;;  %v174_v59 = vld [vmem:[#allocation2 + $0x9] ss:$0 sm:$0xff] }
 0x398   :  { %v161_v51 = vxor.u32 2147483648, %v160_v48  ;;  %v175_v62 = vxor.u32 2147483648, %v174_v59 }
 0x39a   :  { %v169_v56 = vmul.f32 %v161_v51, %v88_v54 }
 0x40f   :  { %v147_v49 = vpop.xlane.xlu0 %146 }
 0x410   :  { %v148_v52 = vsel %vm144_vm14, %v147_v49, %v138_v41 }
 0x411   :  { %v155_v55 = vmul.f32 %v151_v50, %v148_v52 }
 0x413   :  { %156 = vadd.xlane.f32.xlu0 %v155_v55 }
 0x417   :  { %170 = vadd.xlane.f32.xlu0 %v169_v56 }
 0x4a0   :  { %v157_v57 = vpop.xlane.xlu0 %156 }
 0x4a1   :  { %v158_v58 = vsel %vm154_vm0, %v157_v57, %v148_v52 }
 0x4a2   :  { %v165_v60 = vmul.f32 %v161_v51, %v158_v58 }
 0x4a4   :  { %v171_v61 = vpop.xlane.xlu0 %170  ;;  %166 = vadd.xlane.f32.xlu1 %v165_v60 }
 0x4a5   :  { %v172_v63 = vsel %vm164_vm1, %v171_v61, %v88_v54 }
 0x4a6   :  { %v183_v0 = vmul.f32 %v175_v62, %v172_v63 }
 0x4a8   :  { %184 = vadd.xlane.f32.xlu0 %v183_v0 }
 0x531   :  { %v167_v1 = vpop.xlane.xlu1 %166 }
 0x532   :  { %v168_v3 = vsel %vm164_vm1, %v167_v1, %v158_v58 }
 0x533   :  { %v179_v4 = vmul.f32 %v175_v62, %v168_v3 }
 0x535   :  { %v185_v6 = vpop.xlane.xlu0 %184  ;;  %180 = vadd.xlane.f32.xlu1 %v179_v4 }
 0x536   :  { %v186_v8 = vsel %vm178_vm2, %v185_v6, %v172_v63 }
 0x537   :  { %v193_v9 = vmul.f32 %v247_v45, %v186_v8 }
 0x539   :  { %v195_v10 = vsel %vm194_vm3, %v186_v8, %v193_v9 }
 0x53a   :  { %230 = vst [vmem:[%s304_s1 + $0x8] sm:$0xff] %v195_v10 }
 0x5c2   :  { %v181_v11 = vpop.xlane.xlu1 %180 }
 0x5c3   :  { %v182_v12 = vsel %vm178_vm2, %v181_v11, %v168_v3 }
 0x5c4   :  { %v188_v13 = vmul.f32 %v273_v7, %v182_v12 }
 0x5c6   :  { %v190_v14 = vsel %vm189_vm4, %v182_v12, %v188_v13 }
 0x5c7   :  { %228 = vst [vmem:[%s304_s1] sm:$0xff] %v190_v14 }

// kernel: reverse
= control target key start
LH: loop header
LB: loop body
LE: loop exit
PB: predicated region body
PF: predicated region fallthrough
CT: control target
= control target key end

     0   :  { %v2_v0 = vlaneseq  ;;  %s123_s0 = inlined_call_operand.vmem [shape: f32[10], index: 0, kind: input, shape index: {}]   ;;  %s124_s1 = inlined_call_operand.vmem [shape: f32[10], index: 1, kind: output, shape index: {}]  }
   0x2   :  { %v3_v1 = vsub.s32 9, %v2_v0 }
   0x4   :  { %4 = vset.pattern.permute.xlu0 %v3_v1 }
   0x5   :  { %v43_v2 = vld [vmem:[#allocation1] sm:$0x1]  ;;  %v21_v3 = vld [vmem:[%s123_s0] sm:$0x1]  ;;  %v58_v10 = vshrl.u32 %v2_v0, 7 }
   0x6   :  { %44 = vst [vmem:[#allocation0] sm:$0x1] %v43_v2  ;;  %22 = vst [vmem:[#allocation1 + $0x1] sm:$0x1] %v21_v3 }
   0x7   :  { %vm59_vm0 = vcmp.lt.s32.totalorder %v58_v10, 1 }
   0xd   :  { %v46_v4 = vld [vmem:[#allocation0 + $0x7] ss:$-1 sm:$0xff]  ;;  %v40_v5 = vld [vmem:[#allocation1 + $0x1] sm:$0x1] }
   0xe   :  { %v47_v6 = vrot.slane %v46_v4, 7  ;;  %42 = vst [vmem:[#allocation0 + $0x8] sm:$0x1] %v40_v5 }
  0x10   :  { %48 = vperm.xlu0 %4, %v47_v6  }
  0x15   :  { %v53_v7 = vld [vmem:[#allocation0 + $0xf] ss:$-1 sm:$0xff] }
  0x16   :  { %v54_v8 = vrot.slane %v53_v7, 7 }
  0x18   :  { %55 = vperm.xlu0 %4, %v54_v8  }
  0x8f   :  { %v49_v9 = vpop.permute.xlu0 %48 }
  0x90   :  { %50 = vst [vmem:[#allocation2] sm:$0xff] %v49_v9 }
  0x97   :  { %v56_v11 = vpop.permute.xlu0 %55 }
  0x98   :  { %60 = vst.msk [vmem:[#allocation2] sm:$0xff] %vm59_vm0, %v56_v11 }
  0x9f   :  { %v64_v12 = vld [vmem:[#allocation2] sm:$0x1] }
  0xa0   :  { %66 = vst [vmem:[#allocation3] sm:$0x1] %v64_v12 }
  0xa7   :  { %v82_v13 = vld [vmem:[#allocation3] sm:$0x1] }
  0xa8   :  { %83 = vst [vmem:[%s124_s1] sm:$0x1] %v82_v13 }

// kernel: custom-call.52
= control target key start
LH: loop header
LB: loop body
LE: loop exit
PB: predicated region body
PF: predicated region fallthrough
CT: control target
= control target key end

     0   :  { %11 = vsyncpa [#allocation9], 0  ;;  %s2191_s0 = inlined_call_operand.vmem [shape: f32[5,5], index: 0, kind: input, shape index: {}]   ;;  %s2192_s1 = inlined_call_operand.vmem [shape: f32[5,5], index: 1, kind: input, shape index: {}]   ;;  %s2193_s2 = inlined_call_operand.vmem [shape: f32[5,5], index: 2, kind: input, shape index: {}]   ;;  %s2194_s3 = inlined_call_operand.vmem [shape: f32[5,5], index: 3, kind: input, shape index: {}]   ;;  %s2195_s4 = inlined_call_operand.vmem [shape: f32[5], index: 4, kind: output, shape index: {0}]   ;;  %s2196_s5 = inlined_call_operand.vmem [shape: f32[5], index: 5, kind: output, shape index: {1}]   ;;  %s2197_s6 = inlined_call_operand.hbm [shape: f32[5,5], index: 6, kind: output, shape index: {2}]   ;;  %s2198_s7 = inlined_call_operand.hbm [shape: f32[5,5], index: 7, kind: output, shape index: {3}]   ;;  %s2199_s8 = inlined_call_operand.hbm [shape: f32[5,5], index: 8, kind: output, shape index: {4}]   ;;  %s2200_s9 = inlined_call_operand.hbm [shape: f32[5,5], index: 9, kind: output, shape index: {5}]  }
   0x1   :  { %12 = vsyncpa [#allocation11], 0 }
   0x2   :  { %13 = vsyncpa [#allocation14], 0  ;;  %s1815_s30 = smov [#allocation0]   ;;  %s1819_s12 = smov %s2191_s0  }
   0x3 LB: > { %v61_v0 = vld [vmem:[%s1821_s12] sm:$0xff]  ;;  %s63_s12 = scalar_lea.vmem %s1821_s12, 8   ;;  %s1821_s12 = sphi %s1819_s12, %s63_s12   ;;  %s1817_s30 = sphi %s1815_s30, %s64_s30  }
   0x4   : > { %62 = vst [vmem:[%s1817_s30] sm:$0xff] %v61_v0  ;;  %s64_s30 = scalar_lea.vmem %s1817_s30, 8   ;;  %p58_p0 = scmp.gt.s32.totalorder %s63_s12, %s2191_s0 }
   0x5   :  { %s1823_s15 = smov (%p58_p0), [#allocation1]   ;;  %s1827_s18 = smov (%p58_p0), %s2192_s1  }
   0x6   :  { %60 = sbr.rel (!%p58_p0) target bundleno = 3 (0x3), region = 242 }
   0xd LB: > { %v123_v1 = vld [vmem:[%s1829_s18] sm:$0xff]  ;;  %s125_s18 = scalar_lea.vmem %s1829_s18, 8   ;;  %s1829_s18 = sphi %s1827_s18, %s125_s18   ;;  %s1825_s15 = sphi %s1823_s15, %s126_s15  }
   0xe   : > { %124 = vst [vmem:[%s1825_s15] sm:$0xff] %v123_v1  ;;  %s126_s15 = scalar_lea.vmem %s1825_s15, 8   ;;  %p120_p1 = scmp.gt.s32.totalorder %s125_s18, %s2192_s1 }
   0xf   :  { %s1831_s0 = smov (%p120_p1), [#allocation2]   ;;  %s1835_s23 = smov (%p120_p1), %s2193_s2  }
  0x10   :  { %122 = sbr.rel (!%p120_p1) target bundleno = 13 (0xd), region = 264 }
  0x17 LB: > { %v185_v2 = vld [vmem:[%s1837_s23] sm:$0xff]  ;;  %s187_s23 = scalar_lea.vmem %s1837_s23, 8   ;;  %s1837_s23 = sphi %s1835_s23, %s187_s23   ;;  %s1833_s0 = sphi %s1831_s0, %s188_s0  }
  0x18   : > { %186 = vst [vmem:[%s1833_s0] sm:$0xff] %v185_v2  ;;  %s188_s0 = scalar_lea.vmem %s1833_s0, 8   ;;  %p182_p2 = scmp.gt.s32.totalorder %s187_s23, %s2193_s2 }
  0x19   :  { %s1839_s1 = smov (%p182_p2), [#allocation3]   ;;  %s1843_s28 = smov (%p182_p2), %s2194_s3  }
  0x1a   :  { %184 = sbr.rel (!%p182_p2) target bundleno = 23 (0x17), region = 286 }
  0x21 LB: > { %v247_v3 = vld [vmem:[%s1845_s28] sm:$0xff]  ;;  %s249_s28 = scalar_lea.vmem %s1845_s28, 8   ;;  %s1845_s28 = sphi %s1843_s28, %s249_s28   ;;  %s1841_s1 = sphi %s1839_s1, %s250_s1  }
  0x22   : > { %248 = vst [vmem:[%s1841_s1] sm:$0xff] %v247_v3  ;;  %s250_s1 = scalar_lea.vmem %s1841_s1, 8   ;;  %p244_p3 = scmp.gt.s32.totalorder %s249_s28, %s2194_s3 }
  0x23   :  { %s262_s2 = smov (%p244_p3), [#allocation15]  ;;  %v263_v4 = vld [vmem:[#allocation0] sm:$0xff] (%p244_p3)  ;;  %s265_s10 = smov (%p244_p3), [#allocation16]  ;;  %v266_v5 = vld [vmem:[#allocation1] sm:$0xff] (%p244_p3)  ;;  %v269_v6 = vld [vmem:[#allocation2] sm:$0xff] (%p244_p3)  ;;  %v279_v7 = vlaneseq (%p244_p3)  ;;  %v1855_v9 = vmov (%p244_p3), 0.0  }
  0x24   :  { %246 = sbr.rel (!%p244_p3) target bundleno = 33 (0x21), region = 308  ;;  %264 = vst [vmem:[%s262_s2] sm:$0xff] (%p244_p3), %v263_v4  ;;  %267 = vst [vmem:[%s265_s10] sm:$0xff] (%p244_p3), %v266_v5  ;;  %s268_s11 = smov (%p244_p3), [#allocation17] }
  0x25   :  { %s271_s12 = smov (%p244_p3), [#allocation18]  ;;  %274 = vst [vmem:[#allocation8] sm:$0xff] (%p244_p3), %v1855_v9  ;;  %275 = vst [vmem:[#allocation10] sm:$0xff] (%p244_p3), %v1855_v9  ;;  %v1936_v10 = vand.u32 (%p244_p3), 127, %v279_v7  ;;  %v1938_v11 = vshrl.u32 (%p244_p3), %v279_v7, 7  ;;  %s278_s3 = smov (%p244_p3), [#allocation8] }
  0x26   :  { %276 = vst [vmem:[#allocation12] sm:$0xff] (%p244_p3), %v1855_v9  ;;  %277 = vst [vmem:[#allocation13] sm:$0xff] (%p244_p3), %v1855_v9  ;;  %s291_s13 = smov (%p244_p3), [#allocation13]  ;;  %s1179_s14 = smov (%p244_p3), [#allocation15] }
  0x27   :  { %270 = vst [vmem:[%s268_s11] sm:$0xff] (%p244_p3), %v269_v6  ;;  %v281_v10 = vmov (%p244_p3), %v1936_v10  ;;  %v284_v11 = vmov (%p244_p3), %v1938_v11  ;;  %vm1183_vm2 = vcmp.lt.s32.totalorder (%p244_p3), %v1936_v10, 5  ;;  %s1196_s15 = smov (%p244_p3), [#allocation16]  ;;  %s1213_s16 = smov (%p244_p3), [#allocation17] }
  0x28   :  { %v294_v10 = vmov (%p244_p3), %v1936_v10  ;;  %v297_v11 = vmov (%p244_p3), %v1938_v11  ;;  %vm288_vm0 = vcmp.eq.s32.totalorder (%p244_p3), %v284_v11, %v281_v10  ;;  %s1230_s17 = smov (%p244_p3), [#allocation18] }
  0x29   :  { %v272_v8 = vld [vmem:[#allocation3] sm:$0xff] (%p244_p3)  ;;  %vm301_vm1 = vcmp.eq.s32.totalorder (%p244_p3), %v297_v11, %v294_v10  ;;  %v1175_v10 = vmov (%p244_p3), %v1936_v10  ;;  %v1178_v11 = vmov (%p244_p3), %v1938_v11 }
  0x2a   :  { %273 = vst [vmem:[%s271_s12] sm:$0xff] (%p244_p3), %v272_v8  ;;  %vm1188_vm3 = vcmp.eq.s32.totalorder (%p244_p3), %v1178_v11, %v1175_v10  ;;  %v1226_v10 = vmov (%p244_p3), %v1936_v10  ;;  %v1195_v11 = vmov (%p244_p3), %v1938_v11 }
  0x2b   :  { %v1185_v16 = vld [vmem:[%s1179_s14] sm:$0x1f]  ;;  %v1192_v10 = vmov %v1936_v10  ;;  %v1229_v11 = vmov %v1938_v11 }
  0x2c   :  { %v285_v12 = vld [vmem:[%s278_s3] sm:$0x1f]  ;;  %v1186_v18 = vsel %vm1183_vm2, %v1185_v16, 0.0  ;;  %v1209_v10 = vmov %v1936_v10  ;;  %v1212_v11 = vmov %v1938_v11  ;;  %vm1239_vm4 = vcmp.eq.s32.totalorder %v1229_v11, %v1226_v10 }
  0x2d   :  { %v298_v13 = vld [vmem:[%s291_s13] sm:$0x1f]  ;;  %v289_v14 = vsel %vm288_vm0, 1.0, %v285_v12  ;;  %v1187_v22 = vmul.f32 %v1186_v18, %v1186_v18 }
  0x2e   :  { %v302_v15 = vsel %vm301_vm1, 1.0, %v298_v13  ;;  %290 = vst [vmem:[%s278_s3] sm:$0x1f] %v289_v14  ;;  %v1202_v17 = vld [vmem:[%s1196_s15] sm:$0x1f] }
  0x2f   :  { %303 = vst [vmem:[%s291_s13] sm:$0x1f] %v302_v15  ;;  %v1203_v19 = vsel %vm1183_vm2, %v1202_v17, 0.0  ;;  %v1219_v20 = vld [vmem:[%s1213_s16] sm:$0x1f]  ;;  %v1189_v29 = vsel %vm1188_vm3, 0.0, %v1187_v22 }
  0x30   :  { %v1204_v23 = vmul.f32 %v1203_v19, %v1203_v19  ;;  %v1220_v24 = vsel %vm1183_vm2, %v1219_v20, 0.0 }
  0x31   :  { %v1236_v21 = vld [vmem:[%s1230_s17] sm:$0x1f]  ;;  %v1221_v26 = vmul.f32 %v1220_v24, %v1220_v24 }
  0x32   :  { %v1237_v25 = vsel %vm1183_vm2, %v1236_v21, 0.0  ;;  %v1206_v27 = vadd.f32 %v1204_v23, %v1187_v22  ;;  %v1205_v30 = vadd.f32 %v1204_v23, %v1189_v29 }
  0x33   :  { %v1238_v28 = vmul.f32 %v1237_v25, %v1237_v25 }
  0x34   :  { %v1223_v31 = vadd.f32 %v1221_v26, %v1206_v27  ;;  %v1222_v32 = vadd.f32 %v1221_v26, %v1205_v30 }
  0x35   :  { %v1240_v33 = vsel %vm1239_vm4, 0.0, %v1238_v28 }
  0x36   :  { %v1242_v34 = vadd.f32 %v1238_v28, %v1223_v31  ;;  %v1241_v35 = vadd.f32 %v1240_v33, %v1222_v32 }
  0x38   :  { %1243 = vadd.xlane.f32.xlu0 %v1242_v34 }
  0x3c   :  { %1251 = vadd.xlane.f32.xlu0 %v1241_v35 }
  0xc5   :  { %v1244_v36 = vpop.xlane.xlu0 %1243 }
  0xc6   :  { %v1245_v37 = vrot.slane %v1244_v36, 4 }
  0xc8   :  { %v1246_v38 = vadd.f32 %v1245_v37, %v1244_v36 }
  0xc9   :  { %v1252_v39 = vpop.xlane.xlu0 %1251 }
  0xca   :  { %v1247_v40 = vrot.slane %v1246_v38, 2  ;;  %v1253_v41 = vrot.slane %v1252_v39, 4 }
  0xcc   :  { %v1254_v42 = vadd.f32 %v1253_v41, %v1252_v39  ;;  %v1248_v43 = vadd.f32 %v1247_v40, %v1246_v38 }
  0xce   :  { %v1255_v44 = vrot.slane %v1254_v42, 2  ;;  %v1249_v46 = vrot.slane %v1248_v43, 1 }
  0xd0   :  { %v1256_v45 = vadd.f32 %v1255_v44, %v1254_v42  ;;  %v1250_v49 = vadd.f32 %v1249_v46, %v1248_v43 }
  0xd2   :  { %v1257_v47 = vrot.slane %v1256_v45, 1 }
  0xd4   :  { %v1258_v48 = vadd.f32 %v1257_v47, %v1256_v45 }
  0xd6   :  { %1338 = vpush %v1258_v48 }
  0xd7   :  { %1340 = vpush %v1250_v49 }
 0x107   :  { %s1339_s18 = spop %1338 }
 0x108   :  { %s1341_s19 = spop %1340 }
 0x109   :  { %s1261_s20 = smul.f32 1e-10, %s1341_s19 }
 0x10b   :  { %p1262_p4 = scmp.le.f32.partialorder %s1339_s18, %s1261_s20 }
 0x10c   :  { %s1962_s0 = smov (!%p1262_p4), 0  }
 0x10d   :  { %1265 = sbr.rel (%p1262_p4) target bundleno = 951 (0x3b7), region = 324 }
 0x114 LB: > { %s1967_s21 = smov 0   ;;  %s1849_s0 = sphi %s1962_s0, %s2201_s0  }
 0x115 LB: >> { %s408_s22 = smov [#allocation15]  ;;  %v412_v10 = vmov %v1936_v10  ;;  %v415_v11 = vmov %v1938_v11  ;;  %s428_s23 = smov [#allocation16]  ;;  %vm731_vm14 = vcmp.eq.s32.totalorder %v1938_v11, 0  ;;  %vm743_vm15 = vcmp.eq.s32.totalorder %v1938_v11, 4  ;;  %s1853_s21 = sphi %s1967_s21, %s407_s21  }
 0x116   : >> { %v432_v10 = vmov %v1936_v10  ;;  %v435_v11 = vmov %v1938_v11  ;;  %v416_v50 = vld [vmem:[%s408_s22] sm:$0x1f]  ;;  %vm419_vm5 = vcmp.eq.s32.totalorder %v415_v11, %v412_v10  ;;  %s448_s24 = smov [#allocation18]  ;;  %s409_s25 = smov [#allocation19] }
 0x117   : >> { %vm439_vm6 = vcmp.eq.s32.totalorder %v435_v11, %v432_v10  ;;  %v452_v10 = vmov %v1936_v10  ;;  %v455_v11 = vmov %v1938_v11  ;;  %v420_v51 = vsel %vm419_vm5, %v416_v50, 0.0  ;;  %v436_v52 = vld [vmem:[%s428_s23] sm:$0x1f]  ;;  %s429_s1 = smov [#allocation20]  ;;  %s449_s26 = smov [#allocation21] }
 0x118   : >> { %vm459_vm7 = vcmp.eq.s32.totalorder %v455_v11, %v452_v10  ;;  %v421_v53 = vrot.slane %v420_v51, 4  ;;  %v440_v54 = vsel %vm439_vm6, %v436_v52, 0.0  ;;  %v456_v55 = vld [vmem:[%s448_s24] sm:$0x1f]  ;;  %s472_s27 = smov [#allocation20]  ;;  %s470_s28 = smov [#allocation19]  ;;  %v521_v10 = vmov %v1936_v10 }
 0x119   : >> { %v441_v56 = vrot.slane %v440_v54, 4  ;;  %v460_v57 = vsel %vm459_vm7, %v456_v55, 0.0  ;;  %s474_s29 = smov [#allocation21]  ;;  %s509_s30 = smov [#allocation22]  ;;  %v524_v11 = vmov %v1938_v11  ;;  %v536_v10 = vmov %v1936_v10 }
 0x11a   : >> { %v422_v58 = vadd.f32 %v421_v53, %v420_v51  ;;  %v461_v59 = vrot.slane %v460_v57, 4  ;;  %s511_s2 = smov [#allocation23]  ;;  %s468_s10 = smov [#allocation24]  ;;  %v539_v11 = vmov %v1938_v11  ;;  %vm526_vm12 = vcmp.eq.s32.totalorder %v524_v11, %v521_v10 }
 0x11b   : >> { %v442_v60 = vadd.f32 %v441_v56, %v440_v54  ;;  %s469_s11 = smov [#allocation25]  ;;  %s513_s10 = smov %s468_s10  ;;  %vm541_vm13 = vcmp.eq.s32.totalorder %v539_v11, %v536_v10  ;;  %v634_v10 = vmov %v1936_v10  ;;  %v637_v11 = vmov %v1938_v11 }
 0x11c   : >> { %v423_v61 = vrot.slane %v422_v58, 2  ;;  %v462_v62 = vadd.f32 %v461_v59, %v460_v57  ;;  %s515_s11 = smov %s469_s11  ;;  %s517_s12 = smov [#allocation24]  ;;  %v648_v10 = vmov %v1936_v10  ;;  %v651_v11 = vmov %v1938_v11 }
 0x11d   : >> { %v443_v63 = vrot.slane %v442_v60, 2  ;;  %s532_s3 = smov [#allocation25]  ;;  %s530_s13 = smov [#allocation26]  ;;  %vm641_vm0 = vcmp.eq.s32.totalorder %v637_v11, %v634_v10  ;;  %v607_v10 = vmov %v1936_v10  ;;  %v610_v11 = vmov %v1938_v11 }
 0x11e   : >> { %v424_v0 = vadd.f32 %v423_v61, %v422_v58  ;;  %v463_v1 = vrot.slane %v462_v62, 2  ;;  %s547_s14 = smov [#allocation26]  ;;  %s1982_s15 = smov [#allocation15]  ;;  %v621_v10 = vmov %v1936_v10  ;;  %v624_v11 = vmov %v1938_v11 }
 0x11f   : >> { %v444_v2 = vadd.f32 %v443_v63, %v442_v60  ;;  %s545_s16 = smov [#allocation27]  ;;  %s1984_s17 = smov [#allocation16]  ;;  %v555_v49 = vld [vmem:[%s1982_s15] sm:$0x1f]  ;;  %vm656_vm1 = vcmp.eq.s32.totalorder %v651_v11, %v648_v10  ;;  %vm615_vm3 = vcmp.eq.s32.totalorder %v610_v11, %v607_v10  ;;  %vm628_vm4 = vcmp.eq.s32.totalorder %v624_v11, %v621_v10 }
 0x120   : >> { %v425_v3 = vrot.slane %v424_v0, 1  ;;  %v464_v4 = vadd.f32 %v463_v1, %v462_v62  ;;  %s1986_s18 = smov [#allocation17]  ;;  %s1988_s19 = smov [#allocation18]  ;;  %v556_v50 = vld [vmem:[%s1984_s17] sm:$0x1f]  ;;  %vm670_vm5 = vcmp.eq.s32.totalorder %v1936_v10, 0 }
 0x121   : >> { %v445_v5 = vrot.slane %v444_v2, 1  ;;  %s1990_s20 = smov [#allocation8]  ;;  %s1992_s22 = smov [#allocation10]  ;;  %v557_v51 = vld [vmem:[%s1986_s18] sm:$0x1f]  ;;  %vm674_vm6 = vcmp.eq.s32.totalorder %v1936_v10, 1 }
 0x122   : >> { %v426_v6 = vadd.f32 %v425_v3, %v424_v0  ;;  %v465_v7 = vrot.slane %v464_v4, 1  ;;  %s1994_s23 = smov [#allocation12]  ;;  %s771_s24 = smov [#allocation26]  ;;  %v558_v52 = vld [vmem:[%s1988_s19] sm:$0x1f]  ;;  %vm687_vm7 = vcmp.eq.s32.totalorder %v1936_v10, 4 }
 0x123   : >> { %v446_v8 = vadd.f32 %v445_v5, %v444_v2  ;;  %v779_v53 = vld [vmem:[%s1990_s20] sm:$0x1f]  ;;  %s407_s21 = sadd.s32 1, %s1853_s21  }
 0x124   : >> { %427 = vst [vmem:[%s409_s25] sm:$0x1] %v426_v6  ;;  %v466_v9 = vadd.f32 %v465_v7, %v464_v4  ;;  %s1998_s25 = smov [#allocation13]  ;;  %v780_v54 = vld [vmem:[%s1992_s22] sm:$0x1f]  ;;  %p404_p5 = scmp.ge.s32.totalorder %s407_s21, 9  }
 0x125   : >> { %447 = vst [vmem:[%s429_s1] sm:$0x1] %v446_v8  ;;  %v781_v55 = vld [vmem:[%s1994_s23] sm:$0x1f]  ;;  %s549_s1 = smov [#allocation27]  ;;  %v308_v10 = vmov (%p404_p5), %v1936_v10  ;;  %v311_v11 = vmov (%p404_p5), %v1938_v11 }
 0x126   : >> { %467 = vst [vmem:[%s449_s26] sm:$0x1] %v466_v9  ;;  %v782_v57 = vld [vmem:[%s1998_s25] sm:$0x1f]  ;;  %s773_s26 = smov [#allocation27]  ;;  %v361_v10 = vmov (%p404_p5), %v1936_v10 }
 0x12b   : >> { %v471_v14 = vld [vmem:[%s470_s28] sm:$0xff]  ;;  %s577_s28 = smov [#allocation25] }
 0x12c   : >> { %v473_v12 = vld [vmem:[%s472_s27] sm:$0xff]  ;;  %v494_v27 = vand.u32 2147483647, %v471_v14  ;;  %s575_s27 = smov [#allocation24] }
 0x12d   : >> { %v477_v13 = vmul.f32 2.0, %v473_v12  ;;  %v475_v15 = vld [vmem:[%s474_s29] sm:$0xff]  ;;  %v495_v32 = vand.u32 2147483647, %v473_v12  ;;  %s2014_s29 = smov [#allocation8] }
 0x12e   : >> { %v476_v16 = vsub.f32 %v475_v15, %v471_v14  ;;  %v496_v28 = vand.u32 2147483647, %v475_v15 }
 0x12f   : >> { %1593 = vrcp.f32 %v477_v13 }
 0x130   : >> { %v497_v31 = vmin.f32 %v494_v27, %v496_v28 }
 0x132   : >> { %v498_v33 = vmul.f32 1.1920929e-08, %v497_v31 }
 0x134   : >> { %vm499_vm11 = vcmp.le.f32.partialorder %v495_v32, %v498_v33 }
 0x139   : >> { %v1594_v17 = vpop.eup %1593 }
 0x13a   : >> { %v479_v18 = vmul.f32 %v1594_v17, %v476_v16 }
 0x13c   : >> { %v481_v19 = vmul.f32 %v479_v18, %v479_v18  ;;  %vm480_vm10 = vcmp.ge.f32.partialorder %v479_v18, 0.0 }
 0x13e   : >> { %v482_v20 = vadd.f32 1.0, %v481_v19 }
 0x140   : >> { %1595 = vrsqrt.f32 %v482_v20  ;;  %vm485_vm8 = vcmp.eq.f32.partialorder %v482_v20, inf  ;;  %v488_v22 = vand.u32 2147483648, %v482_v20  ;;  %vm487_vm9 = vcmp.eq.f32.partialorder %v482_v20, 0.0 }
 0x14a   : >> { %v1596_v21 = vpop.eup %1595 }
 0x14b   : >> { %v484_v23 = vmul.f32 %v1596_v21, %v482_v20 }
 0x14d   : >> { %v486_v24 = vsel %vm485_vm8, %v482_v20, %v484_v23  ;;  %vm323_vm8 = vcmp.eq.s32.totalorder (%p404_p5), %v311_v11, %v308_v10  ;;  %v364_v11 = vmov (%p404_p5), %v1938_v11  ;;  %v327_v10 = vmov (%p404_p5), %v1936_v10 }
 0x14e   : >> { %v489_v25 = vsel %vm487_vm9, %v488_v22, %v486_v24  ;;  %v330_v11 = vmov (%p404_p5), %v1938_v11  ;;  %v344_v10 = vmov (%p404_p5), %v1936_v10  ;;  %vm376_vm9 = vcmp.eq.s32.totalorder (%p404_p5), %v364_v11, %v361_v10 }
 0x14f   : >> { %v490_v26 = vxor.u32 2147483648, %v489_v25  ;;  %v347_v11 = vmov (%p404_p5), %v1938_v11 }
 0x151   : >> { %v491_v29 = vsel %vm480_vm10, %v489_v25, %v490_v26 }
 0x152   : >> { %v492_v30 = vadd.f32 %v491_v29, %v479_v18 }
 0x154   : >> { %1597 = vrcp.f32 %v492_v30 }
 0x15e   : >> { %v1598_v34 = vpop.eup %1597 }
 0x15f   : >> { %v500_v35 = vsel %vm499_vm11, 0.0, %v1598_v34 }
 0x160   : >> { %v501_v36 = vmul.f32 %v500_v35, %v500_v35  ;;  %v505_v37 = vmul.f32 %v500_v35, %v473_v12 }
 0x162   : >> { %v502_v38 = vadd.f32 1.0, %v501_v36  ;;  %v506_v39 = vsub.f32 %v471_v14, %v505_v37  ;;  %v508_v40 = vadd.f32 %v505_v37, %v475_v15 }
 0x164   : >> { %1599 = vrsqrt.f32 %v502_v38  ;;  %510 = vst [vmem:[%s509_s30] sm:$0xff] %v506_v39  ;;  %512 = vst [vmem:[%s511_s2] sm:$0xff] %v508_v40  ;;  %s2016_s30 = smov [#allocation17]  ;;  %s2018_s2 = smov [#allocation18] }
 0x16e   : >> { %v1600_v41 = vpop.eup %1599 }
 0x16f   : >> { %514 = vst [vmem:[%s513_s10] sm:$0xff] %v1600_v41  ;;  %v504_v42 = vmul.f32 %v1600_v41, %v500_v35  ;;  %s2020_s10 = smov [#allocation15] }
 0x171   : >> { %516 = vst [vmem:[%s515_s11] sm:$0xff] %v504_v42  ;;  %s2022_s11 = smov [#allocation12] }
 0x176   : >> { %v518_v43 = vld [vmem:[%s517_s12] ss:$0 sm:$0xff]  ;;  %s2024_s12 = smov [#allocation10] }
 0x177   : >> { %v527_v44 = vsel %vm526_vm12, %v518_v43, 0.0  ;;  %v576_v23 = vld [vmem:[%s575_s27] ss:$0 sm:$0xff]  ;;  %s747_s27 = smov [#allocation16] }
 0x178   : >> { %528 = vadd.xlane.f32.xlu0 %v527_v44  ;;  %v533_v45 = vld [vmem:[%s532_s3] ss:$0 sm:$0xff]  ;;  %s2028_s3 = smov [#allocation13] }
 0x179   : >> { %v542_v46 = vsel %vm541_vm13, %v533_v45, 0.0  ;;  %v578_v24 = vld [vmem:[%s577_s28] ss:$0 sm:$0xff]  ;;  %s724_s28 = smov [#allocation17] }
 0x17c   : >> { %543 = vadd.xlane.f32.xlu0 %v542_v46 }
 0x205   : >> { %v529_v47 = vpop.xlane.xlu0 %528 }
 0x206   : >> { %531 = vst [vmem:[%s530_s13] sm:$0xff] %v529_v47  ;;  %s2030_s13 = smov [#allocation16] }
 0x209   : >> { %v544_v48 = vpop.xlane.xlu0 %543 }
 0x20a   : >> { %546 = vst [vmem:[%s545_s16] sm:$0xff] %v544_v48  ;;  %s644_s16 = smov [#allocation18] }
 0x20d   : >> { %v548_v56 = vld [vmem:[%s547_s14] sm:$0xff]  ;;  %s645_s14 = smov [#allocation23] }
 0x20e   : >> { %v772_v58 = vld [vmem:[%s771_s24] sm:$0xff]  ;;  %v559_v59 = vmul.f32 %v555_v49, %v548_v56  ;;  %v562_v60 = vmul.f32 %v556_v50, %v548_v56  ;;  %v566_v61 = vmul.f32 %v557_v51, %v548_v56  ;;  %v569_v62 = vmul.f32 %v558_v52, %v548_v56  ;;  %s660_s24 = smov [#allocation16] }
 0x20f   : >> { %v783_v63 = vmul.f32 %v779_v53, %v772_v58  ;;  %v786_v0 = vmul.f32 %v780_v54, %v772_v58  ;;  %v790_v1 = vmul.f32 %v781_v55, %v772_v58  ;;  %v793_v2 = vmul.f32 %v782_v57, %v772_v58 }
 0x211   : >> { %v550_v3 = vld [vmem:[%s549_s1] sm:$0xff]  ;;  %s2075_s1 = smov [#allocation18] }
 0x212   : >> { %v774_v4 = vld [vmem:[%s773_s26] sm:$0xff]  ;;  %v560_v5 = vmul.f32 %v557_v51, %v550_v3  ;;  %v563_v6 = vmul.f32 %v558_v52, %v550_v3  ;;  %v565_v7 = vmul.f32 %v555_v49, %v550_v3  ;;  %v568_v8 = vmul.f32 %v556_v50, %v550_v3  ;;  %s723_s26 = smov [#allocation15] }
 0x213   : >> { %v784_v9 = vmul.f32 %v781_v55, %v774_v4  ;;  %v787_v12 = vmul.f32 %v782_v57, %v774_v4  ;;  %v789_v13 = vmul.f32 %v779_v53, %v774_v4  ;;  %v792_v14 = vmul.f32 %v780_v54, %v774_v4  ;;  %v652_v55 = vld [vmem:[%s645_s14] ss:$0 sm:$0xff] }
 0x214   : >> { %v561_v15 = vsub.f32 %v559_v59, %v560_v5  ;;  %v564_v16 = vsub.f32 %v562_v60, %v563_v6  ;;  %v567_v17 = vadd.f32 %v566_v61, %v565_v7  ;;  %v570_v18 = vadd.f32 %v569_v62, %v568_v8 }
 0x215   : >> { %v785_v19 = vsub.f32 %v783_v63, %v784_v9  ;;  %v788_v20 = vsub.f32 %v786_v0, %v787_v12  ;;  %v791_v21 = vadd.f32 %v790_v1, %v789_v13  ;;  %v794_v22 = vadd.f32 %v793_v2, %v792_v14 }
 0x216   : >> { %572 = vst [vmem:[%s1984_s17] sm:$0x1f] %v564_v16  ;;  %574 = vst [vmem:[%s1988_s19] sm:$0x1f] %v570_v18  ;;  %s604_s17 = smov [#allocation22]  ;;  %s618_s19 = smov [#allocation16] }
 0x217   : >> { %571 = vst [vmem:[%s1982_s15] sm:$0x1f] %v561_v15  ;;  %573 = vst [vmem:[%s1986_s18] sm:$0x1f] %v567_v17  ;;  %s631_s15 = smov [#allocation17]  ;;  %s603_s18 = smov [#allocation15]  ;;  %v611_v59 = vld [vmem:[%s604_s17] ss:$0 sm:$0xff] }
 0x218   : >> { %795 = vst [vmem:[%s1990_s20] sm:$0x1f] %v785_v19  ;;  %796 = vst [vmem:[%s1992_s22] sm:$0x1f] %v788_v20  ;;  %s2072_s20 = smov [#allocation17]  ;;  %s1856_s22 = smov 1  }
 0x219   : >> { %797 = vst [vmem:[%s1994_s23] sm:$0x1f] %v791_v21  ;;  %798 = vst [vmem:[%s1998_s25] sm:$0x1f] %v794_v22  ;;  %s659_s23 = smov [#allocation15]  ;;  %s1857_s25 = smov 127  }
 0x21d   : >> { %v586_v26 = vld [vmem:[%s2018_s2] sm:$0x1f] }
 0x21e   : >> { %v585_v25 = vld [vmem:[%s2016_s30] sm:$0x1f]  ;;  %v594_v32 = vmul.f32 %v586_v26, %v578_v24  ;;  %v597_v38 = vmul.f32 %v586_v26, %v576_v23 }
 0x21f   : >> { %v583_v27 = vld [vmem:[%s2020_s10] sm:$0x1f]  ;;  %v593_v31 = vmul.f32 %v585_v25, %v576_v23  ;;  %v596_v33 = vmul.f32 %v585_v25, %v578_v24 }
 0x220   : >> { %v801_v28 = vld [vmem:[%s2014_s29] ss:$0 sm:$0xff]  ;;  %v1325_v30 = vld [vmem:[%s2014_s29 + $0x4] ss:$0 sm:$0xff]  ;;  %v587_v44 = vmul.f32 %v583_v27, %v576_v23  ;;  %v590_v45 = vmul.f32 %v583_v27, %v578_v24 }
 0x221   : >> { %v1324_v29 = vld [vmem:[%s2014_s29 - $0x1] sm:$0x1e]  ;;  %v1329_v41 = vld [vmem:[%s2024_s12 + $0x4] ss:$0 sm:$0xff]  ;;  %v595_v43 = vsub.f32 %v593_v31, %v594_v32  ;;  %v598_v49 = vadd.f32 %v597_v38, %v596_v33 }
 0x222   : >> { %v808_v34 = vsel %vm731_vm14, %v801_v28, %v1324_v29  ;;  %v812_v35 = vld [vmem:[%s2022_s11] ss:$0 sm:$0xff]  ;;  %v1327_v36 = vld [vmem:[%s2022_s11 + $0x1] sm:$0xf] }
 0x223   : >> { %v825_v37 = vld [vmem:[%s2024_s12] ss:$0 sm:$0xff]  ;;  %811 = vst [vmem:[%s2014_s29] sm:$0x1f] %v808_v34  ;;  %v820_v39 = vsel %vm743_vm15, %v1325_v30, %v1327_v36  ;;  %v1331_v47 = vld [vmem:[%s2028_s3 + $0x1] sm:$0xf]  ;;  %601 = vst [vmem:[%s2016_s30] sm:$0x1f] %v595_v43 }
 0x224   : >> { %v1328_v40 = vld [vmem:[%s2024_s12 - $0x1] sm:$0x1e]  ;;  %1326 = vst [vmem:[%s2014_s29 + $0x1] sm:$0x1] %v812_v35  ;;  %822 = vst [vmem:[%s2022_s11] sm:$0x1f] %v820_v39  ;;  %v844_v50 = vsel %vm743_vm15, %v1329_v41, %v1331_v47  ;;  %s748_s29 = smov [#allocation18] }
 0x225   : >> { %v836_v42 = vld [vmem:[%s2028_s3] ss:$0 sm:$0xff]  ;;  %v832_v46 = vsel %vm731_vm14, %v825_v37, %v1328_v40  ;;  %602 = vst [vmem:[%s2018_s2] sm:$0x1f] %v598_v49  ;;  %s847_s30 = sadd.s32 (%p404_p5), 1, %s1849_s0   ;;  %s312_s2 = smov (%p404_p5), [#allocation15] }
 0x226   : >> { %v584_v48 = vld [vmem:[%s2030_s13] sm:$0x1f]  ;;  %835 = vst [vmem:[%s2024_s12] sm:$0x1f] %v832_v46  ;;  %846 = vst [vmem:[%s2028_s3] sm:$0x1f] %v844_v50  ;;  %s348_s11 = smov (%p404_p5), [#allocation17]  ;;  %p400_p6 = scmp.ge.s32.totalorder (%p404_p5), %s847_s30, 15 }
 0x227   : >> { %v588_v51 = vmul.f32 %v584_v48, %v578_v24  ;;  %v591_v52 = vmul.f32 %v584_v48, %v576_v23  ;;  %1330 = vst [vmem:[%s2024_s12 + $0x1] sm:$0x1] %v836_v42  ;;  %s365_s12 = smov (%p404_p5), [#allocation18]  ;;  %s2201_s0 = smov (%p404_p5), %s847_s30 }
 0x229   : >> { %v589_v53 = vsub.f32 %v587_v44, %v588_v51  ;;  %v592_v54 = vadd.f32 %v591_v52, %v590_v45 }
 0x22a   : >> { %v638_v56 = vld [vmem:[%s631_s15] sm:$0x1f] }
 0x22b   : >> { %599 = vst [vmem:[%s2020_s10] sm:$0x1f] %v589_v53  ;;  %600 = vst [vmem:[%s2030_s13] sm:$0x1f] %v592_v54  ;;  %v642_v57 = vsel %vm641_vm0, 0.0, %v638_v56  ;;  %s331_s10 = smov (%p404_p5), [#allocation16] }
 0x22c   : >> { %v653_v58 = vld [vmem:[%s644_s16] sm:$0x1f]  ;;  %643 = vst [vmem:[%s631_s15] sm:$0x1f] %v642_v57 }
 0x22d   : >> { %v657_v60 = vsel %vm656_vm1, %v652_v55, %v653_v58 }
 0x22e   : >> { %658 = vst [vmem:[%s644_s16] sm:$0x1f] %v657_v60 }
 0x232   : >> { %v612_v61 = vld [vmem:[%s603_s18] sm:$0x1f] }
 0x233   : >> { %v625_v62 = vld [vmem:[%s618_s19] sm:$0x1f]  ;;  %v616_v63 = vsel %vm615_vm3, %v611_v59, %v612_v61 }
 0x234   : >> { %v629_v0 = vsel %vm628_vm4, 0.0, %v625_v62  ;;  %617 = vst [vmem:[%s603_s18] sm:$0x1f] %v616_v63  ;;  %v697_v1 = vld [vmem:[%s2072_s20] sm:$0x1f] }
 0x235   : >> { %630 = vst [vmem:[%s618_s19] sm:$0x1f] %v629_v0  ;;  %698 = vrot.lane.b32.xlu0 %v697_v1, %s1856_s22  ;;  %v693_v5 = vld [vmem:[%s2075_s1] sm:$0x1f] }
 0x236   : >> { %v714_v6 = vld [vmem:[%s2075_s1] sm:$0x1f] }
 0x237   : >> { %v696_v26 = vld [vmem:[%s2072_s20] sm:$0x1f] }
 0x23b   : >> { %v665_v2 = vld [vmem:[%s659_s23] sm:$0x1f] }
 0x23c   : >> { %666 = vrot.lane.b32.xlu1 %v665_v2, %s1856_s22  ;;  %v661_v3 = vld [vmem:[%s660_s24] sm:$0x1f] }
 0x23d   : >> { %v682_v4 = vld [vmem:[%s660_s24] sm:$0x1f] }
 0x23e   : >> { %v664_v14 = vld [vmem:[%s659_s23] sm:$0x1f] }
 0x240   : >> { %662 = vrot.lane.b32.xlu1 %v661_v3, %s1856_s22 }
 0x244   : >> { %683 = vrot.lane.b32.xlu1 %v682_v4, %s1857_s25 }
 0x248   : >> { %694 = vrot.lane.b32.xlu1 %v693_v5, %s1856_s22 }
 0x24c   : >> { %715 = vrot.lane.b32.xlu1 %v714_v6, %s1857_s25 }
 0x2a7   : >> { %v699_v16 = vpop.permute.xlu0 %698 }
 0x2a8   : >> { %v703_v18 = vsel %vm670_vm5, %v697_v1, %v699_v16 }
 0x2ae   : >> { %v667_v7 = vpop.permute.xlu1 %666 }
 0x2af   : >> { %v671_v8 = vsel %vm670_vm5, %v665_v2, %v667_v7 }
 0x2b2   : >> { %v663_v9 = vpop.permute.xlu1 %662 }
 0x2b3   : >> { %v675_v12 = vsel %vm674_vm6, %v663_v9, %v671_v8 }
 0x2b4   : >> { %v681_v13 = vsel %vm1183_vm2, %v675_v12, 0.0 }
 0x2b5   : >> { %689 = vst [vmem:[%s659_s23] sm:$0x1f] %v681_v13 }
 0x2b6   : >> { %v684_v15 = vpop.permute.xlu1 %683 }
 0x2b7   : >> { %v688_v17 = vsel %vm687_vm7, %v664_v14, %v684_v15 }
 0x2b8   : >> { %690 = vst [vmem:[%s660_s24] sm:$0x1f] %v688_v17 }
 0x2ba   : >> { %v695_v19 = vpop.permute.xlu1 %694 }
 0x2bb   : >> { %v707_v20 = vsel %vm674_vm6, %v695_v19, %v703_v18 }
 0x2bc   : >> { %v725_v21 = vld [vmem:[%s723_s26] ss:$0 sm:$0xff]  ;;  %v1317_v23 = vld [vmem:[%s723_s26 + $0x4] ss:$0 sm:$0xff]  ;;  %v713_v25 = vsel %vm1183_vm2, %v707_v20, 0.0 }
 0x2bd   : >> { %v1316_v22 = vld [vmem:[%s723_s26 - $0x1] sm:$0x1e]  ;;  %721 = vst [vmem:[%s2072_s20] sm:$0x1f] %v713_v25 }
 0x2be   : >> { %v732_v24 = vsel %vm731_vm14, %v725_v21, %v1316_v22  ;;  %v716_v27 = vpop.permute.xlu1 %715 }
 0x2bf   : >> { %735 = vst [vmem:[%s723_s26] sm:$0x1f] %v732_v24  ;;  %v749_v28 = vld [vmem:[%s747_s27] ss:$0 sm:$0xff]  ;;  %v1321_v30 = vld [vmem:[%s747_s27 + $0x4] ss:$0 sm:$0xff]  ;;  %v720_v31 = vsel %vm687_vm7, %v696_v26, %v716_v27 }
 0x2c0   : >> { %v1320_v29 = vld [vmem:[%s747_s27 - $0x1] sm:$0x1e]  ;;  %722 = vst [vmem:[%s2075_s1] sm:$0x1f] %v720_v31 }
 0x2c1   : >> { %v756_v32 = vsel %vm731_vm14, %v749_v28, %v1320_v29 }
 0x2c2   : >> { %759 = vst [vmem:[%s747_s27] sm:$0x1f] %v756_v32 }
 0x2c4   : >> { %v736_v33 = vld [vmem:[%s724_s28] ss:$0 sm:$0xff]  ;;  %v1319_v34 = vld [vmem:[%s724_s28 + $0x1] sm:$0xf] }
 0x2c5   : >> { %1318 = vst [vmem:[%s723_s26 + $0x1] sm:$0x1] %v736_v33  ;;  %v744_v35 = vsel %vm743_vm15, %v1317_v23, %v1319_v34  ;;  %406 = sbr.rel (!%p404_p5) target bundleno = 277 (0x115), region = 319 }
 0x2c6   : >> { %746 = vst [vmem:[%s724_s28] sm:$0x1f] %v744_v35 }
 0x2c7   : >> { %v760_v36 = vld [vmem:[%s748_s29] ss:$0 sm:$0xff]  ;;  %v1323_v37 = vld [vmem:[%s748_s29 + $0x1] sm:$0xf] }
 0x2c8   : >> { %1322 = vst [vmem:[%s747_s27 + $0x1] sm:$0x1] %v760_v36  ;;  %v768_v38 = vsel %vm743_vm15, %v1321_v30, %v1323_v37 }
 0x2c9   : >> { %770 = vst [vmem:[%s748_s29] sm:$0x1f] %v768_v38 }
 0x2cc   : > { %v318_v39 = vld [vmem:[%s312_s2] sm:$0x1f] }
 0x2cd   : > { %v319_v41 = vsel %vm1183_vm2, %v318_v39, 0.0  ;;  %v354_v43 = vld [vmem:[%s348_s11] sm:$0x1f] }
 0x2ce   : > { %v320_v45 = vmul.f32 %v319_v41, %v319_v41  ;;  %v355_v47 = vsel %vm1183_vm2, %v354_v43, 0.0 }
 0x2cf   : > { %v337_v40 = vld [vmem:[%s331_s10] sm:$0x1f]  ;;  %v356_v49 = vmul.f32 %v355_v47, %v355_v47 }
 0x2d0   : > { %v338_v42 = vsel %vm1183_vm2, %v337_v40, 0.0  ;;  %v371_v44 = vld [vmem:[%s365_s12] sm:$0x1f]  ;;  %v324_v52 = vsel %vm323_vm8, 0.0, %v320_v45 }
 0x2d1   : > { %v339_v46 = vmul.f32 %v338_v42, %v338_v42  ;;  %v372_v48 = vsel %vm1183_vm2, %v371_v44, 0.0 }
 0x2d2   : > { %v373_v51 = vmul.f32 %v372_v48, %v372_v48 }
 0x2d3   : > { %v341_v50 = vadd.f32 %v339_v46, %v320_v45  ;;  %v340_v53 = vadd.f32 %v339_v46, %v324_v52 }
 0x2d4   : > { %v377_v56 = vsel %vm376_vm9, 0.0, %v373_v51 }
 0x2d5   : > { %v358_v54 = vadd.f32 %v356_v49, %v341_v50  ;;  %v357_v55 = vadd.f32 %v356_v49, %v340_v53 }
 0x2d7   : > { %v379_v57 = vadd.f32 %v373_v51, %v358_v54  ;;  %v378_v58 = vadd.f32 %v377_v56, %v357_v55 }
 0x2d9   : > { %380 = vadd.xlane.f32.xlu0 %v379_v57 }
 0x2dd   : > { %388 = vadd.xlane.f32.xlu0 %v378_v58 }
 0x366   : > { %v381_v59 = vpop.xlane.xlu0 %380 }
 0x367   : > { %v382_v60 = vrot.slane %v381_v59, 4 }
 0x369   : > { %v383_v61 = vadd.f32 %v382_v60, %v381_v59 }
 0x36a   : > { %v389_v62 = vpop.xlane.xlu0 %388 }
 0x36b   : > { %v384_v63 = vrot.slane %v383_v61, 2  ;;  %v390_v0 = vrot.slane %v389_v62, 4 }
 0x36d   : > { %v391_v1 = vadd.f32 %v390_v0, %v389_v62  ;;  %v385_v2 = vadd.f32 %v384_v63, %v383_v61 }
 0x36f   : > { %v392_v3 = vrot.slane %v391_v1, 2  ;;  %v386_v5 = vrot.slane %v385_v2, 1 }
 0x371   : > { %v393_v4 = vadd.f32 %v392_v3, %v391_v1  ;;  %v387_v8 = vadd.f32 %v386_v5, %v385_v2 }
 0x373   : > { %v394_v6 = vrot.slane %v393_v4, 1 }
 0x375   : > { %v395_v7 = vadd.f32 %v394_v6, %v393_v4 }
 0x377   : > { %1342 = vpush %v395_v7 }
 0x378   : > { %1344 = vpush %v387_v8 }
 0x3a8   : > { %s1343_s21 = spop %1342 }
 0x3a9   : > { %s1345_s3 = spop %1344 }
 0x3aa   : > { %s398_s13 = smul.f32 1e-10, %s1345_s3 }
 0x3ac   : > { %p399_p7 = scmp.le.f32.partialorder %s1343_s21, %s398_s13 }
 0x3ae   : > { %p401_p8 = por %p400_p6, %p399_p7 }
 0x3b0   :  { %849 = sbr.rel (!%p401_p8) target bundleno = 276 (0x114), region = 330 }
 0x3b7 PF:  { %s850_s14 = smov [#allocation15]  ;;  %v854_v10 = vmov %v1936_v10  ;;  %v857_v11 = vmov %v1938_v11  ;;  %s1858_s15 = smov [#allocation10]  }
 0x3b8   :  { %v874_v10 = vmov %v1936_v10  ;;  %v877_v11 = vmov %v1938_v11  ;;  %s1040_s16 = sshll.u32 %s1858_s15, 4  ;;  %v858_v9 = vld [vmem:[%s850_s14] sm:$0x1f]  ;;  %vm861_vm10 = vcmp.eq.s32.totalorder %v857_v11, %v854_v10  ;;  %s870_s0 = smov [#allocation18]  ;;  %s1041_s16 = int_to_ptr.vmem [resolvable:$true] %s1040_s16 }
 0x3b9   :  { %vm881_vm11 = vcmp.eq.s32.totalorder %v877_v11, %v874_v10  ;;  %v862_v12 = vsel %vm861_vm10, %v858_v9, 0.0  ;;  %s1601_s17 = scalar_lea.vmem %s1041_s16, 128  ;;  %p1606_p10 = scmp.lt.s32.totalorder %s1041_s16, %s1041_s16 }
 0x3ba   :  { %p1602_p9 = scmp.ne.s32.totalorder %s1041_s16, %s1601_s17  ;;  %p1607_p11 = scmp.lt.s32.totalorder %s1601_s17, %s1601_s17 }
 0x3bc   :  { %p1608_p12 = por %p1607_p11, %p1606_p10 }
 0x3be   :  { %p1609_p13 = pnand %p1608_p12, %p1602_p9 }
 0x3c0   :  { %1612 = shalt.err (!%p1609_p13)
}
 0x3c1   :  { %s1613_s20 = scalar_lea.hbm %s2198_s7, 128 }
 0x3c2   :  { %p1614_p0 = scmp.ne.s32.totalorder %s2198_s7, %s1613_s20  ;;  %p1617_p1 = scmp.lt.u32.totalorder %s1613_s20, %s2198_s7 }
 0x3c4   :  { %p1619_p2 = pnand %p1617_p1, %p1614_p0 }
 0x3c6   :  { %1622 = shalt.err (!%p1619_p2)
}
 0x3c7   :  { %1043 = dma.vmem_to_hbm [thread:$0]  %s1041_s16, 128, %s2198_s7, [#allocation11]   ;;  %v863_v13 = vrot.slane %v862_v12, 4  ;;  %v878_v14 = vld [vmem:[%s870_s0] sm:$0x1f] }
 0x3c8   :  { %v882_v15 = vsel %vm881_vm11, %v878_v14, 0.0  ;;  %s1859_s27 = smov [#allocation8]   ;;  %s1860_s29 = smov [#allocation12]  }
 0x3c9   :  { %v864_v16 = vadd.f32 %v863_v13, %v862_v12  ;;  %v883_v17 = vrot.slane %v882_v15, 4  ;;  %s1033_s28 = sshll.u32 %s1859_s27, 4  ;;  %s1047_s30 = sshll.u32 %s1860_s29, 4  ;;  %s1034_s28 = int_to_ptr.vmem [resolvable:$true] %s1033_s28  ;;  %s1048_s30 = int_to_ptr.vmem [resolvable:$true] %s1047_s30 }
 0x3ca   :  { %s1623_s2 = scalar_lea.vmem %s1034_s28, 128  ;;  %p1628_p4 = scmp.lt.s32.totalorder %s1034_s28, %s1034_s28 }
 0x3cb   :  { %v865_v18 = vrot.slane %v864_v16, 2  ;;  %v884_v19 = vadd.f32 %v883_v17, %v882_v15  ;;  %p1624_p3 = scmp.ne.s32.totalorder %s1034_s28, %s1623_s2  ;;  %p1629_p5 = scmp.lt.s32.totalorder %s1623_s2, %s1623_s2 }
 0x3cd   :  { %p1630_p6 = por %p1629_p5, %p1628_p4 }
 0x3cf   :  { %p1631_p7 = pnand %p1630_p6, %p1624_p3 }
 0x3d1   :  { %1634 = shalt.err (!%p1631_p7)
}
 0x3d2   :  { %s1635_s11 = scalar_lea.hbm %s2197_s6, 128 }
 0x3d3   :  { %p1636_p8 = scmp.ne.s32.totalorder %s2197_s6, %s1635_s11  ;;  %p1639_p9 = scmp.lt.u32.totalorder %s1635_s11, %s2197_s6 }
 0x3d5   :  { %p1641_p10 = pnand %p1639_p9, %p1636_p8 }
 0x3d7   :  { %1644 = shalt.err (!%p1641_p10)
}
 0x3d8   :  { %1036 = dma.vmem_to_hbm [thread:$0]  %s1034_s28, 128, %s2197_s6, [#allocation9]   ;;  %v866_v10 = vadd.f32 %v865_v18, %v864_v16  ;;  %v885_v11 = vrot.slane %v884_v19, 2 }
 0x3d9   :  { %s1645_s16 = scalar_lea.vmem %s1048_s30, 128  ;;  %p1650_p12 = scmp.lt.s32.totalorder %s1048_s30, %s1048_s30 }
 0x3da   :  { %p1646_p11 = scmp.ne.s32.totalorder %s1048_s30, %s1645_s16  ;;  %p1651_p13 = scmp.lt.s32.totalorder %s1645_s16, %s1645_s16 }
 0x3dc   :  { %p1652_p0 = por %p1651_p13, %p1650_p12 }
 0x3de   :  { %p1653_p1 = pnand %p1652_p0, %p1646_p11 }
 0x3e0   :  { %1656 = shalt.err (!%p1653_p1)
}
 0x3e1   :  { %s1657_s18 = scalar_lea.hbm %s2199_s8, 128 }
 0x3e2   :  { %p1658_p2 = scmp.ne.s32.totalorder %s2199_s8, %s1657_s18  ;;  %p1661_p3 = scmp.lt.u32.totalorder %s1657_s18, %s2199_s8 }
 0x3e4   :  { %p1663_p4 = pnand %p1661_p3, %p1658_p2 }
 0x3e6   :  { %1666 = shalt.err (!%p1663_p4)
}
 0x3e7   :  { %1050 = dma.vmem_to_hbm [thread:$0]  %s1048_s30, 128, %s2199_s8, [#allocation11]   ;;  %v867_v20 = vrot.slane %v866_v10, 1  ;;  %v886_v21 = vadd.f32 %v885_v11, %v884_v19 }
 0x3e8   :  { %s1861_s25 = smov [#allocation13]   ;;  %s851_s26 = smov [#allocation4] }
 0x3e9   :  { %s1054_s1 = sshll.u32 %s1861_s25, 4  ;;  %s1055_s1 = int_to_ptr.vmem [resolvable:$true] %s1054_s1 }
 0x3ea   :  { %s1667_s27 = scalar_lea.vmem %s1055_s1, 128  ;;  %p1672_p6 = scmp.lt.s32.totalorder %s1055_s1, %s1055_s1 }
 0x3eb   :  { %p1668_p5 = scmp.ne.s32.totalorder %s1055_s1, %s1667_s27  ;;  %p1673_p7 = scmp.lt.s32.totalorder %s1667_s27, %s1667_s27 }
 0x3ed   :  { %p1674_p8 = por %p1673_p7, %p1672_p6 }
 0x3ef   :  { %p1675_p9 = pnand %p1674_p8, %p1668_p5 }
 0x3f1   :  { %1678 = shalt.err (!%p1675_p9)
}
 0x3f2   :  { %s1679_s2 = scalar_lea.hbm %s2200_s9, 128 }
 0x3f3   :  { %p1680_p10 = scmp.ne.s32.totalorder %s2200_s9, %s1679_s2  ;;  %p1683_p11 = scmp.lt.u32.totalorder %s1679_s2, %s2200_s9 }
 0x3f5   :  { %p1685_p12 = pnand %p1683_p11, %p1680_p10 }
 0x3f7   :  { %1688 = shalt.err (!%p1685_p12)
}
 0x3f8   :  { %1057 = dma.vmem_to_hbm [thread:$0]  %s1055_s1, 128, %s2200_s9, [#allocation14]   ;;  %v868_v22 = vadd.f32 %v867_v20, %v866_v10  ;;  %v887_v23 = vrot.slane %v886_v21, 1 }
 0x3f9   :  { %s871_s21 = smov [#allocation6] }
 0x3fa   :  { %869 = vst [vmem:[%s851_s26] sm:$0x1] %v868_v22  ;;  %v888_v24 = vadd.f32 %v887_v23, %v886_v21 }
 0x3fc   :  { %889 = vst [vmem:[%s871_s21] sm:$0x1] %v888_v24 }
 0x401   :  { %v893_v25 = vld [vmem:[#allocation4] sm:$0x1] }
 0x402   :  { %895 = vst [vmem:[#allocation5] sm:$0x1] %v893_v25 }
 0x403   :  { %v899_v26 = vld [vmem:[#allocation6] sm:$0x1] }
 0x404   :  { %901 = vst [vmem:[#allocation7] sm:$0x1] %v899_v26 }
 0x409   :  { %v964_v27 = vld [vmem:[#allocation5] sm:$0x1] }
 0x40a   :  { %965 = vst [vmem:[%s2195_s4] sm:$0x1] %v964_v27 }
 0x40b   :  { %v1028_v28 = vld [vmem:[#allocation7] sm:$0x1] }
 0x40c   :  { %1029 = vst [vmem:[%s2196_s5] sm:$0x1] %v1028_v28 }
 0x40d   :  { %1809 = dma.done.wait [#allocation9], 128  }
 0x40e   :  { %1810 = vsyncadd [#allocation9], 4294967168 }
 0x40f   :  { %1811 = dma.done.wait [#allocation11], 256  }
 0x410   :  { %1812 = vsyncadd [#allocation11], 4294967040 }
 0x411   :  { %1813 = dma.done.wait [#allocation14], 128  }
 0x412   :  { %1814 = vsyncadd [#allocation14], 4294967168 }
 0x413   :  { %1066 = vsyncpa [#allocation9], 1 }
 0x414   :  { %1067 = vsyncpa [#allocation11], 1 }
 0x415   :  { %1068 = vsyncpa [#allocation14], 1 }

// kernel: tile.9
= control target key start
LH: loop header
LB: loop body
LE: loop exit
PB: predicated region body
PF: predicated region fallthrough
CT: control target
= control target key end

     0   :  { %vm6_vm0 = vcmask 1043458   ;;  %vm10_vm1 = vcmask 1045508   ;;  %s15_s6 = smov 3  ;;  %s18_s7 = smov 12  ;;  %vm12_vm2 = vcmask 64512   ;;  %vm29_vm3 = vcmask 1048512   ;;  %s578_s0 = inlined_call_operand.vmem [shape: f32[6,16,8], index: 0, kind: input, shape index: {}]   ;;  %s579_s1 = inlined_call_operand.vmem [shape: f32[6,128], index: 1, kind: output, shape index: {}]  }
   0x1   :  { %v269_v0 = vld [vmem:[%s578_s0 + $0xf] ss:$16 sm:%s15_s6]   ;;  %s23_s12 = smov 48  ;;  %s49_s15 = smov 3  ;;  %vm46_vm4 = vcmask 982912   ;;  %vm63_vm5 = vcmask 917312  }
   0x2   :  { %v270_v1 = vld [vmem:[%s578_s0 + $0xf] ss:$16 sm:%s18_s7]   ;;  %s52_s16 = smov 12  ;;  %v275_v5 = vld [vmem:[%s578_s0 + $0xd] ss:$16 sm:%s49_s15]   ;;  %s57_s21 = smov 48 }
   0x3   :  { %v21_v2 = vsel %vm6_vm0, %v270_v1, %v269_v0  ;;  %v271_v3 = vld [vmem:[%s578_s0 + $0xf] ss:$16 sm:%s23_s12]   ;;  %v276_v6 = vld [vmem:[%s578_s0 + $0xd] ss:$16 sm:%s52_s16]   ;;  %s329_s22 = smov 120   ;;  %s32_s25 = smov 3 }
   0x4   :  { %v26_v4 = vsel %vm10_vm1, %v271_v3, %v21_v2  ;;  %v55_v7 = vsel %vm6_vm0, %v276_v6, %v275_v5  ;;  %v277_v8 = vld [vmem:[%s578_s0 + $0xd] ss:$16 sm:%s57_s21]   ;;  %s35_s26 = smov 12  ;;  %v272_v10 = vld [vmem:[%s578_s0 + $0xe] ss:$16 sm:%s32_s25]   ;;  %s40_s2 = smov 48 }
   0x5   :  { %27 = vrot.lane.b32.xlu0 %v26_v4, %s329_s22  ;;  %v60_v9 = vsel %vm10_vm1, %v277_v8, %v55_v7  ;;  %v273_v11 = vld [vmem:[%s578_s0 + $0xe] ss:$16 sm:%s35_s26]   ;;  %s330_s3 = smov 104   ;;  %s66_s6 = smov 3  ;;  %vm80_vm6 = vcmask 851712   ;;  %vm97_vm7 = vcmask 786112  }
   0x6   :  { %61 = vrot.lane.b32.xlu1 %v60_v9, %s330_s3  ;;  %v38_v12 = vsel %vm6_vm0, %v273_v11, %v272_v10  ;;  %v274_v13 = vld [vmem:[%s578_s0 + $0xe] ss:$16 sm:%s40_s2]   ;;  %s69_s7 = smov 12  ;;  %s74_s12 = smov 48  ;;  %vm114_vm8 = vcmask 720512   ;;  %vm131_vm9 = vcmask 654912  }
   0x7   :  { %v43_v14 = vsel %vm10_vm1, %v274_v13, %v38_v12  ;;  %v278_v15 = vld [vmem:[%s578_s0 + $0xc] ss:$16 sm:%s66_s6]   ;;  %s331_s13 = smov 112   ;;  %s83_s16 = smov 3  ;;  %vm148_vm10 = vcmask 589312   ;;  %vm165_vm11 = vcmask 523712  }
   0x8   :  { %v279_v16 = vld [vmem:[%s578_s0 + $0xc] ss:$16 sm:%s69_s7]   ;;  %s86_s17 = smov 12  ;;  %v281_v20 = vld [vmem:[%s578_s0 + $0xb] ss:$16 sm:%s83_s16]   ;;  %s91_s22 = smov 48 }
   0x9   :  { %44 = vrot.lane.b32.xlu0 %v43_v14, %s331_s13  ;;  %v72_v17 = vsel %vm6_vm0, %v279_v16, %v278_v15  ;;  %v280_v18 = vld [vmem:[%s578_s0 + $0xc] ss:$16 sm:%s74_s12]   ;;  %s332_s23 = smov 96   ;;  %s100_s26 = smov 3  ;;  %vm182_vm12 = vcmask 458112   ;;  %vm199_vm13 = vcmask 392512  }
   0xa   :  { %v77_v19 = vsel %vm10_vm1, %v280_v18, %v72_v17  ;;  %v282_v21 = vld [vmem:[%s578_s0 + $0xb] ss:$16 sm:%s86_s17]   ;;  %s103_s27 = smov 12  ;;  %v284_v25 = vld [vmem:[%s578_s0 + $0xa] ss:$16 sm:%s100_s26]   ;;  %s108_s3 = smov 48 }
   0xb   :  { %78 = vrot.lane.b32.xlu1 %v77_v19, %s332_s23  ;;  %v89_v22 = vsel %vm6_vm0, %v282_v21, %v281_v20  ;;  %v283_v23 = vld [vmem:[%s578_s0 + $0xb] ss:$16 sm:%s91_s22]   ;;  %s333_s4 = smov 88   ;;  %s117_s7 = smov 3  ;;  %vm216_vm14 = vcmask 326912   ;;  %vm233_vm15 = vcmask 261312  }
   0xc   :  { %v94_v24 = vsel %vm10_vm1, %v283_v23, %v89_v22  ;;  %v285_v26 = vld [vmem:[%s578_s0 + $0xa] ss:$16 sm:%s103_s27]   ;;  %s120_s8 = smov 12  ;;  %v287_v30 = vld [vmem:[%s578_s0 + $0x9] ss:$16 sm:%s117_s7]   ;;  %s125_s13 = smov 48 }
   0xd   :  { %95 = vrot.lane.b32.xlu0 %v94_v24, %s333_s4  ;;  %v106_v27 = vsel %vm6_vm0, %v285_v26, %v284_v25  ;;  %v286_v28 = vld [vmem:[%s578_s0 + $0xa] ss:$16 sm:%s108_s3]   ;;  %s334_s14 = smov 80   ;;  %s134_s17 = smov 3 }
   0xe   :  { %v111_v29 = vsel %vm10_vm1, %v286_v28, %v106_v27  ;;  %v288_v31 = vld [vmem:[%s578_s0 + $0x9] ss:$16 sm:%s120_s8]   ;;  %s137_s18 = smov 12  ;;  %v290_v35 = vld [vmem:[%s578_s0 + $0x8] ss:$16 sm:%s134_s17]   ;;  %s142_s23 = smov 48 }
   0xf   :  { %112 = vrot.lane.b32.xlu1 %v111_v29, %s334_s14  ;;  %v123_v32 = vsel %vm6_vm0, %v288_v31, %v287_v30  ;;  %v289_v33 = vld [vmem:[%s578_s0 + $0x9] ss:$16 sm:%s125_s13]   ;;  %s335_s24 = smov 72   ;;  %s151_s27 = smov 3 }
  0x10   :  { %v128_v34 = vsel %vm10_vm1, %v289_v33, %v123_v32  ;;  %v291_v36 = vld [vmem:[%s578_s0 + $0x8] ss:$16 sm:%s137_s18]   ;;  %s154_s28 = smov 12  ;;  %v293_v40 = vld [vmem:[%s578_s0 + $0x7] ss:$16 sm:%s151_s27]   ;;  %s159_s4 = smov 48 }
  0x11   :  { %129 = vrot.lane.b32.xlu0 %v128_v34, %s335_s24  ;;  %v140_v37 = vsel %vm6_vm0, %v291_v36, %v290_v35  ;;  %v292_v38 = vld [vmem:[%s578_s0 + $0x8] ss:$16 sm:%s142_s23]   ;;  %s336_s5 = smov 64   ;;  %s168_s8 = smov 3 }
  0x12   :  { %v145_v39 = vsel %vm10_vm1, %v292_v38, %v140_v37  ;;  %v294_v41 = vld [vmem:[%s578_s0 + $0x7] ss:$16 sm:%s154_s28]   ;;  %s171_s9 = smov 12  ;;  %v296_v45 = vld [vmem:[%s578_s0 + $0x6] ss:$16 sm:%s168_s8]   ;;  %s176_s14 = smov 48 }
  0x13   :  { %146 = vrot.lane.b32.xlu1 %v145_v39, %s336_s5  ;;  %v157_v42 = vsel %vm6_vm0, %v294_v41, %v293_v40  ;;  %v295_v43 = vld [vmem:[%s578_s0 + $0x7] ss:$16 sm:%s159_s4]   ;;  %s337_s15 = smov 56   ;;  %s185_s18 = smov 3 }
  0x14   :  { %v162_v44 = vsel %vm10_vm1, %v295_v43, %v157_v42  ;;  %v297_v46 = vld [vmem:[%s578_s0 + $0x6] ss:$16 sm:%s171_s9]   ;;  %s188_s19 = smov 12  ;;  %v299_v50 = vld [vmem:[%s578_s0 + $0x5] ss:$16 sm:%s185_s18]   ;;  %s193_s24 = smov 48 }
  0x15   :  { %163 = vrot.lane.b32.xlu0 %v162_v44, %s337_s15  ;;  %v174_v47 = vsel %vm6_vm0, %v297_v46, %v296_v45  ;;  %v298_v48 = vld [vmem:[%s578_s0 + $0x6] ss:$16 sm:%s176_s14]   ;;  %s338_s25 = smov 48   ;;  %s202_s28 = smov 3 }
  0x16   :  { %v179_v49 = vsel %vm10_vm1, %v298_v48, %v174_v47  ;;  %v300_v51 = vld [vmem:[%s578_s0 + $0x5] ss:$16 sm:%s188_s19]   ;;  %s205_s29 = smov 12  ;;  %v302_v55 = vld [vmem:[%s578_s0 + $0x4] ss:$16 sm:%s202_s28]   ;;  %s210_s5 = smov 48 }
  0x17   :  { %180 = vrot.lane.b32.xlu1 %v179_v49, %s338_s25  ;;  %v191_v52 = vsel %vm6_vm0, %v300_v51, %v299_v50  ;;  %v301_v53 = vld [vmem:[%s578_s0 + $0x5] ss:$16 sm:%s193_s24]   ;;  %s339_s6 = smov 40   ;;  %s219_s9 = smov 3 }
  0x18   :  { %v196_v54 = vsel %vm10_vm1, %v301_v53, %v191_v52  ;;  %v303_v56 = vld [vmem:[%s578_s0 + $0x4] ss:$16 sm:%s205_s29]   ;;  %s222_s10 = smov 12  ;;  %v305_v60 = vld [vmem:[%s578_s0 + $0x3] ss:$16 sm:%s219_s9]   ;;  %s227_s15 = smov 48 }
  0x19   :  { %197 = vrot.lane.b32.xlu0 %v196_v54, %s339_s6  ;;  %v208_v57 = vsel %vm6_vm0, %v303_v56, %v302_v55  ;;  %v304_v58 = vld [vmem:[%s578_s0 + $0x4] ss:$16 sm:%s210_s5]   ;;  %s340_s16 = smov 32   ;;  %s236_s19 = smov 3 }
  0x1a   :  { %v213_v59 = vsel %vm10_vm1, %v304_v58, %v208_v57  ;;  %v306_v61 = vld [vmem:[%s578_s0 + $0x3] ss:$16 sm:%s222_s10]   ;;  %s239_s20 = smov 12  ;;  %v308_v1 = vld [vmem:[%s578_s0 + $0x2] ss:$16 sm:%s236_s19]   ;;  %s244_s25 = smov 48 }
  0x1b   :  { %214 = vrot.lane.b32.xlu1 %v213_v59, %s340_s16  ;;  %v225_v62 = vsel %vm6_vm0, %v306_v61, %v305_v60  ;;  %v307_v63 = vld [vmem:[%s578_s0 + $0x3] ss:$16 sm:%s227_s15]   ;;  %s341_s26 = smov 24   ;;  %s253_s29 = smov 3 }
  0x1c   :  { %v230_v0 = vsel %vm10_vm1, %v307_v63, %v225_v62  ;;  %v309_v2 = vld [vmem:[%s578_s0 + $0x2] ss:$16 sm:%s239_s20]   ;;  %s256_s30 = smov 12  ;;  %v311_v6 = vld [vmem:[%s578_s0 + $0x1] ss:$16 sm:%s253_s29]   ;;  %s261_s6 = smov 48 }
  0x1d   :  { %231 = vrot.lane.b32.xlu0 %v230_v0, %s341_s26  ;;  %v242_v3 = vsel %vm6_vm0, %v309_v2, %v308_v1  ;;  %v310_v4 = vld [vmem:[%s578_s0 + $0x2] ss:$16 sm:%s244_s25]   ;;  %s342_s7 = smov 16   ;;  %s2_s10 = smov 3 }
  0x1e   :  { %v247_v5 = vsel %vm10_vm1, %v310_v4, %v242_v3  ;;  %v312_v7 = vld [vmem:[%s578_s0 + $0x1] ss:$16 sm:%s256_s30]   ;;  %s4_s11 = smov 12  ;;  %s8_s12 = smov 48  ;;  %v3_v11 = vld [vmem:[%s578_s0] ss:$16 sm:%s2_s10]  }
  0x1f   :  { %248 = vrot.lane.b32.xlu1 %v247_v5, %s342_s7  ;;  %v259_v8 = vsel %vm6_vm0, %v312_v7, %v311_v6  ;;  %v313_v9 = vld [vmem:[%s578_s0 + $0x1] ss:$16 sm:%s261_s6]   ;;  %s343_s17 = smov 8  }
  0x20   :  { %v264_v10 = vsel %vm10_vm1, %v313_v9, %v259_v8  ;;  %v5_v12 = vld [vmem:[%s578_s0] ss:$16 sm:%s4_s11]  }
  0x21   :  { %265 = vrot.lane.b32.xlu0 %v264_v10, %s343_s17  ;;  %v7_v13 = vsel %vm6_vm0, %v5_v12, %v3_v11  ;;  %v9_v14 = vld [vmem:[%s578_s0] ss:$16 sm:%s8_s12]   ;;  %vm250_vm0 = vcmask 195712  }
  0x22   :  { %v11_v15 = vsel %vm10_vm1, %v9_v14, %v7_v13  ;;  %vm267_vm1 = vcmask 130112  }
  0x23   :  { %13 = vst.msk [vmem:[%s579_s1] sm:$0x3f] %vm12_vm2, %v11_v15  }
  0x77   :  { %v28_v16 = vpop.permute.xlu0 %27  }
  0x78   :  { %30 = vst.msk [vmem:[%s579_s1] sm:$0x3f] %vm29_vm3, %v28_v16   ;;  %v62_v17 = vpop.permute.xlu1 %61  }
  0x7b   :  { %v45_v18 = vpop.permute.xlu0 %44  }
  0x7c   :  { %47 = vst.msk [vmem:[%s579_s1] sm:$0x3f] %vm46_vm4, %v45_v18  }
  0x7d   :  { %64 = vst.msk [vmem:[%s579_s1] sm:$0x3f] %vm63_vm5, %v62_v17   ;;  %v79_v19 = vpop.permute.xlu1 %78  }
  0x7e   :  { %81 = vst.msk [vmem:[%s579_s1] sm:$0x3f] %vm80_vm6, %v79_v19  }
  0x7f   :  { %v96_v20 = vpop.permute.xlu0 %95  }
  0x80   :  { %98 = vst.msk [vmem:[%s579_s1] sm:$0x3f] %vm97_vm7, %v96_v20  }
  0x81   :  { %v113_v21 = vpop.permute.xlu1 %112  }
  0x82   :  { %115 = vst.msk [vmem:[%s579_s1] sm:$0x3f] %vm114_vm8, %v113_v21  }
  0x83   :  { %v130_v22 = vpop.permute.xlu0 %129  }
  0x84   :  { %132 = vst.msk [vmem:[%s579_s1] sm:$0x3f] %vm131_vm9, %v130_v22  }
  0x85   :  { %v147_v23 = vpop.permute.xlu1 %146  }
  0x86   :  { %149 = vst.msk [vmem:[%s579_s1] sm:$0x3f] %vm148_vm10, %v147_v23  }
  0x87   :  { %v164_v24 = vpop.permute.xlu0 %163  }
  0x88   :  { %166 = vst.msk [vmem:[%s579_s1] sm:$0x3f] %vm165_vm11, %v164_v24  }
  0x89   :  { %v181_v25 = vpop.permute.xlu1 %180  }
  0x8a   :  { %183 = vst.msk [vmem:[%s579_s1] sm:$0x3f] %vm182_vm12, %v181_v25  }
  0x8b   :  { %v198_v26 = vpop.permute.xlu0 %197  }
  0x8c   :  { %200 = vst.msk [vmem:[%s579_s1] sm:$0x3f] %vm199_vm13, %v198_v26  }
  0x8d   :  { %v215_v27 = vpop.permute.xlu1 %214  }
  0x8e   :  { %217 = vst.msk [vmem:[%s579_s1] sm:$0x3f] %vm216_vm14, %v215_v27  }
  0x8f   :  { %v232_v28 = vpop.permute.xlu0 %231  }
  0x90   :  { %234 = vst.msk [vmem:[%s579_s1] sm:$0x3f] %vm233_vm15, %v232_v28  }
  0x91   :  { %v249_v29 = vpop.permute.xlu1 %248  }
  0x92   :  { %251 = vst.msk [vmem:[%s579_s1] sm:$0x3f] %vm250_vm0, %v249_v29  }
  0x93   :  { %v266_v30 = vpop.permute.xlu0 %265  }
  0x94   :  { %268 = vst.msk [vmem:[%s579_s1] sm:$0x3f] %vm267_vm1, %v266_v30  }

// kernel: tpr_encoder_forward.1
= control target key start
LH: loop header
LB: loop body
LE: loop exit
PB: predicated region body
PF: predicated region fallthrough
CT: control target
= control target key end

     0   :  { %16 = vsyncpa [#allocation4], 0  ;;  %s2518_s0 = inlined_call_operand.vmem [shape: s32[16,6], index: 0, kind: input, shape index: {}]   ;;  %s2519_s1 = inlined_call_operand.vmem [shape: bf16[10,128], index: 1, kind: input, shape index: {}]   ;;  %s2520_s2 = inlined_call_operand.vmem [shape: bf16[10,128], index: 2, kind: input, shape index: {}]   ;;  %s2521_s3 = inlined_call_operand.vmem [shape: bf16[10,128], index: 3, kind: input, shape index: {}]   ;;  %s2522_s4 = inlined_call_operand.vmem [shape: f32[6,128], index: 4, kind: input, shape index: {}]   ;;  %s2523_s5 = inlined_call_operand.vmem [shape: f32[6,8], index: 5, kind: input, shape index: {}]   ;;  %s2524_s6 = inlined_call_operand.vmem [shape: f32[10,16], index: 6, kind: input, shape index: {}]   ;;  %s2525_s7 = inlined_call_operand.vmem [shape: f32[16,768], index: 7, kind: output, shape index: {0}]   ;;  %s2526_s8 = inlined_call_operand.hbm [shape: f32[16,128], index: 8, kind: output, shape index: {1}]   ;;  %s2527_s9 = inlined_call_operand.hbm [shape: f32[1,1], index: 9, kind: output, shape index: {2}]   ;;  %s2528_s10 = inlined_call_operand.hbm [shape: f32[1,1], index: 10, kind: output, shape index: {3}]  }
   0x1   :  { %17 = vsyncpa [#allocation6], 0  ;;  %s2293_s13 = smov 0   ;;  %s2295_s14 = smov 0  }
   0x2   :  { %s2297_s15 = smov 0   ;;  %s2299_s16 = smov 0  }
   0x3   :  { %s2301_s17 = smov 0  }
   0x4 LB: > { %s1817_s18 = sadd.s32 4294967295, %s2227_s17   ;;  %s32_s19 = sadd.s32 1, %s2223_s16  ;;  %s2227_s17 = sphi %s2301_s17, %s23_s17   ;;  %s2223_s16 = sphi %s2299_s16, %s2536_s16   ;;  %s2219_s15 = sphi %s2297_s15, %s2535_s15   ;;  %s2215_s14 = sphi %s2295_s14, %s2534_s14   ;;  %s2211_s13 = sphi %s2293_s13, %s2533_s13  }
   0x5   : > { %p33_p0 = scmp.ge.s32.totalorder %s32_s19, 6  ;;  %s196_s20 = sadd.s32 1, %s2215_s14 }
   0x6   : > { %p206_p1 = scmp.ne.s32.totalorder %s2215_s14, %s2211_s13  ;;  %p2323_p2 = scmp.eq.s32.totalorder %s1817_s18, 5 }
   0x7   : > { %s2538_s19 = smov (%p33_p0, %s32_s19), 0  ;;  %p1821_p4 = scmp.ge.s32.totalorder %s2227_s17, 1 }
   0x8   : > { %p2331_p3 = por %p2323_p2, %p206_p1  ;;  %s192_s23 = ssub.s32 %s2223_s16, %s2538_s19 }
   0x9   : > { %p326_p5 = scmp.lt.s32.totalorder %s2227_s17, 7  ;;  %p194_p6 = scmp.eq.s32.totalorder %s192_s23, 0 }
   0xb   : > { %p327_p7 = pnand %p1821_p4, %p326_p5 }
   0xc   : > { %s2340_s24 = scalar_select %p194_p6, %s2215_s14, %s196_s20  }
   0xd   : > { %330 = sbr.rel (%p327_p7) target bundleno = 955 (0x3bb), region = 48  ;;  %v372_v0 = vld [vmem:[%s2518_s0] sm:$0xff] (!%p327_p7)  ;;  %v374_v1 = vlaneseq (!%p327_p7)  ;;  %v373_v2 = vld [vmem:[%s2518_s0 + $0x8] sm:$0xff] (!%p327_p7)  ;;  %v376_v3 = vstv (!%p327_p7), %s2219_s15  ;;  %v2229_v4 = vmov (!%p327_p7), 0.0   ;;  %vm380_vm0 = vcmask (!%p327_p7), 48128   ;;  %s354_s26 = sand.u32 (!%p327_p7), 1, %s2211_s13  }
   0xe   : > { %1895 = vmatprep.subr.bf16.mxu0 (!%p327_p7), %v2229_v4  ;;  %1889 = vmatprep.subr.bf16.mxu1 (!%p327_p7), %v2229_v4  ;;  %v2096_v20 = vld [vmem:[%s2519_s1] sm:$0x1f] (!%p327_p7)   ;;  %vm427_vm3 = vcmask (!%p327_p7), 1044480   ;;  %vm2230_vm4 = vmmov (!%p327_p7), 0   ;;  %vm423_vm7 = vcmask (!%p327_p7), 80896   ;;  %vm581_vm8 = vcmask (!%p327_p7), 1045504  }
   0xf   : > { %v2349_v5 = vand.u32 (!%p327_p7), 127, %v374_v1  ;;  %v2351_v6 = vshrl.u32 (!%p327_p7), %v374_v1, 7  ;;  %v2097_v21 = vld [vmem:[%s2520_s2] sm:$0x1f] (!%p327_p7)   ;;  %v478_v22 = vsel (!%p327_p7), %vm427_vm3, %v2096_v20, 0  ;;  %1891 = vmatprep.mubr.msk.bf16.mxu1 (!%p327_p7), %vm2230_vm4, %v2229_v4  ;;  %1897 = vmatprep.mubr.msk.bf16.mxu0 (!%p327_p7), %vm2230_vm4, %v2229_v4  ;;  %s1822_s27 = sshll.u32 (!%p327_p7), %s354_s26, 4 }
  0x10   : > { %v429_v23 = vsel (!%p327_p7), %vm427_vm3, %v2097_v21, 0  ;;  %1896 = vmatpush3.bf16.msra.mxu0 (!%p327_p7), %v478_v22  ;;  %v2098_v36 = vld [vmem:[%s2521_s3] sm:$0x1f] (!%p327_p7)   ;;  %s2386_s28 = scalar_lea.vmem (!%p327_p7), [#allocation2], %s1822_s27  ;;  %p1832_p8 = scmp.ne.s32.totalorder (!%p327_p7), %s2219_s15, 0 }
  0x11   : > { %vm377_vm1 = vcmp.eq.s32.totalorder (!%p327_p7), %v2349_v5, %v376_v3  ;;  %vm2355_vm2 = vcmp.eq.s32.totalorder (!%p327_p7), %v2351_v6, %v376_v3  ;;  %1890 = vmatpush3.bf16.msra.mxu1 (!%p327_p7), %v429_v23  ;;  %1901 = vmatprep.subr.bf16.mxu0 (!%p327_p7), %v2229_v4  ;;  %v529_v40 = vsel (!%p327_p7), %vm427_vm3, %v2098_v36, 0  ;;  %v579_v42 = vld [vmem:[%s2522_s4] sm:$0x3f] (!%p327_p7) }
  0x12   : > { %v378_v8 = vsel (!%p327_p7), %vm377_vm1, %v372_v0, 0  ;;  %v379_v9 = vsel (!%p327_p7), %vm377_vm1, %v373_v2, 0  ;;  %v1831_v41 = vsel (!%p327_p7), %vm2355_vm2, 1.0, %v2229_v4 }
  0x13   : > { %v381_v10 = vsel (!%p327_p7), %vm380_vm0, %v378_v8, 0  ;;  %v394_v11 = vsel (!%p327_p7), %vm380_vm0, %v379_v9, 0  ;;  %v580_v43 = vmul.f32 (!%p327_p7), %v1831_v41, %v579_v42 }
  0x14   : > { %v383_v12 = vshrl.u32 %v381_v10, 16  ;;  %v382_v13 = vand.u32 65535, %v381_v10  ;;  %v396_v14 = vshrl.u32 %v394_v11, 16  ;;  %v395_v15 = vand.u32 65535, %v394_v11 }
  0x15   : > { %v582_v44 = vsel %vm581_vm8, %v580_v43, 0.0 }
  0x16   : > { %v385_v16 = vcvt.s32.f32 %v383_v12  ;;  %v384_v17 = vcvt.s32.f32 %v382_v13  ;;  %v398_v18 = vcvt.s32.f32 %v396_v14  ;;  %v397_v19 = vcvt.s32.f32 %v395_v15 }
  0x17   : > { %v583_v45 = vrot.slane %v582_v44, 4 }
  0x18   : > { %388 = vadd.xlane.f32.xlu0 %v385_v16  ;;  %386 = vadd.xlane.f32.xlu1 %v384_v17 }
  0x19   : > { %v584_v46 = vadd.f32 %v583_v45, %v582_v44 }
  0x1b   : > { %v585_v47 = vrot.slane %v584_v46, 2 }
  0x1c   : > { %401 = vadd.xlane.f32.xlu0 %v398_v18  ;;  %399 = vadd.xlane.f32.xlu1 %v397_v19 }
  0x1d   : > { %v586_v52 = vadd.f32 %v585_v47, %v584_v46 }
  0x1f   : > { %v587_v53 = vrot.slane %v586_v52, 1 }
  0x21   : > { %v588_v54 = vadd.f32 %v587_v53, %v586_v52 }
  0xa5   : > { %v389_v24 = vpop.xlane.xlu0 %388  ;;  %v387_v25 = vpop.xlane.xlu1 %386 }
  0xa6   : > { %v391_v26 = vcvt.f32.s32 %v389_v24  ;;  %v390_v27 = vcvt.f32.s32 %v387_v25 }
  0xa8   : > { %v392_v28 = vshll.u32 %v391_v26, 16 }
  0xa9   : > { %v402_v29 = vpop.xlane.xlu0 %401  ;;  %v400_v30 = vpop.xlane.xlu1 %399 }
  0xaa   : > { %v393_v31 = vadd.s32 %v392_v28, %v390_v27  ;;  %v404_v32 = vcvt.f32.s32 %v402_v29  ;;  %v403_v33 = vcvt.f32.s32 %v400_v30 }
  0xac   : > { %v405_v34 = vshll.u32 %v404_v32, 16  ;;  %vm407_vm5 = vcmp.eq.s32.totalorder %v393_v31, %v2349_v5 }
  0xad   : > { %v1823_v37 = vsel %vm407_vm5, 1.0, %v2229_v4 }
  0xae   : > { %v406_v35 = vadd.s32 %v405_v34, %v403_v33 }
  0xb0   : > { %vm408_vm6 = vcmp.eq.s32.totalorder %v406_v35, %v2349_v5 }
  0xb1   : > { %v1824_v38 = vsel %vm408_vm6, 1.0, %v2229_v4 }
  0xb2   : > { %v413_v39 = vpack.c.bf16 %v1824_v38, %v1823_v37 }
  0xb4   : > { %1892 = vmatmul.mubr.msk.bf16.vlgmr.msra.gmra.mrb[0].mxu1 %vm423_vm7, %v413_v39  ;;  %1898 = vmatmul.mubr.msk.bf16.vlgmr.msra.gmra.mrb[0].mxu0 %vm423_vm7, %v413_v39 }
  0xb5   : > { %1902 = vmatpush3.bf16.msra.mxu0 %v529_v40  ;;  %1903 = vmatprep.mubr.msk.bf16.mxu0 %vm2230_vm4, %v2229_v4 }
  0xc0   : > { %1904 = vmatmul.mubr.msk.bf16.vlgmr.msra.gmra.mrb[0].mxu0 %vm423_vm7, %v413_v39 }
 0x187   : > { %v465_v48 = vpop.f32.mrb[0].mxu1 }
 0x188   : > { %v1893_v49 = vpop.f32.mrb[1].mxu1 }
 0x189   : > { %v468_v50 = vpop.f32.mrb[2].mxu1 }
 0x18a   : > { %v1894_v51 = vpop.f32.mrb[3].mxu1 }
 0x193   : > { %v565_v55 = vpop.f32.mrb[0].mxu0 }
 0x194   : > { %v2003_v56 = vadd.f32 %v565_v55, %v465_v48  ;;  %v1905_v57 = vpop.f32.mrb[1].mxu0  ;;  %596 = sbr.rel (%p1832_p8) target bundleno = 411 (0x19b), region = 52 }
 0x195   : > { %v568_v58 = vpop.f32.mrb[2].mxu0 }
 0x196   : > { %v589_v59 = vmul.f32 %v2003_v56, %v588_v54  ;;  %v2004_v60 = vadd.f32 %v568_v58, %v468_v50  ;;  %v1906_v61 = vpop.f32.mrb[3].mxu0 }
 0x198   : > { %591 = vst [vmem:[%s2386_s28] sm:$0xff] %v589_v59  ;;  %v590_v62 = vmul.f32 %v2004_v60, %v588_v54  ;;  %597 = vst [vmem:[#allocation3] sm:$0xff] (!%p1832_p8), %v589_v59 }
 0x19a   : > { %592 = vst [vmem:[%s2386_s28 + $0x8] sm:$0xff] %v590_v62  ;;  %598 = vst [vmem:[#allocation3 + $0x8] sm:$0xff] (!%p1832_p8), %v590_v62 }
 0x19b PF: > { %p1833_p9 = scmp.le.s32.totalorder %s2219_s15, 0 }
 0x19d   : > { %602 = sbr.rel (%p1833_p9) target bundleno = 421 (0x1a5), region = 56 }
 0x19f   : > { %v603_v63 = vld [vmem:[#allocation3] sm:$0xff] (!%p1833_p9) }
 0x1a0   : > { %v605_v1 = vadd.f32 (!%p1833_p9), %v603_v63, %v589_v59 }
 0x1a1   : > { %v604_v0 = vld [vmem:[#allocation3 + $0x8] sm:$0xff] (!%p1833_p9) }
 0x1a2   : > { %v606_v2 = vadd.f32 (!%p1833_p9), %v604_v0, %v590_v62  ;;  %607 = vst [vmem:[#allocation3] sm:$0xff] (!%p1833_p9), %v605_v1 }
 0x1a4   : > { %608 = vst [vmem:[#allocation3 + $0x8] sm:$0xff] %v606_v2 }
 0x1a5 PF: > { %611 = sbr.rel (%p1832_p8) target bundleno = 876 (0x36c), region = 60  ;;  %v612_v3 = vld [vmem:[%s2523_s5] sm:$0x3f] (!%p1832_p8)  ;;  %vm613_vm9 = vcmask (!%p1832_p8), 64512   ;;  %v2231_v7 = vmov (!%p1832_p8), 0.0   ;;  %vm2232_vm10 = vmmov (!%p1832_p8), 0   ;;  %vm1063_vm12 = vcmp.eq.s32.totalorder (!%p1832_p8), %v2351_v6, %v2349_v5 }
 0x1a6   : > { %v1088_v4 = vld [vmem:[%s2524_s6] sm:$0xff] (!%p1832_p8)  ;;  %1907 = vmatprep.subr.mxu0 (!%p1832_p8), %v2231_v7  ;;  %v615_v8 = vsel (!%p1832_p8), %vm613_vm9, %v612_v3, 0  ;;  %1909 = vmatprep.mubr.msk.f32.mxu0 (!%p1832_p8), %vm2232_vm10, %v2231_v7  ;;  %v1089_v9 = vld [vmem:[%s2524_s6 + $0x8] sm:$0x3] (!%p1832_p8)  ;;  %vm1090_vm11 = vcmask (!%p1832_p8), 130048   ;;  %v1835_v31 = vsel (!%p1832_p8), %vm1063_vm12, 1.0, %v2231_v7 }
 0x1a7   : > { %v618_v10 = vand.u32 (!%p1832_p8), 4294901760, %v615_v8  ;;  %v1092_v11 = vsel (!%p1832_p8), %vm1090_vm11, %v1088_v4, 0  ;;  %v1095_v12 = vsel (!%p1832_p8), %vm1090_vm11, %v1089_v9, 0  ;;  %v1599_v35 = vadd.s32 (!%p1832_p8), 8, %v2351_v6 }
 0x1a8   : > { %v1098_v13 = vand.u32 (!%p1832_p8), 4294901760, %v1092_v11  ;;  %v1101_v14 = vand.u32 (!%p1832_p8), 4294901760, %v1095_v12  ;;  %vm1068_vm13 = vcmask (!%p1832_p8), 46080   ;;  %vm1610_vm15 = vcmask (!%p1832_p8), 74752  }
 0x1a9   : > { %1908 = vmatpush3.xpose.msra.mxu0 (!%p1832_p8), %v618_v10  ;;  %v684_v15 = vsub.f32 (!%p1832_p8), %v615_v8, %v618_v10  ;;  %vm1600_vm14 = vcmp.eq.s32.totalorder (!%p1832_p8), %v1599_v35, %v2349_v5  ;;  %vm1614_vm0 = vcmask (!%p1832_p8), 1041408   ;;  %vm1086_vm1 = vcmask (!%p1832_p8), 0  }
 0x1aa   : > { %1912 = vmatprep.subr.mxu0 (!%p1832_p8), %v2231_v7  ;;  %v1165_v16 = vsub.f32 (!%p1832_p8), %v1092_v11, %v1098_v13  ;;  %v1175_v17 = vsub.f32 (!%p1832_p8), %v1095_v12, %v1101_v14  ;;  %1948 = vmatprep.mubr.f32.mxu1 (!%p1832_p8), %v1098_v13  ;;  %v1979_v29 = vpack.c.bf16 (!%p1832_p8), %v1101_v14, %v1098_v13  ;;  %v1836_v41 = vsel (!%p1832_p8), %vm1600_vm14, 1.0, %v2231_v7 }
 0x1ab   : > { %v685_v18 = vand.u32 (!%p1832_p8), 4294901760, %v684_v15 }
 0x1ac   : > { %v1166_v19 = vand.u32 4294901760, %v1165_v16  ;;  %v1176_v20 = vand.u32 4294901760, %v1175_v17  ;;  %v1987_v28 = vpack.c.bf16 %v1175_v17, %v1165_v16 }
 0x1ad   : > { %v686_v21 = vsub.f32 %v684_v15, %v685_v18 }
 0x1ae   : > { %v1167_v22 = vsub.f32 %v1165_v16, %v1166_v19  ;;  %v1177_v23 = vsub.f32 %v1175_v17, %v1176_v20  ;;  %v1995_v30 = vpack.c.bf16 %v1176_v20, %v1166_v19 }
 0x1af   : > { %v687_v24 = vand.u32 4294901760, %v686_v21 }
 0x1b0   : > { %v1168_v25 = vand.u32 4294901760, %v1167_v22  ;;  %v1178_v26 = vand.u32 4294901760, %v1177_v23 }
 0x1b1   : > { %1910 = vmatmul.mubr.f32.vlgmr.msra.gmra.mrb[0].mxu0 %v687_v24 }
 0x1b2   : > { %1913 = vmatpush3.xpose.msra.mxu0 %v687_v24  ;;  %v1983_v27 = vpack.c.bf16 %v1178_v26, %v1168_v25  ;;  %1914 = vmatprep.mubr.msk.f32.mxu0 %vm2232_vm10, %v2231_v7 }
 0x1b3   : > { %1917 = vmatprep.subr.mxu0 %v2231_v7 }
 0x1b4   : > { %1984 = vmatprep.subr.bf16.mxu1 %v1983_v27 }
 0x1b5   : > { %1986 = vmatpush3.bf16.xpose.msra.mxu1 %v1983_v27 }
 0x1b6   : > { %1988 = vmatprep.subr.bf16.mxu1 %v1987_v28 }
 0x1b9   : > { %1915 = vmatmul.mubr.f32.vlgmr.msra.gmra.mrb[0].mxu0 %v618_v10 }
 0x1ba   : > { %1918 = vmatpush3.xpose.msra.mxu0 %v684_v15  ;;  %1919 = vmatprep.mubr.msk.f32.mxu0 %vm2232_vm10, %v2231_v7 }
 0x1bb   : > { %1922 = vmatprep.subr.mxu0 %v2231_v7 }
 0x1bc   : > { %1949 = vmatmul.mubr.f32.vlgmr.msra.gmra.mrb[0].mxu1 %v1101_v14 }
 0x1bd   : > { %1990 = vmatpush3.bf16.xpose.msra.mxu1 %v1987_v28  ;;  %1955 = vmatprep.mubr.f32.mxu1 %v1165_v16 }
 0x1be   : > { %1992 = vmatprep.subr.bf16.mxu1 %v1979_v29 }
 0x1c1   : > { %1920 = vmatmul.mubr.f32.vlgmr.msra.gmra.mrb[0].mxu0 %v684_v15 }
 0x1c2   : > { %1923 = vmatpush3.xpose.msra.mxu0 %v618_v10  ;;  %1924 = vmatprep.mubr.msk.f32.mxu0 %vm2232_vm10, %v2231_v7 }
 0x1c3   : > { %1927 = vmatprep.subr.mxu0 %v2231_v7 }
 0x1c4   : > { %1956 = vmatmul.mubr.f32.vlgmr.msra.gmra.mrb[0].mxu1 %v1175_v17 }
 0x1c5   : > { %1994 = vmatpush3.bf16.xpose.msra.mxu1 %v1979_v29  ;;  %1962 = vmatprep.mubr.f32.mxu1 %v1166_v19 }
 0x1c6   : > { %1996 = vmatprep.subr.bf16.mxu1 %v1995_v30 }
 0x1c9   : > { %1925 = vmatmul.mubr.f32.vlgmr.msra.gmra.mrb[0].mxu0 %v685_v18 }
 0x1ca   : > { %1928 = vmatpush3.xpose.msra.mxu0 %v685_v18  ;;  %1929 = vmatprep.mubr.msk.f32.mxu0 %vm2232_vm10, %v2231_v7 }
 0x1cb   : > { %1932 = vmatprep.subr.mxu0 %v2231_v7 }
 0x1cc   : > { %1963 = vmatmul.mubr.f32.vlgmr.msra.gmra.mrb[0].mxu1 %v1176_v20 }
 0x1cd   : > { %1998 = vmatpush3.bf16.xpose.msra.mxu1 %v1995_v30  ;;  %1969 = vmatprep.mubr.f32.mxu1 %v1098_v13 }
 0x1ce   : > { %2000 = vmatprep.subr.bf16.mxu1 %v1979_v29 }
 0x1d1   : > { %1930 = vmatmul.mubr.f32.vlgmr.msra.gmra.mrb[0].mxu0 %v618_v10 }
 0x1d2   : > { %1933 = vmatpush3.xpose.msra.mxu0 %v618_v10  ;;  %1934 = vmatprep.mubr.msk.f32.mxu0 %vm2232_vm10, %v2231_v7 }
 0x1d3   : > { %1980 = vmatprep.subr.bf16.mxu0 %v1979_v29 }
 0x1d4   : > { %1970 = vmatmul.mubr.f32.vlgmr.msra.gmra.mrb[0].mxu1 %v1101_v14 }
 0x1d5   : > { %2002 = vmatpush3.bf16.xpose.msra.mxu1 %v1979_v29  ;;  %1976 = vmatprep.mubr.f32.mxu1 %v1098_v13 }
 0x1d9   : > { %1935 = vmatmul.mubr.f32.vlgmr.msra.gmra.mrb[0].mxu0 %v618_v10 }
 0x1da   : > { %1982 = vmatpush3.bf16.xpose.msra.mxu0 %v1979_v29  ;;  %1941 = vmatprep.mubr.f32.mxu0 %v1168_v25 }
 0x1dc   : > { %1977 = vmatmul.mubr.f32.vlgmr.msra.gmra.mrb[0].mxu1 %v1101_v14 }
 0x1e1   : > { %1942 = vmatmul.mubr.f32.vlgmr.msra.gmra.mrb[2].mxu0 %v1178_v26 }
 0x2ac   : > { %v1059_v32 = vpop.f32.mrb[0].mxu0 }
 0x2ad   : > { %v1066_v33 = vsub.f32 %v1835_v31, %v1059_v32  ;;  %v1936_v34 = vpop.f32.mrb[1].mxu0 }
 0x2af   : > { %v1067_v36 = vmul.f32 %v1066_v33, %v1066_v33  ;;  %v1978_v37 = vpop.f32.mrb[0].mxu1 }
 0x2b0   : > { %v1589_v38 = vpop.f32.mrb[1].mxu1 }
 0x2b1   : > { %v1069_v39 = vsel %vm1068_vm13, %v1067_v36, 0.0 }
 0x2b2   : > { %1070 = vadd.xlane.f32.xlu1 %v1069_v39 }
 0x2b4   : > { %v1943_v40 = vpop.f32.mrb[2].mxu0 }
 0x2b5   : > { %v2009_v42 = vadd.f32 %v1978_v37, %v1943_v40  ;;  %v1170_v43 = vpop.f32.mrb[3].mxu0 }
 0x2b6   : > { %v2010_v44 = vadd.f32 %v1589_v38, %v1170_v43 }
 0x2b7   : > { %v1604_v45 = vsub.f32 %v1836_v41, %v2009_v42 }
 0x2b8   : > { %v1603_v46 = vsub.f32 %v1835_v31, %v2010_v44 }
 0x2b9   : > { %v1606_v47 = vmul.f32 %v1604_v45, %v1604_v45 }
 0x2ba   : > { %v1605_v6 = vmul.f32 %v1603_v46, %v1603_v46 }
 0x2bb   : > { %v1611_v48 = vsel %vm1610_vm15, %v1606_v47, 0.0 }
 0x2bc   : > { %1612 = vadd.xlane.f32.xlu0 %v1611_v48  ;;  %v1607_v49 = vsel %vm423_vm7, %v1605_v6, 0.0 }
 0x2c0   : > { %1608 = vadd.xlane.f32.xlu0 %v1607_v49 }
 0x33f   : > { %v1071_v50 = vpop.xlane.xlu1 %1070 }
 0x340   : > { %v1072_v5 = vsel %vm581_vm8, %v1071_v50, 0.0 }
 0x341   : > { %v1073_v51 = vrot.slane %v1072_v5, 4 }
 0x343   : > { %v1074_v52 = vadd.f32 %v1073_v51, %v1072_v5 }
 0x345   : > { %v1075_v53 = vrot.slane %v1074_v52, 2 }
 0x347   : > { %v1076_v54 = vadd.f32 %v1075_v53, %v1074_v52 }
 0x349   : > { %v1077_v55 = vrot.slane %v1076_v54, 1  ;;  %v1613_v56 = vpop.xlane.xlu0 %1612 }
 0x34a   : > { %v1615_v58 = vsel %vm1614_vm0, %v1613_v56, 0.0 }
 0x34b   : > { %v1078_v57 = vadd.f32 %v1077_v55, %v1076_v54 }
 0x34d   : > { %2099 = vrsqrt.f32 %v1078_v57  ;;  %v1609_v59 = vpop.xlane.xlu0 %1608  ;;  %vm1081_vm2 = vcmp.eq.f32.partialorder %v1078_v57, inf  ;;  %v1084_v4 = vand.u32 2147483648, %v1078_v57  ;;  %vm1083_vm3 = vcmp.eq.f32.partialorder %v1078_v57, 0.0 }
 0x34e   : > { %v1616_v60 = vadd.f32 %v1615_v58, %v1609_v59 }
 0x350   : > { %v1617_v61 = vrot.slane %v1616_v60, 4 }
 0x352   : > { %v1618_v62 = vadd.f32 %v1617_v61, %v1616_v60 }
 0x354   : > { %v1619_v63 = vrot.slane %v1618_v62, 2 }
 0x356   : > { %v1620_v0 = vadd.f32 %v1619_v63, %v1618_v62 }
 0x357   : > { %v2100_v1 = vpop.eup %2099 }
 0x358   : > { %v1080_v2 = vmul.f32 %v2100_v1, %v1078_v57  ;;  %v1621_v3 = vrot.slane %v1620_v0, 1 }
 0x35a   : > { %v1082_v7 = vsel %vm1081_vm2, %v1078_v57, %v1080_v2  ;;  %v1622_v8 = vadd.f32 %v1621_v3, %v1620_v0 }
 0x35b   : > { %v1085_v9 = vsel %vm1083_vm3, %v1084_v4, %v1082_v7 }
 0x35c   : > { %1087 = vst.msk [vmem:[#allocation5] sm:$0x1] %vm1086_vm1, %v1085_v9  ;;  %2101 = vrsqrt.f32 %v1622_v8  ;;  %vm1625_vm4 = vcmp.eq.f32.partialorder %v1622_v8, inf  ;;  %v1628_v12 = vand.u32 2147483648, %v1622_v8  ;;  %vm1627_vm5 = vcmp.eq.f32.partialorder %v1622_v8, 0.0 }
 0x366   : > { %v2102_v10 = vpop.eup %2101 }
 0x367   : > { %v1624_v11 = vmul.f32 %v2102_v10, %v1622_v8 }
 0x369   : > { %v1626_v13 = vsel %vm1625_vm4, %v1622_v8, %v1624_v11 }
 0x36a   : > { %v1629_v14 = vsel %vm1627_vm5, %v1628_v12, %v1626_v13 }
 0x36b   : > { %1630 = vst.msk [vmem:[#allocation7] sm:$0x1] %vm1086_vm1, %v1629_v14 }
 0x36c PF: > { %1637 = sbr.rel (!%p2331_p3) target bundleno = 883 (0x373), region = 64  ;;  %s1838_s20 = sshll.u32 (%p2331_p3), %s2219_s15, 3  ;;  %v1672_v15 = vld [vmem:[%s2386_s28] sm:$0xff] (%p2331_p3)  ;;  %v1674_v16 = vld [vmem:[%s2386_s28 + $0x8] sm:$0xff] (%p2331_p3) }
 0x36d   : > { %s1642_s26 = scalar_lea.vmem (%p2331_p3), %s2525_s7, %s1838_s20 }
 0x36e   : > { %1673 = vst [vmem:[%s1642_s26] sm:$0xff] (%p2331_p3), %v1672_v15  ;;  %1675 = vst [vmem:[%s1642_s26 + $0x30] sm:$0xff] (%p2331_p3), %v1674_v16 }
 0x373 PF: > { %s2233_s27 = smov [#allocation5]   ;;  %s2234_s29 = smov [#allocation3]  }
 0x374   : > { %s1702_s13 = sshll.u32 %s2233_s27, 4  ;;  %s1688_s22 = sshll.u32 %s2234_s29, 4  ;;  %s1703_s13 = int_to_ptr.vmem [resolvable:$true] %s1702_s13  ;;  %s1689_s22 = int_to_ptr.vmem [resolvable:$true] %s1688_s22 }
 0x375   : > { %s2103_s30 = scalar_lea.vmem %s1703_s13, 16  ;;  %s2109_s15 = scalar_lea.vmem %s1703_s13, 32 }
 0x376   : > { %p2104_p10 = scmp.ne.s32.totalorder %s1703_s13, %s2103_s30  ;;  %p2110_p13 = scmp.lt.s32.totalorder %s1703_s13, %s1703_s13 }
 0x377   : > { %p2111_p0 = scmp.lt.s32.totalorder %s2109_s15, %s2103_s30 }
 0x378   : > { %p2105_p11 = pnand %p2104_p10, %p2323_p2 }
 0x379   : > { %p2112_p1 = por %p2111_p0, %p2110_p13 }
 0x37a   : > { %p2106_p12 = pneg %p2105_p11 }
 0x37c   : > { %p2113_p3 = pnand %p2112_p1, %p2106_p12 }
 0x37e   : > { %2116 = shalt.err (!%p2113_p3)
}
 0x37f   : > { %s2117_s12 = scalar_lea.hbm %s2527_s9, 16 }
 0x380   : > { %p2118_p4 = scmp.ne.s32.totalorder %s2527_s9, %s2117_s12  ;;  %p2123_p7 = scmp.lt.u32.totalorder %s2117_s12, %s2527_s9 }
 0x382   : > { %p2119_p5 = pnand %p2118_p4, %p2323_p2 }
 0x384   : > { %p2120_p6 = pneg %p2119_p5 }
 0x386   : > { %p2125_p8 = pnand %p2123_p7, %p2120_p6 }
 0x388   : > { %2128 = shalt.err (!%p2125_p8)
}
 0x389   : > { %2032 = dma.vmem_to_hbm [thread:$0]  (%p2323_p2), %s1703_s13, 16, %s2527_s9, [#allocation6]  }
 0x38a   : > { %s2129_s29 = scalar_lea.vmem %s1689_s22, 256  ;;  %p2136_p12 = scmp.lt.s32.totalorder %s1689_s22, %s1689_s22 }
 0x38b   : > { %p2130_p9 = scmp.ne.s32.totalorder %s1689_s22, %s2129_s29  ;;  %p2137_p13 = scmp.lt.s32.totalorder %s2129_s29, %s2129_s29 }
 0x38d   : > { %p2131_p10 = pnand %p2130_p9, %p2323_p2  ;;  %p2138_p0 = por %p2137_p13, %p2136_p12 }
 0x38f   : > { %p2132_p11 = pneg %p2131_p10 }
 0x391   : > { %p2139_p1 = pnand %p2138_p0, %p2132_p11 }
 0x393   : > { %2142 = shalt.err (!%p2139_p1)
}
 0x394   : > { %s2143_s28 = scalar_lea.hbm %s2526_s8, 256 }
 0x395   : > { %p2144_p3 = scmp.ne.s32.totalorder %s2526_s8, %s2143_s28  ;;  %p2149_p6 = scmp.lt.u32.totalorder %s2143_s28, %s2526_s8 }
 0x397   : > { %p2145_p4 = pnand %p2144_p3, %p2323_p2 }
 0x399   : > { %p2146_p5 = pneg %p2145_p4 }
 0x39b   : > { %p2151_p7 = pnand %p2149_p6, %p2146_p5 }
 0x39d   : > { %2154 = shalt.err (!%p2151_p7)
}
 0x39e   : > { %s2235_s20 = smov 128   ;;  %s2236_s23 = smov 8  }
 0x39f   : > { %2030 = dma.vmem_to_hbm [thread:$0]  (%p2323_p2), %s1689_s22, 256, %s2526_s8, [#allocation4], %s2235_s20, %s2235_s20, %s2236_s23  }
 0x3a0   : > { %s2237_s27 = smov [#allocation7]  }
 0x3a1   : > { %s1713_s29 = sshll.u32 %s2237_s27, 4  ;;  %s1714_s29 = int_to_ptr.vmem [resolvable:$true] %s1713_s29 }
 0x3a2   : > { %s2155_s30 = scalar_lea.vmem %s1714_s29, 16  ;;  %s2161_s15 = scalar_lea.vmem %s1714_s29, 32 }
 0x3a3   : > { %p2156_p8 = scmp.ne.s32.totalorder %s1714_s29, %s2155_s30  ;;  %p2162_p11 = scmp.lt.s32.totalorder %s1714_s29, %s1714_s29 }
 0x3a4   : > { %p2163_p12 = scmp.lt.s32.totalorder %s2161_s15, %s2155_s30 }
 0x3a5   : > { %p2157_p9 = pnand %p2156_p8, %p2323_p2 }
 0x3a6   : > { %p2164_p13 = por %p2163_p12, %p2162_p11 }
 0x3a7   : > { %p2158_p10 = pneg %p2157_p9 }
 0x3a9   : > { %p2165_p0 = pnand %p2164_p13, %p2158_p10 }
 0x3ab   : > { %2168 = shalt.err (!%p2165_p0)
}
 0x3ac   : > { %s2169_s12 = scalar_lea.hbm %s2528_s10, 16 }
 0x3ad   : > { %p2170_p1 = scmp.ne.s32.totalorder %s2528_s10, %s2169_s12  ;;  %p2175_p5 = scmp.lt.u32.totalorder %s2169_s12, %s2528_s10 }
 0x3af   : > { %p2171_p3 = pnand %p2170_p1, %p2323_p2 }
 0x3b1   : > { %p2172_p4 = pneg %p2171_p3 }
 0x3b3   : > { %p2177_p6 = pnand %p2175_p5, %p2172_p4 }
 0x3b5   : > { %2180 = shalt.err (!%p2177_p6)
}
 0x3b6   : > { %2034 = dma.vmem_to_hbm [thread:$0]  (%p2323_p2), %s1714_s29, 16, %s2528_s10, [#allocation6]  }
 0x3b7   : > { %2202 = dma.done.wait (%p2323_p2), [#allocation4], 256  }
 0x3b8   : > { %2204 = vsyncadd (%p2323_p2), [#allocation4], 4294967040 }
 0x3b9   : > { %2206 = dma.done.wait (%p2323_p2), [#allocation6], 32  }
 0x3ba   : > { %2208 = vsyncadd (%p2323_p2), [#allocation6], 4294967264 }
 0x3bb PF: > { %s23_s17 = sadd.s32 1, %s2227_s17   ;;  %s2533_s13 = smov %s2215_s14 }
 0x3bc   : > { %p20_p7 = scmp.ge.s32.totalorder %s23_s17, 8   ;;  %s2534_s14 = smov %s2340_s24 }
 0x3bd   : > { %s2535_s15 = smov %s2223_s16  ;;  %s2536_s16 = smov %s2538_s19 }
 0x3be   :  { %22 = sbr.rel (!%p20_p7) target bundleno = 4 (0x4), region = 154 }
 0x3c5   :  { %1741 = vsyncpa [#allocation4], 1 }
 0x3c6   :  { %1743 = vsyncpa [#allocation4 + $0x1], 1 }
 0x3c7   :  { %1744 = vsyncpa [#allocation6], 1 }

</bundles_post_ra>
